<compile_context>
chip_gen: v5e
topology: v5e:2x2
jax: 0.10.0
libtpu: 0.0.40
codegen_flags: <defaults>
</compile_context>

<pallas_src>
import jax
import jax.numpy as jnp
from jax import lax
from jax.experimental import pallas as pl
from jax.experimental.pallas import tpu as pltpu

IN_FEATURE = 32
HIDDEN = 1024
NEG_SLOPE = 0.01   # nn.LeakyReLU() default
LANES = 128


def _round_up(x, m):
    return ((x + m - 1) // m) * m


def _leaky(h):
    return jnp.where(h > 0, h, NEG_SLOPE * h)


def _adv_kernel(x_ref, w1_ref, b1_ref, w2_ref, b2_ref, w3_ref, b3_ref,
                o_ref, h1_ref, acc_ref):
    n = pl.program_id(1)

    # ---- first chunk: layer 1 (bf16 MXU, f32 accumulate) + LeakyReLU,
    #      stash h1 as bf16 in VMEM scratch, zero the layer-3 accumulator ----
    @pl.when(n == 0)
    def _():
        h1 = jnp.dot(x_ref[...], w1_ref[...],
                     preferred_element_type=jnp.float32)       # (bm, 1024)
        h1 = _leaky(h1 + b1_ref[...])
        h1_ref[...] = h1.astype(jnp.bfloat16)                  # dropout1: identity
        acc_ref[...] = jnp.zeros_like(acc_ref)

    # ---- layer 2, one column chunk of W2: (bm, 1024) @ (1024, C) bf16 -> f32 ----
    h2 = jnp.dot(h1_ref[...], w2_ref[...],
                 preferred_element_type=jnp.float32)           # (bm, C)
    h2 = _leaky(h2 + b2_ref[...])                              # dropout2: identity

    # ---- layer-3 partial: contract the chunk dim, (1, C) x (bm, C) -> (1, bm).
    #      Result lands batch-on-lanes, so no transpose is ever needed. ----
    part = lax.dot_general(w3_ref[...], h2.astype(jnp.bfloat16),
                           dimension_numbers=(((1,), (1,)), ((), ())),
                           preferred_element_type=jnp.float32)  # (1, bm)
    acc_ref[...] += part

    # ---- last chunk: bias + numerically-stable sigmoid (tanh -> EUP),
    #      lane-dense (1, bm) store ----
    @pl.when(n == pl.num_programs(1) - 1)
    def _():
        logit = acc_ref[...] + b3_ref[0]                       # (1, bm)
        o_ref[...] = 0.5 * (jnp.tanh(0.5 * logit) + 1.0)


def _choose_tiling(B, bm):
    bm_eff = min(bm, _round_up(B, LANES))      # always a multiple of 128
    B_pad = _round_up(B, bm_eff)
    nt = B_pad // bm_eff
    # v7x has 2 TensorCores: prefer an even tile count so the "parallel" axis
    # splits evenly (harmless on single-TC v5e/v6e).
    if nt > 1 and nt % 2 == 1:
        bm_even = _round_up(-(-B // (nt + 1)), LANES)
        if bm_even >= LANES:
            B_pad_even = _round_up(B, bm_even)
            nt_even = B_pad_even // bm_even
            if nt_even % 2 == 0:
                bm_eff, B_pad, nt = bm_even, B_pad_even, nt_even
    return bm_eff, B_pad, nt


def adversarial_network(x, w1, b1, w2, b2, w3, b3, *, bm=512):
    """x: (B, F) f32.  w1: (F,1024), w2: (1024,1024), w3: (1024,1) in (in, out)
    layout; b1/b2: (1,1024); b3: (1,1).  Returns (B, 1) f32."""
    B, F = x.shape
    assert w1.shape == (F, HIDDEN)
    assert w2.shape == (HIDDEN, HIDDEN)
    assert w3.shape == (HIDDEN, 1)

    bm_eff, B_pad, num_tiles = _choose_tiling(B, bm)

    # Small batch (<= 2 tiles): stream W2 in 4 column chunks so the weight DMA
    # overlaps layer-2 compute.  Large batch: single chunk -> W2 stays resident.
    n_chunks = 4 if num_tiles <= 2 else 1
    chunk = HIDDEN // n_chunks

    # Layout / dtype plumbing (wrapper side, not compute-hoisting):
    x_b = x.astype(jnp.bfloat16)
    if B_pad != B:
        x_b = jnp.pad(x_b, ((0, B_pad - B), (0, 0)))
    w1_b = w1.astype(jnp.bfloat16)
    w2_b = w2.astype(jnp.bfloat16)
    w3_row = jnp.reshape(w3, (1, HIDDEN)).astype(jnp.bfloat16)
    b1_r = jnp.reshape(b1, (1, HIDDEN)).astype(jnp.float32)
    b2_r = jnp.reshape(b2, (1, HIDDEN)).astype(jnp.float32)
    b3_s = jnp.reshape(b3, (1,)).astype(jnp.float32)           # scalar -> SMEM

    w2_reads = num_tiles if n_chunks > 1 else 1
    flops = 2 * B_pad * (F * HIDDEN + HIDDEN * HIDDEN + HIDDEN)
    bytes_accessed = (B_pad * F * 2 + F * HIDDEN * 2 + HIDDEN * 4
                      + w2_reads * HIDDEN * HIDDEN * 2
                      + HIDDEN * 4 + HIDDEN * 2 + 4
                      + B_pad * 4)
    ce = pl.CostEstimate(flops=int(flops),
                         transcendentals=int(B_pad),
                         bytes_accessed=int(bytes_accessed))

    out = pl.pallas_call(
        _adv_kernel,
        out_shape=jax.ShapeDtypeStruct((1, B_pad), jnp.float32),
        grid_spec=pltpu.PrefetchScalarGridSpec(
            num_scalar_prefetch=0,
            grid=(num_tiles, n_chunks),
            in_specs=[
                pl.BlockSpec((bm_eff, F), lambda i, n: (i, 0)),      # x (bf16)
                pl.BlockSpec((F, HIDDEN), lambda i, n: (0, 0)),      # W1 (bf16)
                pl.BlockSpec((1, HIDDEN), lambda i, n: (0, 0)),      # b1 (f32)
                pl.BlockSpec((HIDDEN, chunk), lambda i, n: (0, n)),  # W2 chunk (bf16)
                pl.BlockSpec((1, chunk), lambda i, n: (0, n)),       # b2 chunk
                pl.BlockSpec((1, chunk), lambda i, n: (0, n)),       # w3 chunk (bf16)
                pl.BlockSpec(memory_space=pltpu.MemorySpace.SMEM),   # b3 scalar
            ],
            out_specs=pl.BlockSpec((1, bm_eff), lambda i, n: (0, i)),
            scratch_shapes=[
                pltpu.VMEM((bm_eff, HIDDEN), jnp.bfloat16),          # h1
                pltpu.VMEM((1, bm_eff), jnp.float32),                # layer-3 acc
            ],
        ),
        compiler_params=pltpu.CompilerParams(
            dimension_semantics=("parallel", "arbitrary"),
            vmem_limit_bytes=32 * 1024 * 1024,
        ),
        cost_estimate=ce,
    )(x_b, w1_b, b1_r, w2_b, b2_r, w3_row, b3_s)

    return out[0, :B][:, None]


def init_params(key, in_feature=IN_FEATURE):
    # Matches the PyTorch init: weight ~ N(0, sigma), bias = 0.
    k1, k2, k3 = jax.random.split(key, 3)
    # PyTorch Linear weight is (out, in); we store transposed (in, out).
    w1 = (jax.random.normal(k1, (HIDDEN, in_feature), jnp.float32) * 0.01).T
    w2 = (jax.random.normal(k2, (HIDDEN, HIDDEN), jnp.float32) * 0.01).T
    w3 = (jax.random.normal(k3, (1, HIDDEN), jnp.float32) * 0.3).T
    b1 = jnp.zeros((1, HIDDEN), jnp.float32)
    b2 = jnp.zeros((1, HIDDEN), jnp.float32)
    b3 = jnp.zeros((1, 1), jnp.float32)
    return w1, b1, w2, b2, w3, b3


def reference(x, w1, b1, w2, b2, w3, b3):
    # Mirrors the kernel's mixed precision (bf16 matmul inputs, f32 accumulation).
    h = jnp.dot(x.astype(jnp.bfloat16), w1.astype(jnp.bfloat16),
                preferred_element_type=jnp.float32) + b1
    h = jnp.where(h > 0, h, NEG_SLOPE * h)
    h = jnp.dot(h.astype(jnp.bfloat16), w2.astype(jnp.bfloat16),
                preferred_element_type=jnp.float32) + b2
    h = jnp.where(h > 0, h, NEG_SLOPE * h)
    logit = jnp.dot(h.astype(jnp.bfloat16), w3.astype(jnp.bfloat16),
                    preferred_element_type=jnp.float32) + b3
    return jax.nn.sigmoid(logit)


if __name__ == "__main__":
    key = jax.random.PRNGKey(0)
    kx, kp = jax.random.split(key)

    B = 16
    x = jax.random.normal(kx, (B, IN_FEATURE), jnp.float32)
    params = init_params(kp, IN_FEATURE)

    out = jax.block_until_ready(adversarial_network(x, *params))
    ref = reference(x, *params)

    assert out.shape == (B, 1)
    err = float(jnp.max(jnp.abs(out - ref)))
    assert err < 1e-4, f"max err {err}"

    print("KERNEL_OK")
</pallas_src>

<mosaic_0001>
module attributes {stable_mosaic.version = 11 : i64} {
  func.func @_adv_kernel(%arg0: i32, %arg1: i32, %arg2: memref<128x32xbf16, #tpu.memory_space<vmem>>, %arg3: memref<32x1024xbf16, #tpu.memory_space<vmem>>, %arg4: memref<1x1024xf32, #tpu.memory_space<vmem>>, %arg5: memref<1024x256xbf16, #tpu.memory_space<vmem>>, %arg6: memref<1x256xf32, #tpu.memory_space<vmem>>, %arg7: memref<1x256xbf16, #tpu.memory_space<vmem>>, %arg8: memref<1xf32, #tpu.memory_space<smem>>, %arg9: memref<1x128xf32, #tpu.memory_space<vmem>>, %arg10: memref<128x1024xbf16, #tpu.memory_space<vmem>>, %arg11: memref<1x128xf32, #tpu.memory_space<vmem>>) attributes {dimension_semantics = [#tpu.dimension_semantics<parallel>, #tpu.dimension_semantics<arbitrary>], iteration_bounds = array<i64: 1, 4>, scalar_prefetch = 0 : i64, scratch_operands = 2 : i64, tpu.core_type = #tpu.core_type<tc>, window_params = [{transform_indices = @transform_0, window_bounds = array<i64: 128, 32>}, {pipeline_mode = #tpu.pipeline_mode<synchronous>, transform_indices = @transform_1, window_bounds = array<i64: 32, 1024>}, {pipeline_mode = #tpu.pipeline_mode<synchronous>, transform_indices = @transform_2, window_bounds = array<i64: 1, 1024>}, {transform_indices = @transform_3, window_bounds = array<i64: 1024, 256>}, {transform_indices = @transform_4, window_bounds = array<i64: 1, 256>}, {transform_indices = @transform_5, window_bounds = array<i64: 1, 256>}, {transform_indices = @transform_6, window_bounds = array<i64: 1>}, {transform_indices = @transform_7, window_bounds = array<i64: 1, 128>}]} {
    %c0_i32 = arith.constant 0 : i32
    %0 = arith.cmpi eq, %arg1, %c0_i32 : i32
    %1 = arith.extui %0 : i1 to i32
    %c0_i32_0 = arith.constant 0 : i32
    %2 = arith.cmpi ne, %1, %c0_i32_0 : i32
    scf.if %2 {
      %c0_16 = arith.constant 0 : index
      %c0_17 = arith.constant 0 : index
      %23 = vector.load %arg2[%c0_16, %c0_17] : memref<128x32xbf16, #tpu.memory_space<vmem>>, vector<128x32xbf16>
      %c0_18 = arith.constant 0 : index
      %c0_19 = arith.constant 0 : index
      %24 = vector.load %arg3[%c0_18, %c0_19] : memref<32x1024xbf16, #tpu.memory_space<vmem>>, vector<32x1024xbf16>
      %cst_20 = arith.constant dense<0.000000e+00> : vector<128x1024xf32>
      %25 = tpu.matmul %23, %24, %cst_20 {dimension_numbers = #tpu.dot_dimension_numbers<[1], [0], [0], [1], [0, 0, 1, 1], [], []>} : vector<128x32xbf16>, vector<32x1024xbf16>, vector<128x1024xf32> -> vector<128x1024xf32>
      %c0_21 = arith.constant 0 : index
      %c0_22 = arith.constant 0 : index
      %26 = vector.load %arg4[%c0_21, %c0_22] : memref<1x1024xf32, #tpu.memory_space<vmem>>, vector<1x1024xf32>
      %27 = vector.broadcast %26 : vector<1x1024xf32> to vector<128x1024xf32>
      %28 = arith.addf %25, %27 : vector<128x1024xf32>
      %cst_23 = arith.constant 0.000000e+00 : f32
      %29 = vector.broadcast %cst_23 : f32 to vector<128x1024xf32>
      %30 = arith.cmpf ogt, %28, %29 : vector<128x1024xf32>
      %cst_24 = arith.constant 0.00999999977 : f32
      %31 = vector.broadcast %cst_24 : f32 to vector<128x1024xf32>
      %32 = arith.mulf %31, %28 : vector<128x1024xf32>
      %33 = arith.select %30, %28, %32 : vector<128x1024xi1>, vector<128x1024xf32>
      %34 = arith.truncf %33 : vector<128x1024xf32> to vector<128x1024xbf16>
      %c0_25 = arith.constant 0 : index
      %c0_26 = arith.constant 0 : index
      %35 = vector.load %arg10[%c0_25, %c0_26] : memref<128x1024xbf16, #tpu.memory_space<vmem>>, vector<128x1024xbf16>
      tpu.vector_store %arg10[%c0_25, %c0_26], %34 {strides = array<i32>} : memref<128x1024xbf16, #tpu.memory_space<vmem>>, vector<128x1024xbf16>,
      %cst_27 = arith.constant 0.000000e+00 : f32
      %36 = vector.broadcast %cst_27 : f32 to vector<1x128xf32>
      %c0_28 = arith.constant 0 : index
      %c0_29 = arith.constant 0 : index
      %37 = vector.load %arg11[%c0_28, %c0_29] : memref<1x128xf32, #tpu.memory_space<vmem>>, vector<1x128xf32>
      tpu.vector_store %arg11[%c0_28, %c0_29], %36 {strides = array<i32>} : memref<1x128xf32, #tpu.memory_space<vmem>>, vector<1x128xf32>,
    } else {
    }
    %c0 = arith.constant 0 : index
    %c0_1 = arith.constant 0 : index
    %3 = vector.load %arg10[%c0, %c0_1] : memref<128x1024xbf16, #tpu.memory_space<vmem>>, vector<128x1024xbf16>
    %c0_2 = arith.constant 0 : index
    %c0_3 = arith.constant 0 : index
    %4 = vector.load %arg5[%c0_2, %c0_3] : memref<1024x256xbf16, #tpu.memory_space<vmem>>, vector<1024x256xbf16>
    %cst = arith.constant dense<0.000000e+00> : vector<128x256xf32>
    %5 = tpu.matmul %3, %4, %cst {dimension_numbers = #tpu.dot_dimension_numbers<[1], [0], [0], [1], [0, 0, 1, 1], [], []>} : vector<128x1024xbf16>, vector<1024x256xbf16>, vector<128x256xf32> -> vector<128x256xf32>
    %c0_4 = arith.constant 0 : index
    %c0_5 = arith.constant 0 : index
    %6 = vector.load %arg6[%c0_4, %c0_5] : memref<1x256xf32, #tpu.memory_space<vmem>>, vector<1x256xf32>
    %7 = vector.broadcast %6 : vector<1x256xf32> to vector<128x256xf32>
    %8 = arith.addf %5, %7 : vector<128x256xf32>
    %cst_6 = arith.constant 0.000000e+00 : f32
    %9 = vector.broadcast %cst_6 : f32 to vector<128x256xf32>
    %10 = arith.cmpf ogt, %8, %9 : vector<128x256xf32>
    %cst_7 = arith.constant 0.00999999977 : f32
    %11 = vector.broadcast %cst_7 : f32 to vector<128x256xf32>
    %12 = arith.mulf %11, %8 : vector<128x256xf32>
    %13 = arith.select %10, %8, %12 : vector<128x256xi1>, vector<128x256xf32>
    %c0_8 = arith.constant 0 : index
    %c0_9 = arith.constant 0 : index
    %14 = vector.load %arg7[%c0_8, %c0_9] : memref<1x256xbf16, #tpu.memory_space<vmem>>, vector<1x256xbf16>
    %15 = arith.truncf %13 : vector<128x256xf32> to vector<128x256xbf16>
    %cst_10 = arith.constant dense<0.000000e+00> : vector<1x128xf32>
    %16 = tpu.matmul %14, %15, %cst_10 {dimension_numbers = #tpu.dot_dimension_numbers<[1], [1], [0], [0], [0, 0, 1, 0], [], []>} : vector<1x256xbf16>, vector<128x256xbf16>, vector<1x128xf32> -> vector<1x128xf32>
    %c0_11 = arith.constant 0 : index
    %c0_12 = arith.constant 0 : index
    %17 = vector.load %arg11[%c0_11, %c0_12] : memref<1x128xf32, #tpu.memory_space<vmem>>, vector<1x128xf32>
    %18 = arith.addf %17, %16 : vector<1x128xf32>
    %c0_13 = arith.constant 0 : index
    %c0_14 = arith.constant 0 : index
    %19 = vector.load %arg11[%c0_13, %c0_14] : memref<1x128xf32, #tpu.memory_space<vmem>>, vector<1x128xf32>
    tpu.vector_store %arg11[%c0_13, %c0_14], %18 {strides = array<i32>} : memref<1x128xf32, #tpu.memory_space<vmem>>, vector<1x128xf32>,
    %c3_i32 = arith.constant 3 : i32
    %20 = arith.cmpi eq, %arg1, %c3_i32 : i32
    %21 = arith.extui %20 : i1 to i32
    %c0_i32_15 = arith.constant 0 : i32
    %22 = arith.cmpi ne, %21, %c0_i32_15 : i32
    scf.if %22 {
      %c0_16 = arith.constant 0 : index
      %c0_17 = arith.constant 0 : index
      %23 = vector.load %arg11[%c0_16, %c0_17] : memref<1x128xf32, #tpu.memory_space<vmem>>, vector<1x128xf32>
      %c0_18 = arith.constant 0 : index
      %24 = memref.load %arg8[%c0_18] : memref<1xf32, #tpu.memory_space<smem>>
      %25 = vector.broadcast %24 : f32 to vector<1x128xf32>
      %26 = arith.addf %23, %25 : vector<1x128xf32>
      %cst_19 = arith.constant 5.000000e-01 : f32
      %27 = vector.broadcast %cst_19 : f32 to vector<1x128xf32>
      %28 = arith.mulf %27, %26 : vector<1x128xf32>
      %29 = math.tanh %28 : vector<1x128xf32>
      %cst_20 = arith.constant 1.000000e+00 : f32
      %30 = vector.broadcast %cst_20 : f32 to vector<1x128xf32>
      %31 = arith.addf %29, %30 : vector<1x128xf32>
      %cst_21 = arith.constant 5.000000e-01 : f32
      %32 = vector.broadcast %cst_21 : f32 to vector<1x128xf32>
      %33 = arith.mulf %32, %31 : vector<1x128xf32>
      %c0_22 = arith.constant 0 : index
      %c0_23 = arith.constant 0 : index
      %34 = vector.load %arg9[%c0_22, %c0_23] : memref<1x128xf32, #tpu.memory_space<vmem>>, vector<1x128xf32>
      tpu.vector_store %arg9[%c0_22, %c0_23], %33 {strides = array<i32>} : memref<1x128xf32, #tpu.memory_space<vmem>>, vector<1x128xf32>,
    } else {
    }
    return
  }
  func.func @transform_0(%arg0: i32, %arg1: i32) -> (i32, i32) {
    %c0_i32 = arith.constant 0 : i32
    %c0_i32_0 = arith.constant 0 : i32
    return %arg0, %c0_i32 : i32, i32
  }
  func.func @transform_1(%arg0: i32, %arg1: i32) -> (i32, i32) {
    %c0_i32 = arith.constant 0 : i32
    %c0_i32_0 = arith.constant 0 : i32
    %c0_i32_1 = arith.constant 0 : i32
    return %c0_i32, %c0_i32_0 : i32, i32
  }
  func.func @transform_2(%arg0: i32, %arg1: i32) -> (i32, i32) {
    %c0_i32 = arith.constant 0 : i32
    %c0_i32_0 = arith.constant 0 : i32
    %c0_i32_1 = arith.constant 0 : i32
    return %c0_i32, %c0_i32_0 : i32, i32
  }
  func.func @transform_3(%arg0: i32, %arg1: i32) -> (i32, i32) {
    %c0_i32 = arith.constant 0 : i32
    %c0_i32_0 = arith.constant 0 : i32
    return %c0_i32, %arg1 : i32, i32
  }
  func.func @transform_4(%arg0: i32, %arg1: i32) -> (i32, i32) {
    %c0_i32 = arith.constant 0 : i32
    %c0_i32_0 = arith.constant 0 : i32
    return %c0_i32, %arg1 : i32, i32
  }
  func.func @transform_5(%arg0: i32, %arg1: i32) -> (i32, i32) {
    %c0_i32 = arith.constant 0 : i32
    %c0_i32_0 = arith.constant 0 : i32
    return %c0_i32, %arg1 : i32, i32
  }
  func.func @transform_6(%arg0: i32, %arg1: i32) -> i32 {
    %c0_i32 = arith.constant 0 : i32
    %c0_i32_0 = arith.constant 0 : i32
    return %c0_i32 : i32
  }
  func.func @transform_7(%arg0: i32, %arg1: i32) -> (i32, i32) {
    %c0_i32 = arith.constant 0 : i32
    %c0_i32_0 = arith.constant 0 : i32
    return %c0_i32, %arg0 : i32, i32
  }
}

</mosaic_0001>

<bundles_post_ra>
// kernel: tpu_custom_call.1
= control target key start
LH: loop header
LB: loop body
LE: loop exit
PB: predicated region body
PF: predicated region fallthrough
CT: control target
= control target key end

     0   :  { %s6573_s0 = inlined_call_operand.vmem [shape: bf16[128,32], index: 0, kind: input, shape index: {}]   ;;  %s6574_s1 = inlined_call_operand.hbm [shape: bf16[32,1024], index: 1, kind: input, shape index: {}]   ;;  %s6575_s2 = inlined_call_operand.hbm [shape: f32[1,1024], index: 2, kind: input, shape index: {}]   ;;  %s6576_s3 = inlined_call_operand.hbm [shape: bf16[1024,1024], index: 3, kind: input, shape index: {}]   ;;  %s6577_s4 = inlined_call_operand.hbm [shape: f32[1,1024], index: 4, kind: input, shape index: {}]   ;;  %s6578_s5 = inlined_call_operand.hbm [shape: bf16[1,1024], index: 5, kind: input, shape index: {}]   ;;  %s6579_s6 = inlined_call_operand.<no memory space> [shape: f32[1], index: 6, kind: input, shape index: {}]   ;;  %s6580_s7 = inlined_call_operand.hbm [shape: f32[1,128], index: 7, kind: output, shape index: {}]  }
   0x1   :  { %6617 = sst [smem:[#allocation54_spill]] %s6573_s0 }
   0x2   :  { %6618 = sst [smem:[#allocation55_spill]] %s6574_s1 }
   0x3   :  { %6619 = sst [smem:[#allocation56_spill]] %s6580_s7 }
   0x4   :  { %12 = sst [smem:[#allocation4]] %s6579_s6 }
   0x5   :  { %13 = vsyncpa [#allocation6], 0 }
   0x6   :  { %14 = vsyncpa [#allocation9], 0 }
   0x7   :  { %15 = vsyncpa [#allocation7], 0  ;;  %s5347_s26 = smov 0   ;;  %s5349_s27 = smov 0  }
   0x8   :  { %s5351_s28 = smov 0   ;;  %s5353_s29 = smov 0  }
   0x9   :  { %s5355_s30 = smov 0   ;;  %s5357_s8 = smov 0  }
   0xa LB: > { %6620 = sst [smem:[#allocation18_spill]] %s5286_s29  ;;  %s5376_s6 = sadd.s32 4294967295, %s5294_s8   ;;  %s5294_s8 = sphi %s5357_s8, %s21_s8   ;;  %s5290_s30 = sphi %s5355_s30, %s6705_s30   ;;  %s5286_s29 = sphi %s5353_s29, %s6704_s29   ;;  %s5282_s28 = sphi %s5351_s28, %s6703_s28   ;;  %s5278_s27 = sphi %s5349_s27, %s6702_s27   ;;  %s5274_s26 = sphi %s5347_s26, %s6701_s26  }
   0xb   : > { %6621 = sst [smem:[#allocation19_spill]] %s5294_s8  ;;  %s108_s9 = sadd.s32 1, %s5282_s28 }
   0xc   : > { %p115_p0 = scmp.ne.s32.totalorder %s5282_s28, %s5278_s27  ;;  %p116_p1 = scmp.eq.s32.totalorder %s5294_s8, 0 }
   0xd   : > { %p121_p2 = scmp.ne.s32.totalorder %s5278_s27, %s5274_s26  ;;  %p122_p3 = scmp.eq.s32.totalorder %s5376_s6, 0 }
   0xe   : > { %p5384_p4 = por %p116_p1, %p115_p0  ;;  %p3784_p5 = scmp.ge.s32.totalorder %s5294_s8, 1 }
   0xf   : > { %p5391_p6 = por %p122_p3, %p121_p2  ;;  %p231_p7 = scmp.lt.s32.totalorder %s5294_s8, 5 }
  0x10   : > { %s6624_s1 = sld [smem:[#allocation55_spill]]  ;;  %s5296_s16 = smov [#allocation5]  }
  0x11   : > { %p5399_p8 = pnand %p3784_p5, %p231_p7  ;;  %s253_s17 = sshll.u32 %s5296_s16, 4  ;;  %s254_s17 = int_to_ptr.vmem [resolvable:$true] %s253_s17 }
  0x12   : > { %p4990_p11 = scmp.lt.s32.totalorder %s5294_s8, 4  ;;  %s5297_s19 = smov 512  }
  0x13   : > { %p4971_p9 = pneg %p5399_p8  ;;  %s5298_s20 = smov 32  }
  0x14   : > { %p5416_p12 = pnand %p4990_p11, %p5384_p4  ;;  %s30_s22 = sadd.s32 1, %s5290_s30 }
  0x15   : > { %p5407_p10 = pnand %p4971_p9, %p122_p3  ;;  %p31_p13 = scmp.ge.s32.totalorder %s30_s22, 4 }
  0x16   : > { %s251_s14 = sshll.u32 %s6624_s1, 4  ;;  %s282_s23 = sand.u32 1, %s5294_s8   ;;  %s252_s14 = int_to_ptr.hbm [resolvable:$true] %s251_s14 }
  0x17   : > { %4974 = dma.hbm_to_vmem [thread:$0]  (!%p5407_p10), %s252_s14, 2048, %s254_s17, [#allocation6], %s5297_s19, %s5297_s19, %s5298_s20  }
  0x18   : > { %s6707_s22 = smov (%p31_p13, %s30_s22), 0  ;;  %s284_s24 = sand.u32 1, %s5282_s28  }
  0x19   : > { %6628 = sst [smem:[#allocation20_spill]] %s6707_s22  ;;  %s4736_s25 = sshll.u32 %s5290_s30, 3 }
  0x1a   : > { %s105_s26 = ssub.s32 %s5290_s30, %s6707_s22  ;;  %s3789_s12 = sshll.u32 %s284_s24, 10 }
  0x1b   : > { %p106_p0 = scmp.eq.s32.totalorder %s105_s26, 0  ;;  %s291_s10 = scalar_lea.hbm %s6576_s3, %s4736_s25 }
  0x1c   : > { %s286_s16 = scalar_lea.vmem [#allocation10], %s3789_s12  ;;  %s292_s1 = sshll.u32 %s291_s10, 4  ;;  %s293_s1 = int_to_ptr.hbm [resolvable:$true] %s292_s1 }
  0x1d   : > { %s294_s17 = sshll.u32 %s286_s16, 4  ;;  %s3792_s8 = sshll.u32 %s284_s24, 1  ;;  %s295_s17 = int_to_ptr.vmem [resolvable:$true] %s294_s17 }
  0x1e   : > { %s5434_s20 = scalar_select %p106_p0, %s5282_s28, %s108_s9  }
  0x1f   : > { %s283_s7 = scalar_lea.sflag [#allocation6], %s282_s23  ;;  %s5299_s0 = smov 128  }
  0x20   : > { %s5300_s29 = smov 8   ;;  %s3793_s26 = sshll.u32 %s5290_s30, 1 }
  0x21   : > { %4981 = dma.hbm_to_vmem [thread:$0]  (!%p5416_p12), %s293_s1, 16384, %s295_s17, %s283_s7, %s5297_s19, %s5299_s0, %s5300_s29  }
  0x22   : > { %s312_s25 = scalar_lea.hbm %s6577_s4, %s3793_s26  ;;  %s308_s12 = scalar_lea.vmem [#allocation11], %s3792_s8 }
  0x23   : > { %s316_s14 = sshll.u32 %s308_s12, 4  ;;  %s314_s9 = sshll.u32 %s312_s25, 4  ;;  %s317_s14 = int_to_ptr.vmem [resolvable:$true] %s316_s14  ;;  %s315_s9 = int_to_ptr.hbm [resolvable:$true] %s314_s9 }
  0x24   : > { %s266_s23 = sshll.u32 %s6575_s2, 4  ;;  %s5301_s24 = smov [#allocation8]   ;;  %s267_s23 = int_to_ptr.hbm [resolvable:$true] %s266_s23 }
  0x25   : > { %4984 = dma.hbm_to_vmem [thread:$0]  (!%p5416_p12), %s315_s9, 32, %s317_s14, %s283_s7  }
  0x26   : > { %s268_s0 = sshll.u32 %s5301_s24, 4  ;;  %s331_s19 = scalar_lea.hbm %s6578_s5, %s3793_s26  ;;  %s269_s0 = int_to_ptr.vmem [resolvable:$true] %s268_s0 }
  0x27   : > { %4977 = dma.hbm_to_vmem [thread:$0]  (!%p5407_p10), %s267_s23, 128, %s269_s0, [#allocation9]  }
  0x28   : > { %s333_s22 = sshll.u32 %s331_s19, 4  ;;  %s327_s17 = scalar_lea.vmem [#allocation12], %s3792_s8  ;;  %s334_s22 = int_to_ptr.hbm [resolvable:$true] %s333_s22 }
  0x29   : > { %s335_s13 = sshll.u32 %s327_s17, 4  ;;  %344 = sbr.rel (%p5399_p8) target bundleno = 1375 (0x55f), region = 48  ;;  %s336_s13 = int_to_ptr.vmem [resolvable:$true] %s335_s13 }
  0x2a   : > { %4987 = dma.hbm_to_vmem [thread:$0]  (!%p5416_p12), %s334_s22, 32, %s336_s13, %s283_s7  }
  0x2e   : > { %5257 = dma.done.wait (%p122_p3), [#allocation6], 2048  }
  0x2f   : > { %5259 = vsyncadd (%p122_p3), [#allocation6], 4294965248 }
  0x30   : > { %5261 = dma.done.wait (%p122_p3), [#allocation9], 128  }
  0x31   : > { %5263 = vsyncadd (%p122_p3), [#allocation9], 4294967168  ;;  %s356_s8 = sand.u32 1, %s5376_s6   ;;  %s358_s7 = sand.u32 1, %s5278_s27  }
  0x32   : > { %s3799_s18 = sshll.u32 %s358_s7, 10  ;;  %s357_s15 = scalar_lea.sflag [#allocation6], %s356_s8 }
  0x33   : > { %s5466_s21 = scalar_lea.vmem [#allocation10], %s3799_s18 }
  0x34   : > { %5265 = dma.done.wait (%p5391_p6), %s357_s15, 16448  }
  0x35   : > { %5267 = vsyncadd (%p5391_p6), %s357_s15, 4294950848  ;;  %s5472_s26 = sshll.u32 %s358_s7, 1  ;;  %s6629_s14 = sld [smem:[#allocation18_spill]] }
  0x36   : > { %s370_s25 = scalar_lea.vmem [#allocation11], %s5472_s26  ;;  %s380_s12 = scalar_lea.vmem [#allocation12], %s5472_s26 }
  0x3b   : > { %p3802_p1 = scmp.ne.s32.totalorder %s6629_s14, 0 }
  0x3c   : > { %s6630_s10 = sld [smem:[#allocation54_spill]] (!%p3802_p1) }
  0x3d   : > { %435 = sbr.rel (%p3802_p1) target bundleno = 467 (0x1d3), region = 72 }
  0x42   : > { %v3869_v0 = vld [vmem:[#allocation5 + $0x40] sm:$0xf]  ;;  %v4753_v2 = vld [vmem:[#allocation5 + $0x44] sm:$0xf]  ;;  %v3877_v5 = vld [vmem:[#allocation5 + $0x48] sm:$0xf] }
  0x43   : > { %v4757_v1 = vld [vmem:[#allocation5 + $0x5c] sm:$0xf0]  ;;  %v3871_v4 = vld [vmem:[#allocation5 + $0x60] sm:$0xf0]  ;;  %v4758_v6 = vld [vmem:[#allocation5 + $0x64] sm:$0xf0] }
  0x44   : > { %v3870_v3 = vor.u32 %v4757_v1, %v3869_v0  ;;  %v3874_v7 = vor.u32 %v4753_v2, %v3871_v4  ;;  %v3878_v8 = vor.u32 %v4758_v6, %v3877_v5  ;;  %v4754_v9 = vld [vmem:[#allocation5 + $0x4c] sm:$0xf]  ;;  %v3837_v11 = vld [vmem:[#allocation5] sm:$0xf]  ;;  %v4745_v14 = vld [vmem:[#allocation5 + $0x4] sm:$0xf] }
  0x45   : > { %v3879_v10 = vld [vmem:[#allocation5 + $0x68] sm:$0xf0]  ;;  %v4749_v13 = vld [vmem:[#allocation5 + $0x1c] sm:$0xf0]  ;;  %v3839_v15 = vld [vmem:[#allocation5 + $0x20] sm:$0xf0] }
  0x46   : > { %637 = vmatpush.bf16.msra.mxu0 %v3870_v3  ;;  %v3882_v12 = vor.u32 %v4754_v9, %v3879_v10  ;;  %686 = vmatpush.bf16.msra.mxu1 %v3874_v7  ;;  %v3838_v16 = vor.u32 %v4749_v13, %v3837_v11  ;;  %v3842_v17 = vor.u32 %v4745_v14, %v3839_v15  ;;  %v3845_v18 = vld [vmem:[#allocation5 + $0x8] sm:$0xf]  ;;  %v4746_v20 = vld [vmem:[#allocation5 + $0xc] sm:$0xf]  ;;  %v5480_v23 = vld [vmem:[%s6630_s10] sm:$0xff]  ;;  %vm606_vm0 = vcmask 261120  }
  0x47   : > { %735 = vmatpush.bf16.msra.mxu2 %v3878_v8  ;;  %v4750_v19 = vld [vmem:[#allocation5 + $0x24] sm:$0xf0]  ;;  %v3847_v22 = vld [vmem:[#allocation5 + $0x28] sm:$0xf0]  ;;  %v3893_v24 = vld [vmem:[#allocation5 + $0x58] sm:$0xf] }
  0x48   : > { %784 = vmatpush.bf16.msra.mxu3 %v3882_v12  ;;  %v3846_v21 = vor.u32 %v4750_v19, %v3845_v18  ;;  %v3850_v25 = vor.u32 %v4746_v20, %v3847_v22  ;;  %v4760_v26 = vld [vmem:[#allocation5 + $0x74] sm:$0xf0]  ;;  %v4756_v27 = vld [vmem:[#allocation5 + $0x5c] sm:$0xf]  ;;  %v3885_v31 = vld [vmem:[#allocation5 + $0x50] sm:$0xf] }
  0x49   : > { %v3895_v28 = vld [vmem:[#allocation5 + $0x78] sm:$0xf0]  ;;  %v3894_v29 = vor.u32 %v4760_v26, %v3893_v24  ;;  %v4759_v32 = vld [vmem:[#allocation5 + $0x6c] sm:$0xf0]  ;;  %v4755_v33 = vld [vmem:[#allocation5 + $0x54] sm:$0xf] }
  0x4a   : > { %638 = vmatpush.bf16.msra.mxu0 %v3838_v16  ;;  %v3898_v30 = vor.u32 %v4756_v27, %v3895_v28  ;;  %687 = vmatpush.bf16.msra.mxu1 %v3842_v17  ;;  %v3886_v34 = vor.u32 %v4759_v32, %v3885_v31  ;;  %v3887_v35 = vld [vmem:[#allocation5 + $0x70] sm:$0xf0]  ;;  %v5493_v37 = vld [vmem:[%s6630_s10 + $0x8] sm:$0xff]  ;;  %v5506_v38 = vld [vmem:[%s6630_s10 + $0x10] sm:$0xff] }
  0x4b   : > { %736 = vmatpush.bf16.msra.mxu2 %v3846_v21  ;;  %v3890_v36 = vor.u32 %v4755_v33, %v3887_v35  ;;  %v3861_v39 = vld [vmem:[#allocation5 + $0x18] sm:$0xf]  ;;  %v4748_v41 = vld [vmem:[#allocation5 + $0x1c] sm:$0xf]  ;;  %v3853_v44 = vld [vmem:[#allocation5 + $0x10] sm:$0xf] }
  0x4c   : > { %785 = vmatpush.bf16.msra.mxu3 %v3850_v25  ;;  %v4752_v40 = vld [vmem:[#allocation5 + $0x34] sm:$0xf0]  ;;  %v3863_v43 = vld [vmem:[#allocation5 + $0x38] sm:$0xf0]  ;;  %v4751_v45 = vld [vmem:[#allocation5 + $0x2c] sm:$0xf0] }
  0x4d   : > { %3899 = vmatmul.msk.bf16.vlgmr.msra.gmra.mxu0 %vm606_vm0, %v5480_v23  ;;  %3907 = vmatmul.msk.bf16.vlgmr.msra.gmra.mxu1 %vm606_vm0, %v5480_v23  ;;  %v3862_v42 = vor.u32 %v4752_v40, %v3861_v39  ;;  %v3866_v46 = vor.u32 %v4748_v41, %v3863_v43  ;;  %v3854_v47 = vor.u32 %v4751_v45, %v3853_v44  ;;  %v4747_v48 = vld [vmem:[#allocation5 + $0x14] sm:$0xf]  ;;  %v5545_v53 = vld [vmem:[%s6630_s10 + $0x28] sm:$0xff]  ;;  %v5558_v54 = vld [vmem:[%s6630_s10 + $0x30] sm:$0xff] }
  0x4e   : > { %3915 = vmatmul.msk.bf16.vlgmr.msra.gmra.mxu2 %vm606_vm0, %v5480_v23  ;;  %833 = vmatpush.bf16.msrb.mxu0 %v3886_v34  ;;  %v3855_v49 = vld [vmem:[#allocation5 + $0x30] sm:$0xf0]  ;;  %v5581_v56 = vld [vmem:[#allocation8] sm:$0xff] }
  0x4f   : > { %931 = vmatpush.bf16.msrb.mxu2 %v3894_v29  ;;  %3923 = vmatmul.msk.bf16.vlgmr.msra.gmra.mxu3 %vm606_vm0, %v5480_v23  ;;  %v3858_v50 = vor.u32 %v4747_v48, %v3855_v49  ;;  %v5519_v51 = vld [vmem:[%s6630_s10 + $0x18] sm:$0xff]  ;;  %v5532_v52 = vld [vmem:[%s6630_s10 + $0x20] sm:$0xff]  ;;  %v5584_v57 = vperm.slane %v5581_v56, 0  ;;  %v5587_v58 = vperm.slane %v5581_v56, 1  ;;  %v5598_v1 = vperm.slane %v5581_v56, 2 }
  0x50   : > { %980 = vmatpush.bf16.msrb.mxu3 %v3898_v30  ;;  %882 = vmatpush.bf16.msrb.mxu1 %v3890_v36  ;;  %v5571_v55 = vld [vmem:[%s6630_s10 + $0x38] sm:$0xff]  ;;  %v5603_v3 = vperm.slane %v5581_v56, 3 }
  0x52   : > { %834 = vmatpush.bf16.msrb.mxu0 %v3854_v47 }
  0x53   : > { %932 = vmatpush.bf16.msrb.mxu2 %v3862_v42 }
  0x54   : > { %981 = vmatpush.bf16.msrb.mxu3 %v3866_v46  ;;  %883 = vmatpush.bf16.msrb.mxu1 %v3858_v50 }
  0x5d   : > { %3900 = vmatmul.msk.bf16.gmra.mxu0 %vm606_vm0, %v5493_v37  ;;  %3908 = vmatmul.msk.bf16.gmra.mxu1 %vm606_vm0, %v5493_v37 }
  0x5e   : > { %3916 = vmatmul.msk.bf16.gmra.mxu2 %vm606_vm0, %v5493_v37 }
  0x5f   : > { %3924 = vmatmul.msk.bf16.gmra.mxu3 %vm606_vm0, %v5493_v37 }
  0x6d   : > { %3901 = vmatmul.msk.bf16.gmra.mxu0 %vm606_vm0, %v5506_v38  ;;  %3909 = vmatmul.msk.bf16.gmra.mxu1 %vm606_vm0, %v5506_v38 }
  0x6e   : > { %3917 = vmatmul.msk.bf16.gmra.mxu2 %vm606_vm0, %v5506_v38 }
  0x6f   : > { %3925 = vmatmul.msk.bf16.gmra.mxu3 %vm606_vm0, %v5506_v38 }
  0x7d   : > { %3902 = vmatmul.msk.bf16.gmra.mxu0 %vm606_vm0, %v5519_v51  ;;  %3910 = vmatmul.msk.bf16.gmra.mxu1 %vm606_vm0, %v5519_v51 }
  0x7e   : > { %3918 = vmatmul.msk.bf16.gmra.mxu2 %vm606_vm0, %v5519_v51 }
  0x7f   : > { %3926 = vmatmul.msk.bf16.gmra.mxu3 %vm606_vm0, %v5519_v51 }
  0x8d   : > { %3903 = vmatmul.msk.bf16.gmra.mxu0 %vm606_vm0, %v5532_v52  ;;  %3911 = vmatmul.msk.bf16.gmra.mxu1 %vm606_vm0, %v5532_v52 }
  0x8e   : > { %3919 = vmatmul.msk.bf16.gmra.mxu2 %vm606_vm0, %v5532_v52 }
  0x8f   : > { %3927 = vmatmul.msk.bf16.gmra.mxu3 %vm606_vm0, %v5532_v52 }
  0x9d   : > { %3904 = vmatmul.msk.bf16.gmra.mxu0 %vm606_vm0, %v5545_v53  ;;  %3912 = vmatmul.msk.bf16.gmra.mxu1 %vm606_vm0, %v5545_v53 }
  0x9e   : > { %3920 = vmatmul.msk.bf16.gmra.mxu2 %vm606_vm0, %v5545_v53 }
  0x9f   : > { %3928 = vmatmul.msk.bf16.gmra.mxu3 %vm606_vm0, %v5545_v53 }
  0xad   : > { %3905 = vmatmul.msk.bf16.gmra.mxu0 %vm606_vm0, %v5558_v54  ;;  %3913 = vmatmul.msk.bf16.gmra.mxu1 %vm606_vm0, %v5558_v54 }
  0xae   : > { %3921 = vmatmul.msk.bf16.gmra.mxu2 %vm606_vm0, %v5558_v54 }
  0xaf   : > { %3929 = vmatmul.msk.bf16.gmra.mxu3 %vm606_vm0, %v5558_v54 }
  0xbd   : > { %3906 = vmatmul.msk.bf16.gmra.mxu0 %vm606_vm0, %v5571_v55  ;;  %3914 = vmatmul.msk.bf16.gmra.mxu1 %vm606_vm0, %v5571_v55 }
  0xbe   : > { %3922 = vmatmul.msk.bf16.gmra.mxu2 %vm606_vm0, %v5571_v55 }
  0xbf   : > { %3930 = vmatmul.msk.bf16.gmra.mxu3 %vm606_vm0, %v5571_v55 }
  0xca   : > { %v640_v59 = vpop.f32.mrf.mxu0  ;;  %v689_v61 = vpop.f32.mrf.mxu1 }
  0xcb   : > { %v641_v60 = vadd.f32 %v640_v59, %v5584_v57  ;;  %v690_v62 = vadd.f32 %v689_v61, %v5587_v58 }
  0xcd   : > { %vm1023_vm1 = vcmp.gt.f32.partialorder %v641_v60, 0.0  ;;  %v1151_v63 = vmul.f32 0.01, %v641_v60  ;;  %3931 = vmatmul.msk.bf16.vlgmr.msrb.gmra.mxu0 %vm606_vm0, %v5480_v23  ;;  %vm1024_vm2 = vcmp.gt.f32.partialorder %v690_v62, 0.0  ;;  %v1152_v0 = vmul.f32 0.01, %v690_v62  ;;  %3939 = vmatmul.msk.bf16.vlgmr.msrb.gmra.mxu1 %vm606_vm0, %v5480_v23 }
  0xce   : > { %3947 = vmatmul.msk.bf16.vlgmr.msrb.gmra.mxu2 %vm606_vm0, %v5480_v23 }
  0xcf   : > { %v1279_v2 = vsel %vm1023_vm1, %v641_v60, %v1151_v63  ;;  %3955 = vmatmul.msk.bf16.vlgmr.msrb.gmra.mxu3 %vm606_vm0, %v5480_v23  ;;  %v1280_v4 = vsel %vm1024_vm2, %v690_v62, %v1152_v0 }
  0xd0   : > { %v1407_v5 = vpack.c.bf16 %v1280_v4, %v1279_v2 }
  0xd1   : > { %v738_v6 = vpop.f32.mrf.mxu2 }
  0xd2   : > { %v739_v7 = vadd.f32 %v738_v6, %v5598_v1  ;;  %v787_v8 = vpop.f32.mrf.mxu3  ;;  %v642_v9 = vpop.f32.mrf.mxu0  ;;  %1471 = vst [vmem:[#allocation2] sm:$0xff] %v1407_v5 }
  0xd3   : > { %v788_v10 = vadd.f32 %v787_v8, %v5603_v3  ;;  %v643_v11 = vadd.f32 %v642_v9, %v5584_v57  ;;  %v691_v12 = vpop.f32.mrf.mxu1 }
  0xd4   : > { %vm1025_vm3 = vcmp.gt.f32.partialorder %v739_v7, 0.0  ;;  %v1153_v13 = vmul.f32 0.01, %v739_v7  ;;  %v692_v14 = vadd.f32 %v691_v12, %v5587_v58 }
  0xd5   : > { %vm1026_vm4 = vcmp.gt.f32.partialorder %v788_v10, 0.0  ;;  %v1154_v15 = vmul.f32 0.01, %v788_v10  ;;  %vm1031_vm5 = vcmp.gt.f32.partialorder %v643_v11, 0.0  ;;  %v1159_v16 = vmul.f32 0.01, %v643_v11 }
  0xd6   : > { %v1281_v17 = vsel %vm1025_vm3, %v739_v7, %v1153_v13  ;;  %vm1032_vm6 = vcmp.gt.f32.partialorder %v692_v14, 0.0  ;;  %v1160_v18 = vmul.f32 0.01, %v692_v14 }
  0xd7   : > { %v1282_v19 = vsel %vm1026_vm4, %v788_v10, %v1154_v15  ;;  %v1287_v20 = vsel %vm1031_vm5, %v643_v11, %v1159_v16 }
  0xd8   : > { %v1408_v21 = vpack.c.bf16 %v1282_v19, %v1281_v17  ;;  %v1288_v22 = vsel %vm1032_vm6, %v692_v14, %v1160_v18 }
  0xd9   : > { %v1411_v23 = vpack.c.bf16 %v1288_v22, %v1287_v20  ;;  %v740_v24 = vpop.f32.mrf.mxu2 }
  0xda   : > { %1472 = vst [vmem:[#allocation2 + $0x8] sm:$0xff] %v1408_v21  ;;  %v741_v25 = vadd.f32 %v740_v24, %v5598_v1  ;;  %v789_v26 = vpop.f32.mrf.mxu3  ;;  %v645_v27 = vpop.f32.mrf.mxu0 }
  0xdb   : > { %1475 = vst [vmem:[#allocation2 + $0x20] sm:$0xff] %v1411_v23  ;;  %v790_v28 = vadd.f32 %v789_v26, %v5603_v3  ;;  %v646_v29 = vadd.f32 %v645_v27, %v5584_v57  ;;  %v694_v30 = vpop.f32.mrf.mxu1 }
  0xdc   : > { %vm1033_vm7 = vcmp.gt.f32.partialorder %v741_v25, 0.0  ;;  %v1161_v31 = vmul.f32 0.01, %v741_v25  ;;  %v695_v32 = vadd.f32 %v694_v30, %v5587_v58 }
  0xdd   : > { %vm1034_vm8 = vcmp.gt.f32.partialorder %v790_v28, 0.0  ;;  %v1162_v33 = vmul.f32 0.01, %v790_v28  ;;  %vm1039_vm9 = vcmp.gt.f32.partialorder %v646_v29, 0.0  ;;  %v1167_v34 = vmul.f32 0.01, %v646_v29  ;;  %3932 = vmatmul.msk.bf16.gmra.mxu0 %vm606_vm0, %v5493_v37  ;;  %3940 = vmatmul.msk.bf16.gmra.mxu1 %vm606_vm0, %v5493_v37 }
  0xde   : > { %v1289_v35 = vsel %vm1033_vm7, %v741_v25, %v1161_v31  ;;  %vm1040_vm10 = vcmp.gt.f32.partialorder %v695_v32, 0.0  ;;  %v1168_v36 = vmul.f32 0.01, %v695_v32  ;;  %3948 = vmatmul.msk.bf16.gmra.mxu2 %vm606_vm0, %v5493_v37 }
  0xdf   : > { %v1290_v39 = vsel %vm1034_vm8, %v790_v28, %v1162_v33  ;;  %v1295_v40 = vsel %vm1039_vm9, %v646_v29, %v1167_v34  ;;  %3956 = vmatmul.msk.bf16.gmra.mxu3 %vm606_vm0, %v5493_v37 }
  0xe0   : > { %v1412_v41 = vpack.c.bf16 %v1290_v39, %v1289_v35  ;;  %v1296_v42 = vsel %vm1040_vm10, %v695_v32, %v1168_v36 }
  0xe1   : > { %v1415_v43 = vpack.c.bf16 %v1296_v42, %v1295_v40  ;;  %v743_v44 = vpop.f32.mrf.mxu2 }
  0xe2   : > { %1476 = vst [vmem:[#allocation2 + $0x28] sm:$0xff] %v1412_v41  ;;  %v744_v45 = vadd.f32 %v743_v44, %v5598_v1  ;;  %v792_v46 = vpop.f32.mrf.mxu3  ;;  %v647_v47 = vpop.f32.mrf.mxu0 }
  0xe3   : > { %1479 = vst [vmem:[#allocation2 + $0x40] sm:$0xff] %v1415_v43  ;;  %v793_v48 = vadd.f32 %v792_v46, %v5603_v3  ;;  %v648_v49 = vadd.f32 %v647_v47, %v5584_v57  ;;  %v696_v50 = vpop.f32.mrf.mxu1 }
  0xe4   : > { %vm1041_vm11 = vcmp.gt.f32.partialorder %v744_v45, 0.0  ;;  %v1169_v59 = vmul.f32 0.01, %v744_v45  ;;  %v697_v60 = vadd.f32 %v696_v50, %v5587_v58 }
  0xe5   : > { %vm1042_vm12 = vcmp.gt.f32.partialorder %v793_v48, 0.0  ;;  %v1170_v37 = vmul.f32 0.01, %v793_v48  ;;  %vm1047_vm13 = vcmp.gt.f32.partialorder %v648_v49, 0.0  ;;  %v1175_v61 = vmul.f32 0.01, %v648_v49 }
  0xe6   : > { %v1297_v62 = vsel %vm1041_vm11, %v744_v45, %v1169_v59  ;;  %vm1048_vm14 = vcmp.gt.f32.partialorder %v697_v60, 0.0  ;;  %v1176_v63 = vmul.f32 0.01, %v697_v60 }
  0xe7   : > { %v1298_v0 = vsel %vm1042_vm12, %v793_v48, %v1170_v37  ;;  %v1303_v2 = vsel %vm1047_vm13, %v648_v49, %v1175_v61 }
  0xe8   : > { %v1416_v4 = vpack.c.bf16 %v1298_v0, %v1297_v62  ;;  %v1304_v5 = vsel %vm1048_vm14, %v697_v60, %v1176_v63 }
  0xe9   : > { %v1419_v6 = vpack.c.bf16 %v1304_v5, %v1303_v2  ;;  %v745_v7 = vpop.f32.mrf.mxu2 }
  0xea   : > { %1480 = vst [vmem:[#allocation2 + $0x48] sm:$0xff] %v1416_v4  ;;  %v746_v8 = vadd.f32 %v745_v7, %v5598_v1  ;;  %v794_v9 = vpop.f32.mrf.mxu3  ;;  %v650_v10 = vpop.f32.mrf.mxu0 }
  0xeb   : > { %1483 = vst [vmem:[#allocation2 + $0x60] sm:$0xff] %v1419_v6  ;;  %v795_v11 = vadd.f32 %v794_v9, %v5603_v3  ;;  %v651_v12 = vadd.f32 %v650_v10, %v5584_v57  ;;  %v699_v13 = vpop.f32.mrf.mxu1 }
  0xec   : > { %vm1049_vm15 = vcmp.gt.f32.partialorder %v746_v8, 0.0  ;;  %v1177_v14 = vmul.f32 0.01, %v746_v8  ;;  %v700_v15 = vadd.f32 %v699_v13, %v5587_v58 }
  0xed   : > { %vm1050_vm1 = vcmp.gt.f32.partialorder %v795_v11, 0.0  ;;  %v1178_v16 = vmul.f32 0.01, %v795_v11  ;;  %vm1055_vm2 = vcmp.gt.f32.partialorder %v651_v12, 0.0  ;;  %v1183_v17 = vmul.f32 0.01, %v651_v12  ;;  %3933 = vmatmul.msk.bf16.gmra.mxu0 %vm606_vm0, %v5506_v38  ;;  %3941 = vmatmul.msk.bf16.gmra.mxu1 %vm606_vm0, %v5506_v38 }
  0xee   : > { %v1305_v18 = vsel %vm1049_vm15, %v746_v8, %v1177_v14  ;;  %vm1056_vm3 = vcmp.gt.f32.partialorder %v700_v15, 0.0  ;;  %v1184_v19 = vmul.f32 0.01, %v700_v15  ;;  %3949 = vmatmul.msk.bf16.gmra.mxu2 %vm606_vm0, %v5506_v38 }
  0xef   : > { %v1306_v20 = vsel %vm1050_vm1, %v795_v11, %v1178_v16  ;;  %v1311_v21 = vsel %vm1055_vm2, %v651_v12, %v1183_v17  ;;  %3957 = vmatmul.msk.bf16.gmra.mxu3 %vm606_vm0, %v5506_v38 }
  0xf0   : > { %v1420_v22 = vpack.c.bf16 %v1306_v20, %v1305_v18  ;;  %v1312_v23 = vsel %vm1056_vm3, %v700_v15, %v1184_v19 }
  0xf1   : > { %v1423_v24 = vpack.c.bf16 %v1312_v23, %v1311_v21  ;;  %v748_v25 = vpop.f32.mrf.mxu2 }
  0xf2   : > { %1484 = vst [vmem:[#allocation2 + $0x68] sm:$0xff] %v1420_v22  ;;  %v749_v26 = vadd.f32 %v748_v25, %v5598_v1  ;;  %v797_v27 = vpop.f32.mrf.mxu3  ;;  %v652_v28 = vpop.f32.mrf.mxu0 }
  0xf3   : > { %1487 = vst [vmem:[#allocation2 + $0x80] sm:$0xff] %v1423_v24  ;;  %v798_v29 = vadd.f32 %v797_v27, %v5603_v3  ;;  %v653_v30 = vadd.f32 %v652_v28, %v5584_v57  ;;  %v701_v31 = vpop.f32.mrf.mxu1 }
  0xf4   : > { %vm1057_vm4 = vcmp.gt.f32.partialorder %v749_v26, 0.0  ;;  %v1185_v32 = vmul.f32 0.01, %v749_v26  ;;  %v702_v33 = vadd.f32 %v701_v31, %v5587_v58 }
  0xf5   : > { %vm1058_vm5 = vcmp.gt.f32.partialorder %v798_v29, 0.0  ;;  %v1186_v38 = vmul.f32 0.01, %v798_v29  ;;  %vm1063_vm6 = vcmp.gt.f32.partialorder %v653_v30, 0.0  ;;  %v1191_v34 = vmul.f32 0.01, %v653_v30 }
  0xf6   : > { %v1313_v35 = vsel %vm1057_vm4, %v749_v26, %v1185_v32  ;;  %vm1064_vm7 = vcmp.gt.f32.partialorder %v702_v33, 0.0  ;;  %v1192_v36 = vmul.f32 0.01, %v702_v33 }
  0xf7   : > { %v1314_v39 = vsel %vm1058_vm5, %v798_v29, %v1186_v38  ;;  %v1319_v40 = vsel %vm1063_vm6, %v653_v30, %v1191_v34 }
  0xf8   : > { %v1424_v41 = vpack.c.bf16 %v1314_v39, %v1313_v35  ;;  %v1320_v42 = vsel %vm1064_vm7, %v702_v33, %v1192_v36 }
  0xf9   : > { %v1427_v43 = vpack.c.bf16 %v1320_v42, %v1319_v40  ;;  %v750_v44 = vpop.f32.mrf.mxu2 }
  0xfa   : > { %1488 = vst [vmem:[#allocation2 + $0x88] sm:$0xff] %v1424_v41  ;;  %v751_v45 = vadd.f32 %v750_v44, %v5598_v1  ;;  %v799_v46 = vpop.f32.mrf.mxu3  ;;  %v655_v47 = vpop.f32.mrf.mxu0 }
  0xfb   : > { %1491 = vst [vmem:[#allocation2 + $0xa0] sm:$0xff] %v1427_v43  ;;  %v800_v48 = vadd.f32 %v799_v46, %v5603_v3  ;;  %v656_v49 = vadd.f32 %v655_v47, %v5584_v57  ;;  %v704_v50 = vpop.f32.mrf.mxu1 }
  0xfc   : > { %vm1065_vm8 = vcmp.gt.f32.partialorder %v751_v45, 0.0  ;;  %v1193_v59 = vmul.f32 0.01, %v751_v45  ;;  %v705_v60 = vadd.f32 %v704_v50, %v5587_v58 }
  0xfd   : > { %vm1066_vm9 = vcmp.gt.f32.partialorder %v800_v48, 0.0  ;;  %v1194_v37 = vmul.f32 0.01, %v800_v48  ;;  %vm1071_vm10 = vcmp.gt.f32.partialorder %v656_v49, 0.0  ;;  %v1199_v61 = vmul.f32 0.01, %v656_v49  ;;  %3934 = vmatmul.msk.bf16.gmra.mxu0 %vm606_vm0, %v5519_v51  ;;  %3942 = vmatmul.msk.bf16.gmra.mxu1 %vm606_vm0, %v5519_v51 }
  0xfe   : > { %v1321_v62 = vsel %vm1065_vm8, %v751_v45, %v1193_v59  ;;  %vm1072_vm11 = vcmp.gt.f32.partialorder %v705_v60, 0.0  ;;  %v1200_v63 = vmul.f32 0.01, %v705_v60  ;;  %3950 = vmatmul.msk.bf16.gmra.mxu2 %vm606_vm0, %v5519_v51 }
  0xff   : > { %v1322_v0 = vsel %vm1066_vm9, %v800_v48, %v1194_v37  ;;  %v1327_v2 = vsel %vm1071_vm10, %v656_v49, %v1199_v61  ;;  %3958 = vmatmul.msk.bf16.gmra.mxu3 %vm606_vm0, %v5519_v51 }
 0x100   : > { %v1428_v4 = vpack.c.bf16 %v1322_v0, %v1321_v62  ;;  %v1328_v5 = vsel %vm1072_vm11, %v705_v60, %v1200_v63 }
 0x101   : > { %v1431_v6 = vpack.c.bf16 %v1328_v5, %v1327_v2  ;;  %v753_v7 = vpop.f32.mrf.mxu2 }
 0x102   : > { %1492 = vst [vmem:[#allocation2 + $0xa8] sm:$0xff] %v1428_v4  ;;  %v754_v8 = vadd.f32 %v753_v7, %v5598_v1  ;;  %v802_v9 = vpop.f32.mrf.mxu3  ;;  %v657_v10 = vpop.f32.mrf.mxu0 }
 0x103   : > { %1495 = vst [vmem:[#allocation2 + $0xc0] sm:$0xff] %v1431_v6  ;;  %v803_v11 = vadd.f32 %v802_v9, %v5603_v3  ;;  %v658_v12 = vadd.f32 %v657_v10, %v5584_v57  ;;  %v706_v13 = vpop.f32.mrf.mxu1 }
 0x104   : > { %vm1073_vm12 = vcmp.gt.f32.partialorder %v754_v8, 0.0  ;;  %v1201_v14 = vmul.f32 0.01, %v754_v8  ;;  %v707_v15 = vadd.f32 %v706_v13, %v5587_v58 }
 0x105   : > { %vm1074_vm13 = vcmp.gt.f32.partialorder %v803_v11, 0.0  ;;  %v1202_v51 = vmul.f32 0.01, %v803_v11  ;;  %vm1079_vm14 = vcmp.gt.f32.partialorder %v658_v12, 0.0  ;;  %v1207_v16 = vmul.f32 0.01, %v658_v12 }
 0x106   : > { %v1329_v17 = vsel %vm1073_vm12, %v754_v8, %v1201_v14  ;;  %vm1080_vm15 = vcmp.gt.f32.partialorder %v707_v15, 0.0  ;;  %v1208_v18 = vmul.f32 0.01, %v707_v15 }
 0x107   : > { %v1330_v19 = vsel %vm1074_vm13, %v803_v11, %v1202_v51  ;;  %v1335_v20 = vsel %vm1079_vm14, %v658_v12, %v1207_v16 }
 0x108   : > { %v1432_v21 = vpack.c.bf16 %v1330_v19, %v1329_v17  ;;  %v1336_v22 = vsel %vm1080_vm15, %v707_v15, %v1208_v18 }
 0x109   : > { %v1435_v23 = vpack.c.bf16 %v1336_v22, %v1335_v20  ;;  %v755_v24 = vpop.f32.mrf.mxu2 }
 0x10a   : > { %1496 = vst [vmem:[#allocation2 + $0xc8] sm:$0xff] %v1432_v21  ;;  %v756_v25 = vadd.f32 %v755_v24, %v5598_v1  ;;  %v804_v26 = vpop.f32.mrf.mxu3  ;;  %v660_v27 = vpop.f32.mrf.mxu0 }
 0x10b   : > { %1499 = vst [vmem:[#allocation2 + $0xe0] sm:$0xff] %v1435_v23  ;;  %v805_v28 = vadd.f32 %v804_v26, %v5603_v3  ;;  %v661_v29 = vadd.f32 %v660_v27, %v5584_v57  ;;  %v709_v30 = vpop.f32.mrf.mxu1 }
 0x10c   : > { %vm1081_vm1 = vcmp.gt.f32.partialorder %v756_v25, 0.0  ;;  %v1209_v31 = vmul.f32 0.01, %v756_v25  ;;  %v710_v32 = vadd.f32 %v709_v30, %v5587_v58 }
 0x10d   : > { %vm1082_vm2 = vcmp.gt.f32.partialorder %v805_v28, 0.0  ;;  %v1210_v33 = vmul.f32 0.01, %v805_v28  ;;  %vm1087_vm3 = vcmp.gt.f32.partialorder %v661_v29, 0.0  ;;  %v1215_v38 = vmul.f32 0.01, %v661_v29  ;;  %3935 = vmatmul.msk.bf16.gmra.mxu0 %vm606_vm0, %v5532_v52  ;;  %3943 = vmatmul.msk.bf16.gmra.mxu1 %vm606_vm0, %v5532_v52 }
 0x10e   : > { %v1337_v34 = vsel %vm1081_vm1, %v756_v25, %v1209_v31  ;;  %vm1088_vm4 = vcmp.gt.f32.partialorder %v710_v32, 0.0  ;;  %v1216_v35 = vmul.f32 0.01, %v710_v32  ;;  %3951 = vmatmul.msk.bf16.gmra.mxu2 %vm606_vm0, %v5532_v52 }
 0x10f   : > { %v1338_v36 = vsel %vm1082_vm2, %v805_v28, %v1210_v33  ;;  %v1343_v39 = vsel %vm1087_vm3, %v661_v29, %v1215_v38  ;;  %3959 = vmatmul.msk.bf16.gmra.mxu3 %vm606_vm0, %v5532_v52 }
 0x110   : > { %v1436_v40 = vpack.c.bf16 %v1338_v36, %v1337_v34  ;;  %v1344_v41 = vsel %vm1088_vm4, %v710_v32, %v1216_v35 }
 0x111   : > { %v1439_v42 = vpack.c.bf16 %v1344_v41, %v1343_v39  ;;  %v758_v43 = vpop.f32.mrf.mxu2 }
 0x112   : > { %1500 = vst [vmem:[#allocation2 + $0xe8] sm:$0xff] %v1436_v40  ;;  %v759_v44 = vadd.f32 %v758_v43, %v5598_v1  ;;  %v807_v45 = vpop.f32.mrf.mxu3  ;;  %v662_v46 = vpop.f32.mrf.mxu0 }
 0x113   : > { %1503 = vst [vmem:[#allocation2 + $0x100] sm:$0xff] %v1439_v42  ;;  %v808_v47 = vadd.f32 %v807_v45, %v5603_v3  ;;  %v663_v48 = vadd.f32 %v662_v46, %v5584_v57  ;;  %v711_v49 = vpop.f32.mrf.mxu1 }
 0x114   : > { %vm1089_vm5 = vcmp.gt.f32.partialorder %v759_v44, 0.0  ;;  %v1217_v50 = vmul.f32 0.01, %v759_v44  ;;  %v712_v59 = vadd.f32 %v711_v49, %v5587_v58 }
 0x115   : > { %vm1090_vm6 = vcmp.gt.f32.partialorder %v808_v47, 0.0  ;;  %v1218_v52 = vmul.f32 0.01, %v808_v47  ;;  %vm1095_vm7 = vcmp.gt.f32.partialorder %v663_v48, 0.0  ;;  %v1223_v60 = vmul.f32 0.01, %v663_v48 }
 0x116   : > { %v1345_v37 = vsel %vm1089_vm5, %v759_v44, %v1217_v50  ;;  %vm1096_vm8 = vcmp.gt.f32.partialorder %v712_v59, 0.0  ;;  %v1224_v61 = vmul.f32 0.01, %v712_v59 }
 0x117   : > { %v1346_v62 = vsel %vm1090_vm6, %v808_v47, %v1218_v52  ;;  %v1351_v63 = vsel %vm1095_vm7, %v663_v48, %v1223_v60 }
 0x118   : > { %v1440_v0 = vpack.c.bf16 %v1346_v62, %v1345_v37  ;;  %v1352_v2 = vsel %vm1096_vm8, %v712_v59, %v1224_v61 }
 0x119   : > { %v1443_v4 = vpack.c.bf16 %v1352_v2, %v1351_v63  ;;  %v760_v5 = vpop.f32.mrf.mxu2 }
 0x11a   : > { %1504 = vst [vmem:[#allocation2 + $0x108] sm:$0xff] %v1440_v0  ;;  %v761_v6 = vadd.f32 %v760_v5, %v5598_v1  ;;  %v809_v7 = vpop.f32.mrf.mxu3  ;;  %v665_v8 = vpop.f32.mrf.mxu0 }
 0x11b   : > { %1507 = vst [vmem:[#allocation2 + $0x120] sm:$0xff] %v1443_v4  ;;  %v810_v9 = vadd.f32 %v809_v7, %v5603_v3  ;;  %v666_v10 = vadd.f32 %v665_v8, %v5584_v57  ;;  %v714_v11 = vpop.f32.mrf.mxu1 }
 0x11c   : > { %vm1097_vm9 = vcmp.gt.f32.partialorder %v761_v6, 0.0  ;;  %v1225_v12 = vmul.f32 0.01, %v761_v6  ;;  %v715_v13 = vadd.f32 %v714_v11, %v5587_v58 }
 0x11d   : > { %vm1098_vm10 = vcmp.gt.f32.partialorder %v810_v9, 0.0  ;;  %v1226_v14 = vmul.f32 0.01, %v810_v9  ;;  %vm1103_vm11 = vcmp.gt.f32.partialorder %v666_v10, 0.0  ;;  %v1231_v15 = vmul.f32 0.01, %v666_v10  ;;  %3936 = vmatmul.msk.bf16.gmra.mxu0 %vm606_vm0, %v5545_v53  ;;  %3944 = vmatmul.msk.bf16.gmra.mxu1 %vm606_vm0, %v5545_v53 }
 0x11e   : > { %v1353_v51 = vsel %vm1097_vm9, %v761_v6, %v1225_v12  ;;  %vm1104_vm12 = vcmp.gt.f32.partialorder %v715_v13, 0.0  ;;  %v1232_v16 = vmul.f32 0.01, %v715_v13  ;;  %3952 = vmatmul.msk.bf16.gmra.mxu2 %vm606_vm0, %v5545_v53 }
 0x11f   : > { %v1354_v17 = vsel %vm1098_vm10, %v810_v9, %v1226_v14  ;;  %v1359_v18 = vsel %vm1103_vm11, %v666_v10, %v1231_v15  ;;  %3960 = vmatmul.msk.bf16.gmra.mxu3 %vm606_vm0, %v5545_v53 }
 0x120   : > { %v1444_v19 = vpack.c.bf16 %v1354_v17, %v1353_v51  ;;  %v1360_v20 = vsel %vm1104_vm12, %v715_v13, %v1232_v16 }
 0x121   : > { %v1447_v21 = vpack.c.bf16 %v1360_v20, %v1359_v18  ;;  %v763_v22 = vpop.f32.mrf.mxu2 }
 0x122   : > { %1508 = vst [vmem:[#allocation2 + $0x128] sm:$0xff] %v1444_v19  ;;  %v764_v23 = vadd.f32 %v763_v22, %v5598_v1  ;;  %v812_v24 = vpop.f32.mrf.mxu3  ;;  %v667_v25 = vpop.f32.mrf.mxu0 }
 0x123   : > { %1511 = vst [vmem:[#allocation2 + $0x140] sm:$0xff] %v1447_v21  ;;  %v813_v26 = vadd.f32 %v812_v24, %v5603_v3  ;;  %v668_v27 = vadd.f32 %v667_v25, %v5584_v57  ;;  %v716_v28 = vpop.f32.mrf.mxu1 }
 0x124   : > { %vm1105_vm13 = vcmp.gt.f32.partialorder %v764_v23, 0.0  ;;  %v1233_v29 = vmul.f32 0.01, %v764_v23  ;;  %v717_v30 = vadd.f32 %v716_v28, %v5587_v58 }
 0x125   : > { %vm1106_vm14 = vcmp.gt.f32.partialorder %v813_v26, 0.0  ;;  %v1234_v53 = vmul.f32 0.01, %v813_v26  ;;  %vm1111_vm15 = vcmp.gt.f32.partialorder %v668_v27, 0.0  ;;  %v1239_v31 = vmul.f32 0.01, %v668_v27 }
 0x126   : > { %v1361_v32 = vsel %vm1105_vm13, %v764_v23, %v1233_v29  ;;  %vm1112_vm1 = vcmp.gt.f32.partialorder %v717_v30, 0.0  ;;  %v1240_v33 = vmul.f32 0.01, %v717_v30 }
 0x127   : > { %v1362_v38 = vsel %vm1106_vm14, %v813_v26, %v1234_v53  ;;  %v1367_v34 = vsel %vm1111_vm15, %v668_v27, %v1239_v31 }
 0x128   : > { %v1448_v35 = vpack.c.bf16 %v1362_v38, %v1361_v32  ;;  %v1368_v36 = vsel %vm1112_vm1, %v717_v30, %v1240_v33 }
 0x129   : > { %v1451_v39 = vpack.c.bf16 %v1368_v36, %v1367_v34  ;;  %v765_v40 = vpop.f32.mrf.mxu2 }
 0x12a   : > { %1512 = vst [vmem:[#allocation2 + $0x148] sm:$0xff] %v1448_v35  ;;  %v766_v41 = vadd.f32 %v765_v40, %v5598_v1  ;;  %v814_v42 = vpop.f32.mrf.mxu3  ;;  %v670_v43 = vpop.f32.mrf.mxu0 }
 0x12b   : > { %1515 = vst [vmem:[#allocation2 + $0x160] sm:$0xff] %v1451_v39  ;;  %v815_v44 = vadd.f32 %v814_v42, %v5603_v3  ;;  %v671_v45 = vadd.f32 %v670_v43, %v5584_v57  ;;  %v719_v46 = vpop.f32.mrf.mxu1 }
 0x12c   : > { %vm1113_vm2 = vcmp.gt.f32.partialorder %v766_v41, 0.0  ;;  %v1241_v47 = vmul.f32 0.01, %v766_v41  ;;  %v720_v48 = vadd.f32 %v719_v46, %v5587_v58 }
 0x12d   : > { %vm1114_vm3 = vcmp.gt.f32.partialorder %v815_v44, 0.0  ;;  %v1242_v49 = vmul.f32 0.01, %v815_v44  ;;  %vm1119_vm4 = vcmp.gt.f32.partialorder %v671_v45, 0.0  ;;  %v1247_v50 = vmul.f32 0.01, %v671_v45  ;;  %3937 = vmatmul.msk.bf16.gmra.mxu0 %vm606_vm0, %v5558_v54  ;;  %3945 = vmatmul.msk.bf16.gmra.mxu1 %vm606_vm0, %v5558_v54 }
 0x12e   : > { %v1369_v59 = vsel %vm1113_vm2, %v766_v41, %v1241_v47  ;;  %vm1120_vm5 = vcmp.gt.f32.partialorder %v720_v48, 0.0  ;;  %v1248_v52 = vmul.f32 0.01, %v720_v48  ;;  %3953 = vmatmul.msk.bf16.gmra.mxu2 %vm606_vm0, %v5558_v54 }
 0x12f   : > { %v1370_v60 = vsel %vm1114_vm3, %v815_v44, %v1242_v49  ;;  %v1375_v37 = vsel %vm1119_vm4, %v671_v45, %v1247_v50  ;;  %3961 = vmatmul.msk.bf16.gmra.mxu3 %vm606_vm0, %v5558_v54  ;;  %v5722_v50 = vperm.slane %v5581_v56, 4 }
 0x130   : > { %v1452_v61 = vpack.c.bf16 %v1370_v60, %v1369_v59  ;;  %v1376_v62 = vsel %vm1120_vm5, %v720_v48, %v1248_v52 }
 0x131   : > { %v1455_v63 = vpack.c.bf16 %v1376_v62, %v1375_v37  ;;  %v768_v0 = vpop.f32.mrf.mxu2 }
 0x132   : > { %1516 = vst [vmem:[#allocation2 + $0x168] sm:$0xff] %v1452_v61  ;;  %v769_v2 = vadd.f32 %v768_v0, %v5598_v1  ;;  %v817_v4 = vpop.f32.mrf.mxu3  ;;  %v672_v5 = vpop.f32.mrf.mxu0 }
 0x133   : > { %1519 = vst [vmem:[#allocation2 + $0x180] sm:$0xff] %v1455_v63  ;;  %v818_v6 = vadd.f32 %v817_v4, %v5603_v3  ;;  %v673_v7 = vadd.f32 %v672_v5, %v5584_v57  ;;  %v721_v8 = vpop.f32.mrf.mxu1 }
 0x134   : > { %vm1121_vm6 = vcmp.gt.f32.partialorder %v769_v2, 0.0  ;;  %v1249_v9 = vmul.f32 0.01, %v769_v2  ;;  %v722_v10 = vadd.f32 %v721_v8, %v5587_v58 }
 0x135   : > { %vm1122_vm7 = vcmp.gt.f32.partialorder %v818_v6, 0.0  ;;  %v1250_v54 = vmul.f32 0.01, %v818_v6  ;;  %vm1127_vm8 = vcmp.gt.f32.partialorder %v673_v7, 0.0  ;;  %v1255_v11 = vmul.f32 0.01, %v673_v7 }
 0x136   : > { %v1377_v12 = vsel %vm1121_vm6, %v769_v2, %v1249_v9  ;;  %vm1128_vm9 = vcmp.gt.f32.partialorder %v722_v10, 0.0  ;;  %v1256_v13 = vmul.f32 0.01, %v722_v10 }
 0x137   : > { %v1378_v14 = vsel %vm1122_vm7, %v818_v6, %v1250_v54  ;;  %v1383_v15 = vsel %vm1127_vm8, %v673_v7, %v1255_v11 }
 0x138   : > { %v1456_v51 = vpack.c.bf16 %v1378_v14, %v1377_v12  ;;  %v1384_v16 = vsel %vm1128_vm9, %v722_v10, %v1256_v13 }
 0x139   : > { %v1459_v17 = vpack.c.bf16 %v1384_v16, %v1383_v15  ;;  %v770_v18 = vpop.f32.mrf.mxu2 }
 0x13a   : > { %1520 = vst [vmem:[#allocation2 + $0x188] sm:$0xff] %v1456_v51  ;;  %v771_v19 = vadd.f32 %v770_v18, %v5598_v1  ;;  %v819_v20 = vpop.f32.mrf.mxu3  ;;  %v675_v21 = vpop.f32.mrf.mxu0 }
 0x13b   : > { %1523 = vst [vmem:[#allocation2 + $0x1a0] sm:$0xff] %v1459_v17  ;;  %v820_v22 = vadd.f32 %v819_v20, %v5603_v3  ;;  %v676_v23 = vadd.f32 %v675_v21, %v5584_v57  ;;  %v724_v24 = vpop.f32.mrf.mxu1 }
 0x13c   : > { %vm1129_vm10 = vcmp.gt.f32.partialorder %v771_v19, 0.0  ;;  %v1257_v25 = vmul.f32 0.01, %v771_v19  ;;  %v725_v26 = vadd.f32 %v724_v24, %v5587_v58 }
 0x13d   : > { %vm1130_vm11 = vcmp.gt.f32.partialorder %v820_v22, 0.0  ;;  %v1258_v27 = vmul.f32 0.01, %v820_v22  ;;  %vm1135_vm12 = vcmp.gt.f32.partialorder %v676_v23, 0.0  ;;  %v1263_v28 = vmul.f32 0.01, %v676_v23  ;;  %3938 = vmatmul.msk.bf16.gmra.mxu0 %vm606_vm0, %v5571_v55  ;;  %3946 = vmatmul.msk.bf16.gmra.mxu1 %vm606_vm0, %v5571_v55 }
 0x13e   : > { %v1385_v29 = vsel %vm1129_vm10, %v771_v19, %v1257_v25  ;;  %vm1136_vm13 = vcmp.gt.f32.partialorder %v725_v26, 0.0  ;;  %v1264_v30 = vmul.f32 0.01, %v725_v26  ;;  %3954 = vmatmul.msk.bf16.gmra.mxu2 %vm606_vm0, %v5571_v55 }
 0x13f   : > { %v1386_v53 = vsel %vm1130_vm11, %v820_v22, %v1258_v27  ;;  %v1391_v31 = vsel %vm1135_vm12, %v676_v23, %v1263_v28  ;;  %3962 = vmatmul.msk.bf16.gmra.mxu3 %vm606_vm0, %v5571_v55 }
 0x140   : > { %v1460_v32 = vpack.c.bf16 %v1386_v53, %v1385_v29  ;;  %v1392_v33 = vsel %vm1136_vm13, %v725_v26, %v1264_v30 }
 0x141   : > { %v1463_v38 = vpack.c.bf16 %v1392_v33, %v1391_v31  ;;  %v773_v34 = vpop.f32.mrf.mxu2 }
 0x142   : > { %1524 = vst [vmem:[#allocation2 + $0x1a8] sm:$0xff] %v1460_v32  ;;  %v774_v35 = vadd.f32 %v773_v34, %v5598_v1  ;;  %v822_v36 = vpop.f32.mrf.mxu3  ;;  %v677_v39 = vpop.f32.mrf.mxu0 }
 0x143   : > { %1527 = vst [vmem:[#allocation2 + $0x1c0] sm:$0xff] %v1463_v38  ;;  %v823_v40 = vadd.f32 %v822_v36, %v5603_v3  ;;  %v678_v41 = vadd.f32 %v677_v39, %v5584_v57  ;;  %v726_v42 = vpop.f32.mrf.mxu1  ;;  %v5725_v57 = vperm.slane %v5581_v56, 5 }
 0x144   : > { %vm1137_vm14 = vcmp.gt.f32.partialorder %v774_v35, 0.0  ;;  %v1265_v43 = vmul.f32 0.01, %v774_v35  ;;  %v727_v44 = vadd.f32 %v726_v42, %v5587_v58 }
 0x145   : > { %vm1138_vm0 = vcmp.gt.f32.partialorder %v823_v40, 0.0  ;;  %v1266_v55 = vmul.f32 0.01, %v823_v40  ;;  %vm1143_vm15 = vcmp.gt.f32.partialorder %v678_v41, 0.0  ;;  %v1271_v45 = vmul.f32 0.01, %v678_v41 }
 0x146   : > { %v1393_v46 = vsel %vm1137_vm14, %v774_v35, %v1265_v43  ;;  %vm1144_vm1 = vcmp.gt.f32.partialorder %v727_v44, 0.0  ;;  %v1272_v47 = vmul.f32 0.01, %v727_v44 }
 0x147   : > { %v1394_v48 = vsel %vm1138_vm0, %v823_v40, %v1266_v55  ;;  %v1399_v49 = vsel %vm1143_vm15, %v678_v41, %v1271_v45 }
 0x148   : > { %v1464_v59 = vpack.c.bf16 %v1394_v48, %v1393_v46  ;;  %v1400_v52 = vsel %vm1144_vm1, %v727_v44, %v1272_v47 }
 0x149   : > { %v1467_v60 = vpack.c.bf16 %v1400_v52, %v1399_v49  ;;  %v775_v37 = vpop.f32.mrf.mxu2 }
 0x14a   : > { %1528 = vst [vmem:[#allocation2 + $0x1c8] sm:$0xff] %v1464_v59  ;;  %v776_v58 = vadd.f32 %v775_v37, %v5598_v1  ;;  %v824_v61 = vpop.f32.mrf.mxu3  ;;  %v836_v62 = vpop.f32.mrf.mxu0  ;;  %v5732_v1 = vperm.slane %v5581_v56, 6 }
 0x14b   : > { %1531 = vst [vmem:[#allocation2 + $0x1e0] sm:$0xff] %v1467_v60  ;;  %v825_v63 = vadd.f32 %v824_v61, %v5603_v3  ;;  %v837_v0 = vadd.f32 %v836_v62, %v5722_v50  ;;  %v885_v2 = vpop.f32.mrf.mxu1  ;;  %v5735_v3 = vperm.slane %v5581_v56, 7 }
 0x14c   : > { %vm1145_vm2 = vcmp.gt.f32.partialorder %v776_v58, 0.0  ;;  %v1273_v4 = vmul.f32 0.01, %v776_v58  ;;  %v886_v5 = vadd.f32 %v885_v2, %v5725_v57 }
 0x14d   : > { %vm1146_vm3 = vcmp.gt.f32.partialorder %v825_v63, 0.0  ;;  %v1274_v6 = vmul.f32 0.01, %v825_v63  ;;  %vm1027_vm4 = vcmp.gt.f32.partialorder %v837_v0, 0.0  ;;  %v1155_v7 = vmul.f32 0.01, %v837_v0 }
 0x14e   : > { %v1401_v8 = vsel %vm1145_vm2, %v776_v58, %v1273_v4  ;;  %vm1028_vm5 = vcmp.gt.f32.partialorder %v886_v5, 0.0  ;;  %v1156_v9 = vmul.f32 0.01, %v886_v5 }
 0x14f   : > { %v1402_v10 = vsel %vm1146_vm3, %v825_v63, %v1274_v6  ;;  %v1283_v54 = vsel %vm1027_vm4, %v837_v0, %v1155_v7 }
 0x150   : > { %v1468_v11 = vpack.c.bf16 %v1402_v10, %v1401_v8  ;;  %v1284_v12 = vsel %vm1028_vm5, %v886_v5, %v1156_v9 }
 0x151   : > { %v1409_v13 = vpack.c.bf16 %v1284_v12, %v1283_v54  ;;  %v934_v14 = vpop.f32.mrf.mxu2 }
 0x152   : > { %1532 = vst [vmem:[#allocation2 + $0x1e8] sm:$0xff] %v1468_v11  ;;  %v935_v15 = vadd.f32 %v934_v14, %v5732_v1  ;;  %v983_v51 = vpop.f32.mrf.mxu3  ;;  %v838_v16 = vpop.f32.mrf.mxu0 }
 0x153   : > { %1473 = vst [vmem:[#allocation2 + $0x10] sm:$0xff] %v1409_v13  ;;  %v984_v17 = vadd.f32 %v983_v51, %v5735_v3  ;;  %v839_v18 = vadd.f32 %v838_v16, %v5722_v50  ;;  %v887_v19 = vpop.f32.mrf.mxu1 }
 0x154   : > { %vm1029_vm6 = vcmp.gt.f32.partialorder %v935_v15, 0.0  ;;  %v1157_v20 = vmul.f32 0.01, %v935_v15  ;;  %v888_v56 = vadd.f32 %v887_v19, %v5725_v57 }
 0x155   : > { %vm1030_vm7 = vcmp.gt.f32.partialorder %v984_v17, 0.0  ;;  %v1158_v21 = vmul.f32 0.01, %v984_v17  ;;  %vm1035_vm8 = vcmp.gt.f32.partialorder %v839_v18, 0.0  ;;  %v1163_v22 = vmul.f32 0.01, %v839_v18 }
 0x156   : > { %v1285_v23 = vsel %vm1029_vm6, %v935_v15, %v1157_v20  ;;  %vm1036_vm9 = vcmp.gt.f32.partialorder %v888_v56, 0.0  ;;  %v1164_v24 = vmul.f32 0.01, %v888_v56 }
 0x157   : > { %v1286_v25 = vsel %vm1030_vm7, %v984_v17, %v1158_v21  ;;  %v1291_v26 = vsel %vm1035_vm8, %v839_v18, %v1163_v22 }
 0x158   : > { %v1410_v27 = vpack.c.bf16 %v1286_v25, %v1285_v23  ;;  %v1292_v28 = vsel %vm1036_vm9, %v888_v56, %v1164_v24 }
 0x159   : > { %v1413_v29 = vpack.c.bf16 %v1292_v28, %v1291_v26  ;;  %v936_v30 = vpop.f32.mrf.mxu2 }
 0x15a   : > { %1474 = vst [vmem:[#allocation2 + $0x18] sm:$0xff] %v1410_v27  ;;  %v937_v53 = vadd.f32 %v936_v30, %v5732_v1  ;;  %v985_v31 = vpop.f32.mrf.mxu3  ;;  %v841_v32 = vpop.f32.mrf.mxu0 }
 0x15b   : > { %1477 = vst [vmem:[#allocation2 + $0x30] sm:$0xff] %v1413_v29  ;;  %v986_v33 = vadd.f32 %v985_v31, %v5735_v3  ;;  %v842_v38 = vadd.f32 %v841_v32, %v5722_v50  ;;  %v890_v34 = vpop.f32.mrf.mxu1 }
 0x15c   : > { %vm1037_vm10 = vcmp.gt.f32.partialorder %v937_v53, 0.0  ;;  %v1165_v35 = vmul.f32 0.01, %v937_v53  ;;  %v891_v36 = vadd.f32 %v890_v34, %v5725_v57 }
 0x15d   : > { %vm1038_vm11 = vcmp.gt.f32.partialorder %v986_v33, 0.0  ;;  %v1166_v39 = vmul.f32 0.01, %v986_v33  ;;  %vm1043_vm12 = vcmp.gt.f32.partialorder %v842_v38, 0.0  ;;  %v1171_v40 = vmul.f32 0.01, %v842_v38 }
 0x15e   : > { %v1293_v41 = vsel %vm1037_vm10, %v937_v53, %v1165_v35  ;;  %vm1044_vm13 = vcmp.gt.f32.partialorder %v891_v36, 0.0  ;;  %v1172_v42 = vmul.f32 0.01, %v891_v36 }
 0x15f   : > { %v1294_v43 = vsel %vm1038_vm11, %v986_v33, %v1166_v39  ;;  %v1299_v44 = vsel %vm1043_vm12, %v842_v38, %v1171_v40 }
 0x160   : > { %v1414_v55 = vpack.c.bf16 %v1294_v43, %v1293_v41  ;;  %v1300_v45 = vsel %vm1044_vm13, %v891_v36, %v1172_v42 }
 0x161   : > { %v1417_v46 = vpack.c.bf16 %v1300_v45, %v1299_v44  ;;  %v939_v47 = vpop.f32.mrf.mxu2 }
 0x162   : > { %1478 = vst [vmem:[#allocation2 + $0x38] sm:$0xff] %v1414_v55  ;;  %v940_v48 = vadd.f32 %v939_v47, %v5732_v1  ;;  %v988_v49 = vpop.f32.mrf.mxu3  ;;  %v843_v59 = vpop.f32.mrf.mxu0 }
 0x163   : > { %1481 = vst [vmem:[#allocation2 + $0x50] sm:$0xff] %v1417_v46  ;;  %v989_v52 = vadd.f32 %v988_v49, %v5735_v3  ;;  %v844_v60 = vadd.f32 %v843_v59, %v5722_v50  ;;  %v892_v37 = vpop.f32.mrf.mxu1 }
 0x164   : > { %vm1045_vm14 = vcmp.gt.f32.partialorder %v940_v48, 0.0  ;;  %v1173_v58 = vmul.f32 0.01, %v940_v48  ;;  %v893_v61 = vadd.f32 %v892_v37, %v5725_v57 }
 0x165   : > { %vm1046_vm0 = vcmp.gt.f32.partialorder %v989_v52, 0.0  ;;  %v1174_v62 = vmul.f32 0.01, %v989_v52  ;;  %vm1051_vm15 = vcmp.gt.f32.partialorder %v844_v60, 0.0  ;;  %v1179_v63 = vmul.f32 0.01, %v844_v60 }
 0x166   : > { %v1301_v0 = vsel %vm1045_vm14, %v940_v48, %v1173_v58  ;;  %vm1052_vm1 = vcmp.gt.f32.partialorder %v893_v61, 0.0  ;;  %v1180_v2 = vmul.f32 0.01, %v893_v61 }
 0x167   : > { %v1302_v4 = vsel %vm1046_vm0, %v989_v52, %v1174_v62  ;;  %v1307_v5 = vsel %vm1051_vm15, %v844_v60, %v1179_v63 }
 0x168   : > { %v1418_v6 = vpack.c.bf16 %v1302_v4, %v1301_v0  ;;  %v1308_v7 = vsel %vm1052_vm1, %v893_v61, %v1180_v2 }
 0x169   : > { %v1421_v8 = vpack.c.bf16 %v1308_v7, %v1307_v5  ;;  %v941_v9 = vpop.f32.mrf.mxu2 }
 0x16a   : > { %1482 = vst [vmem:[#allocation2 + $0x58] sm:$0xff] %v1418_v6  ;;  %v942_v10 = vadd.f32 %v941_v9, %v5732_v1  ;;  %v990_v54 = vpop.f32.mrf.mxu3  ;;  %v846_v11 = vpop.f32.mrf.mxu0 }
 0x16b   : > { %1485 = vst [vmem:[#allocation2 + $0x70] sm:$0xff] %v1421_v8  ;;  %v991_v12 = vadd.f32 %v990_v54, %v5735_v3  ;;  %v847_v13 = vadd.f32 %v846_v11, %v5722_v50  ;;  %v895_v14 = vpop.f32.mrf.mxu1 }
 0x16c   : > { %vm1053_vm2 = vcmp.gt.f32.partialorder %v942_v10, 0.0  ;;  %v1181_v15 = vmul.f32 0.01, %v942_v10  ;;  %v896_v51 = vadd.f32 %v895_v14, %v5725_v57 }
 0x16d   : > { %vm1054_vm3 = vcmp.gt.f32.partialorder %v991_v12, 0.0  ;;  %v1182_v16 = vmul.f32 0.01, %v991_v12  ;;  %vm1059_vm4 = vcmp.gt.f32.partialorder %v847_v13, 0.0  ;;  %v1187_v17 = vmul.f32 0.01, %v847_v13 }
 0x16e   : > { %v1309_v18 = vsel %vm1053_vm2, %v942_v10, %v1181_v15  ;;  %vm1060_vm5 = vcmp.gt.f32.partialorder %v896_v51, 0.0  ;;  %v1188_v19 = vmul.f32 0.01, %v896_v51 }
 0x16f   : > { %v1310_v20 = vsel %vm1054_vm3, %v991_v12, %v1182_v16  ;;  %v1315_v56 = vsel %vm1059_vm4, %v847_v13, %v1187_v17 }
 0x170   : > { %v1422_v21 = vpack.c.bf16 %v1310_v20, %v1309_v18  ;;  %v1316_v22 = vsel %vm1060_vm5, %v896_v51, %v1188_v19 }
 0x171   : > { %v1425_v23 = vpack.c.bf16 %v1316_v22, %v1315_v56  ;;  %v944_v24 = vpop.f32.mrf.mxu2 }
 0x172   : > { %1486 = vst [vmem:[#allocation2 + $0x78] sm:$0xff] %v1422_v21  ;;  %v945_v25 = vadd.f32 %v944_v24, %v5732_v1  ;;  %v993_v26 = vpop.f32.mrf.mxu3  ;;  %v848_v27 = vpop.f32.mrf.mxu0 }
 0x173   : > { %1489 = vst [vmem:[#allocation2 + $0x90] sm:$0xff] %v1425_v23  ;;  %v994_v28 = vadd.f32 %v993_v26, %v5735_v3  ;;  %v849_v29 = vadd.f32 %v848_v27, %v5722_v50  ;;  %v897_v30 = vpop.f32.mrf.mxu1 }
 0x174   : > { %vm1061_vm6 = vcmp.gt.f32.partialorder %v945_v25, 0.0  ;;  %v1189_v53 = vmul.f32 0.01, %v945_v25  ;;  %v898_v31 = vadd.f32 %v897_v30, %v5725_v57 }
 0x175   : > { %vm1062_vm7 = vcmp.gt.f32.partialorder %v994_v28, 0.0  ;;  %v1190_v32 = vmul.f32 0.01, %v994_v28  ;;  %vm1067_vm8 = vcmp.gt.f32.partialorder %v849_v29, 0.0  ;;  %v1195_v33 = vmul.f32 0.01, %v849_v29 }
 0x176   : > { %v1317_v38 = vsel %vm1061_vm6, %v945_v25, %v1189_v53  ;;  %vm1068_vm9 = vcmp.gt.f32.partialorder %v898_v31, 0.0  ;;  %v1196_v34 = vmul.f32 0.01, %v898_v31 }
 0x177   : > { %v1318_v35 = vsel %vm1062_vm7, %v994_v28, %v1190_v32  ;;  %v1323_v36 = vsel %vm1067_vm8, %v849_v29, %v1195_v33 }
 0x178   : > { %v1426_v39 = vpack.c.bf16 %v1318_v35, %v1317_v38  ;;  %v1324_v40 = vsel %vm1068_vm9, %v898_v31, %v1196_v34 }
 0x179   : > { %v1429_v41 = vpack.c.bf16 %v1324_v40, %v1323_v36  ;;  %v946_v42 = vpop.f32.mrf.mxu2 }
 0x17a   : > { %1490 = vst [vmem:[#allocation2 + $0x98] sm:$0xff] %v1426_v39  ;;  %v947_v43 = vadd.f32 %v946_v42, %v5732_v1  ;;  %v995_v44 = vpop.f32.mrf.mxu3  ;;  %v851_v55 = vpop.f32.mrf.mxu0 }
 0x17b   : > { %1493 = vst [vmem:[#allocation2 + $0xb0] sm:$0xff] %v1429_v41  ;;  %v996_v45 = vadd.f32 %v995_v44, %v5735_v3  ;;  %v852_v46 = vadd.f32 %v851_v55, %v5722_v50  ;;  %v900_v47 = vpop.f32.mrf.mxu1 }
 0x17c   : > { %vm1069_vm10 = vcmp.gt.f32.partialorder %v947_v43, 0.0  ;;  %v1197_v48 = vmul.f32 0.01, %v947_v43  ;;  %v901_v49 = vadd.f32 %v900_v47, %v5725_v57 }
 0x17d   : > { %vm1070_vm11 = vcmp.gt.f32.partialorder %v996_v45, 0.0  ;;  %v1198_v59 = vmul.f32 0.01, %v996_v45  ;;  %vm1075_vm12 = vcmp.gt.f32.partialorder %v852_v46, 0.0  ;;  %v1203_v52 = vmul.f32 0.01, %v852_v46 }
 0x17e   : > { %v1325_v60 = vsel %vm1069_vm10, %v947_v43, %v1197_v48  ;;  %vm1076_vm13 = vcmp.gt.f32.partialorder %v901_v49, 0.0  ;;  %v1204_v37 = vmul.f32 0.01, %v901_v49 }
 0x17f   : > { %v1326_v58 = vsel %vm1070_vm11, %v996_v45, %v1198_v59  ;;  %v1331_v61 = vsel %vm1075_vm12, %v852_v46, %v1203_v52 }
 0x180   : > { %v1430_v62 = vpack.c.bf16 %v1326_v58, %v1325_v60  ;;  %v1332_v63 = vsel %vm1076_vm13, %v901_v49, %v1204_v37 }
 0x181   : > { %v1433_v0 = vpack.c.bf16 %v1332_v63, %v1331_v61  ;;  %v949_v2 = vpop.f32.mrf.mxu2 }
 0x182   : > { %1494 = vst [vmem:[#allocation2 + $0xb8] sm:$0xff] %v1430_v62  ;;  %v950_v4 = vadd.f32 %v949_v2, %v5732_v1  ;;  %v998_v5 = vpop.f32.mrf.mxu3  ;;  %v853_v6 = vpop.f32.mrf.mxu0 }
 0x183   : > { %1497 = vst [vmem:[#allocation2 + $0xd0] sm:$0xff] %v1433_v0  ;;  %v999_v7 = vadd.f32 %v998_v5, %v5735_v3  ;;  %v854_v8 = vadd.f32 %v853_v6, %v5722_v50  ;;  %v902_v9 = vpop.f32.mrf.mxu1 }
 0x184   : > { %vm1077_vm14 = vcmp.gt.f32.partialorder %v950_v4, 0.0  ;;  %v1205_v10 = vmul.f32 0.01, %v950_v4  ;;  %v903_v54 = vadd.f32 %v902_v9, %v5725_v57 }
 0x185   : > { %vm1078_vm0 = vcmp.gt.f32.partialorder %v999_v7, 0.0  ;;  %v1206_v11 = vmul.f32 0.01, %v999_v7  ;;  %vm1083_vm15 = vcmp.gt.f32.partialorder %v854_v8, 0.0  ;;  %v1211_v12 = vmul.f32 0.01, %v854_v8 }
 0x186   : > { %v1333_v13 = vsel %vm1077_vm14, %v950_v4, %v1205_v10  ;;  %vm1084_vm1 = vcmp.gt.f32.partialorder %v903_v54, 0.0  ;;  %v1212_v14 = vmul.f32 0.01, %v903_v54 }
 0x187   : > { %v1334_v15 = vsel %vm1078_vm0, %v999_v7, %v1206_v11  ;;  %v1339_v51 = vsel %vm1083_vm15, %v854_v8, %v1211_v12 }
 0x188   : > { %v1434_v16 = vpack.c.bf16 %v1334_v15, %v1333_v13  ;;  %v1340_v17 = vsel %vm1084_vm1, %v903_v54, %v1212_v14 }
 0x189   : > { %v1437_v18 = vpack.c.bf16 %v1340_v17, %v1339_v51  ;;  %v951_v19 = vpop.f32.mrf.mxu2 }
 0x18a   : > { %1498 = vst [vmem:[#allocation2 + $0xd8] sm:$0xff] %v1434_v16  ;;  %v952_v20 = vadd.f32 %v951_v19, %v5732_v1  ;;  %v1000_v56 = vpop.f32.mrf.mxu3  ;;  %v856_v21 = vpop.f32.mrf.mxu0 }
 0x18b   : > { %1501 = vst [vmem:[#allocation2 + $0xf0] sm:$0xff] %v1437_v18  ;;  %v1001_v22 = vadd.f32 %v1000_v56, %v5735_v3  ;;  %v857_v23 = vadd.f32 %v856_v21, %v5722_v50  ;;  %v905_v24 = vpop.f32.mrf.mxu1 }
 0x18c   : > { %vm1085_vm2 = vcmp.gt.f32.partialorder %v952_v20, 0.0  ;;  %v1213_v25 = vmul.f32 0.01, %v952_v20  ;;  %v906_v26 = vadd.f32 %v905_v24, %v5725_v57 }
 0x18d   : > { %vm1086_vm3 = vcmp.gt.f32.partialorder %v1001_v22, 0.0  ;;  %v1214_v27 = vmul.f32 0.01, %v1001_v22  ;;  %vm1091_vm4 = vcmp.gt.f32.partialorder %v857_v23, 0.0  ;;  %v1219_v28 = vmul.f32 0.01, %v857_v23 }
 0x18e   : > { %v1341_v29 = vsel %vm1085_vm2, %v952_v20, %v1213_v25  ;;  %vm1092_vm5 = vcmp.gt.f32.partialorder %v906_v26, 0.0  ;;  %v1220_v30 = vmul.f32 0.01, %v906_v26 }
 0x18f   : > { %v1342_v53 = vsel %vm1086_vm3, %v1001_v22, %v1214_v27  ;;  %v1347_v31 = vsel %vm1091_vm4, %v857_v23, %v1219_v28 }
 0x190   : > { %v1438_v32 = vpack.c.bf16 %v1342_v53, %v1341_v29  ;;  %v1348_v33 = vsel %vm1092_vm5, %v906_v26, %v1220_v30 }
 0x191   : > { %v1441_v38 = vpack.c.bf16 %v1348_v33, %v1347_v31  ;;  %v954_v34 = vpop.f32.mrf.mxu2 }
 0x192   : > { %1502 = vst [vmem:[#allocation2 + $0xf8] sm:$0xff] %v1438_v32  ;;  %v955_v35 = vadd.f32 %v954_v34, %v5732_v1  ;;  %v1003_v36 = vpop.f32.mrf.mxu3  ;;  %v858_v39 = vpop.f32.mrf.mxu0 }
 0x193   : > { %1505 = vst [vmem:[#allocation2 + $0x110] sm:$0xff] %v1441_v38  ;;  %v1004_v40 = vadd.f32 %v1003_v36, %v5735_v3  ;;  %v859_v41 = vadd.f32 %v858_v39, %v5722_v50  ;;  %v907_v42 = vpop.f32.mrf.mxu1 }
 0x194   : > { %vm1093_vm6 = vcmp.gt.f32.partialorder %v955_v35, 0.0  ;;  %v1221_v43 = vmul.f32 0.01, %v955_v35  ;;  %v908_v44 = vadd.f32 %v907_v42, %v5725_v57 }
 0x195   : > { %vm1094_vm7 = vcmp.gt.f32.partialorder %v1004_v40, 0.0  ;;  %v1222_v55 = vmul.f32 0.01, %v1004_v40  ;;  %vm1099_vm8 = vcmp.gt.f32.partialorder %v859_v41, 0.0  ;;  %v1227_v45 = vmul.f32 0.01, %v859_v41 }
 0x196   : > { %v1349_v46 = vsel %vm1093_vm6, %v955_v35, %v1221_v43  ;;  %vm1100_vm9 = vcmp.gt.f32.partialorder %v908_v44, 0.0  ;;  %v1228_v47 = vmul.f32 0.01, %v908_v44 }
 0x197   : > { %v1350_v48 = vsel %vm1094_vm7, %v1004_v40, %v1222_v55  ;;  %v1355_v49 = vsel %vm1099_vm8, %v859_v41, %v1227_v45 }
 0x198   : > { %v1442_v59 = vpack.c.bf16 %v1350_v48, %v1349_v46  ;;  %v1356_v52 = vsel %vm1100_vm9, %v908_v44, %v1228_v47 }
 0x199   : > { %v1445_v60 = vpack.c.bf16 %v1356_v52, %v1355_v49  ;;  %v956_v37 = vpop.f32.mrf.mxu2 }
 0x19a   : > { %1506 = vst [vmem:[#allocation2 + $0x118] sm:$0xff] %v1442_v59  ;;  %v957_v58 = vadd.f32 %v956_v37, %v5732_v1  ;;  %v1005_v61 = vpop.f32.mrf.mxu3  ;;  %v861_v62 = vpop.f32.mrf.mxu0 }
 0x19b   : > { %1509 = vst [vmem:[#allocation2 + $0x130] sm:$0xff] %v1445_v60  ;;  %v1006_v63 = vadd.f32 %v1005_v61, %v5735_v3  ;;  %v862_v0 = vadd.f32 %v861_v62, %v5722_v50  ;;  %v910_v2 = vpop.f32.mrf.mxu1  ;;  %v5302_v62 = vmov 0.0  }
 0x19c   : > { %vm1101_vm10 = vcmp.gt.f32.partialorder %v957_v58, 0.0  ;;  %v1229_v4 = vmul.f32 0.01, %v957_v58  ;;  %v911_v5 = vadd.f32 %v910_v2, %v5725_v57  ;;  %1535 = vst [vmem:[#allocation3] sm:$0x1] %v5302_v62 }
 0x19d   : > { %vm1102_vm11 = vcmp.gt.f32.partialorder %v1006_v63, 0.0  ;;  %v1230_v6 = vmul.f32 0.01, %v1006_v63  ;;  %vm1107_vm12 = vcmp.gt.f32.partialorder %v862_v0, 0.0  ;;  %v1235_v7 = vmul.f32 0.01, %v862_v0 }
 0x19e   : > { %v1357_v8 = vsel %vm1101_vm10, %v957_v58, %v1229_v4  ;;  %vm1108_vm13 = vcmp.gt.f32.partialorder %v911_v5, 0.0  ;;  %v1236_v9 = vmul.f32 0.01, %v911_v5 }
 0x19f   : > { %v1358_v10 = vsel %vm1102_vm11, %v1006_v63, %v1230_v6  ;;  %v1363_v54 = vsel %vm1107_vm12, %v862_v0, %v1235_v7 }
 0x1a0   : > { %v1446_v11 = vpack.c.bf16 %v1358_v10, %v1357_v8  ;;  %v1364_v12 = vsel %vm1108_vm13, %v911_v5, %v1236_v9 }
 0x1a1   : > { %v1449_v13 = vpack.c.bf16 %v1364_v12, %v1363_v54  ;;  %v959_v14 = vpop.f32.mrf.mxu2 }
 0x1a2   : > { %1510 = vst [vmem:[#allocation2 + $0x138] sm:$0xff] %v1446_v11  ;;  %v960_v15 = vadd.f32 %v959_v14, %v5732_v1  ;;  %v1008_v51 = vpop.f32.mrf.mxu3  ;;  %v863_v16 = vpop.f32.mrf.mxu0 }
 0x1a3   : > { %1513 = vst [vmem:[#allocation2 + $0x150] sm:$0xff] %v1449_v13  ;;  %v1009_v17 = vadd.f32 %v1008_v51, %v5735_v3  ;;  %v864_v18 = vadd.f32 %v863_v16, %v5722_v50  ;;  %v912_v19 = vpop.f32.mrf.mxu1 }
 0x1a4   : > { %vm1109_vm14 = vcmp.gt.f32.partialorder %v960_v15, 0.0  ;;  %v1237_v20 = vmul.f32 0.01, %v960_v15  ;;  %v913_v56 = vadd.f32 %v912_v19, %v5725_v57 }
 0x1a5   : > { %vm1110_vm0 = vcmp.gt.f32.partialorder %v1009_v17, 0.0  ;;  %v1238_v21 = vmul.f32 0.01, %v1009_v17  ;;  %vm1115_vm15 = vcmp.gt.f32.partialorder %v864_v18, 0.0  ;;  %v1243_v22 = vmul.f32 0.01, %v864_v18 }
 0x1a6   : > { %v1365_v23 = vsel %vm1109_vm14, %v960_v15, %v1237_v20  ;;  %vm1116_vm1 = vcmp.gt.f32.partialorder %v913_v56, 0.0  ;;  %v1244_v24 = vmul.f32 0.01, %v913_v56 }
 0x1a7   : > { %v1366_v25 = vsel %vm1110_vm0, %v1009_v17, %v1238_v21  ;;  %v1371_v26 = vsel %vm1115_vm15, %v864_v18, %v1243_v22 }
 0x1a8   : > { %v1450_v27 = vpack.c.bf16 %v1366_v25, %v1365_v23  ;;  %v1372_v28 = vsel %vm1116_vm1, %v913_v56, %v1244_v24 }
 0x1a9   : > { %v1453_v29 = vpack.c.bf16 %v1372_v28, %v1371_v26  ;;  %v961_v30 = vpop.f32.mrf.mxu2 }
 0x1aa   : > { %1514 = vst [vmem:[#allocation2 + $0x158] sm:$0xff] %v1450_v27  ;;  %v962_v53 = vadd.f32 %v961_v30, %v5732_v1  ;;  %v1010_v31 = vpop.f32.mrf.mxu3  ;;  %v866_v32 = vpop.f32.mrf.mxu0 }
 0x1ab   : > { %1517 = vst [vmem:[#allocation2 + $0x170] sm:$0xff] %v1453_v29  ;;  %v1011_v33 = vadd.f32 %v1010_v31, %v5735_v3  ;;  %v867_v38 = vadd.f32 %v866_v32, %v5722_v50  ;;  %v915_v34 = vpop.f32.mrf.mxu1 }
 0x1ac   : > { %vm1117_vm2 = vcmp.gt.f32.partialorder %v962_v53, 0.0  ;;  %v1245_v35 = vmul.f32 0.01, %v962_v53  ;;  %v916_v36 = vadd.f32 %v915_v34, %v5725_v57 }
 0x1ad   : > { %vm1118_vm3 = vcmp.gt.f32.partialorder %v1011_v33, 0.0  ;;  %v1246_v39 = vmul.f32 0.01, %v1011_v33  ;;  %vm1123_vm4 = vcmp.gt.f32.partialorder %v867_v38, 0.0  ;;  %v1251_v40 = vmul.f32 0.01, %v867_v38 }
 0x1ae   : > { %v1373_v41 = vsel %vm1117_vm2, %v962_v53, %v1245_v35  ;;  %vm1124_vm5 = vcmp.gt.f32.partialorder %v916_v36, 0.0  ;;  %v1252_v42 = vmul.f32 0.01, %v916_v36 }
 0x1af   : > { %v1374_v43 = vsel %vm1118_vm3, %v1011_v33, %v1246_v39  ;;  %v1379_v44 = vsel %vm1123_vm4, %v867_v38, %v1251_v40 }
 0x1b0   : > { %v1454_v55 = vpack.c.bf16 %v1374_v43, %v1373_v41  ;;  %v1380_v45 = vsel %vm1124_vm5, %v916_v36, %v1252_v42 }
 0x1b1   : > { %v1457_v46 = vpack.c.bf16 %v1380_v45, %v1379_v44  ;;  %v964_v47 = vpop.f32.mrf.mxu2 }
 0x1b2   : > { %1518 = vst [vmem:[#allocation2 + $0x178] sm:$0xff] %v1454_v55  ;;  %v965_v48 = vadd.f32 %v964_v47, %v5732_v1  ;;  %v1013_v49 = vpop.f32.mrf.mxu3  ;;  %v868_v59 = vpop.f32.mrf.mxu0 }
 0x1b3   : > { %1521 = vst [vmem:[#allocation2 + $0x190] sm:$0xff] %v1457_v46  ;;  %v1014_v52 = vadd.f32 %v1013_v49, %v5735_v3  ;;  %v869_v60 = vadd.f32 %v868_v59, %v5722_v50  ;;  %v917_v37 = vpop.f32.mrf.mxu1 }
 0x1b4   : > { %vm1125_vm6 = vcmp.gt.f32.partialorder %v965_v48, 0.0  ;;  %v1253_v58 = vmul.f32 0.01, %v965_v48  ;;  %v918_v61 = vadd.f32 %v917_v37, %v5725_v57 }
 0x1b5   : > { %vm1126_vm7 = vcmp.gt.f32.partialorder %v1014_v52, 0.0  ;;  %v1254_v63 = vmul.f32 0.01, %v1014_v52  ;;  %vm1131_vm8 = vcmp.gt.f32.partialorder %v869_v60, 0.0  ;;  %v1259_v0 = vmul.f32 0.01, %v869_v60 }
 0x1b6   : > { %v1381_v2 = vsel %vm1125_vm6, %v965_v48, %v1253_v58  ;;  %vm1132_vm9 = vcmp.gt.f32.partialorder %v918_v61, 0.0  ;;  %v1260_v4 = vmul.f32 0.01, %v918_v61 }
 0x1b7   : > { %v1382_v5 = vsel %vm1126_vm7, %v1014_v52, %v1254_v63  ;;  %v1387_v6 = vsel %vm1131_vm8, %v869_v60, %v1259_v0 }
 0x1b8   : > { %v1458_v7 = vpack.c.bf16 %v1382_v5, %v1381_v2  ;;  %v1388_v8 = vsel %vm1132_vm9, %v918_v61, %v1260_v4 }
 0x1b9   : > { %v1461_v9 = vpack.c.bf16 %v1388_v8, %v1387_v6  ;;  %v966_v10 = vpop.f32.mrf.mxu2 }
 0x1ba   : > { %1522 = vst [vmem:[#allocation2 + $0x198] sm:$0xff] %v1458_v7  ;;  %v967_v54 = vadd.f32 %v966_v10, %v5732_v1  ;;  %v1015_v11 = vpop.f32.mrf.mxu3  ;;  %v871_v12 = vpop.f32.mrf.mxu0 }
 0x1bb   : > { %1525 = vst [vmem:[#allocation2 + $0x1b0] sm:$0xff] %v1461_v9  ;;  %v1016_v13 = vadd.f32 %v1015_v11, %v5735_v3  ;;  %v872_v14 = vadd.f32 %v871_v12, %v5722_v50  ;;  %v920_v15 = vpop.f32.mrf.mxu1 }
 0x1bc   : > { %vm1133_vm10 = vcmp.gt.f32.partialorder %v967_v54, 0.0  ;;  %v1261_v51 = vmul.f32 0.01, %v967_v54  ;;  %v921_v16 = vadd.f32 %v920_v15, %v5725_v57 }
 0x1bd   : > { %vm1134_vm11 = vcmp.gt.f32.partialorder %v1016_v13, 0.0  ;;  %v1262_v17 = vmul.f32 0.01, %v1016_v13  ;;  %vm1139_vm12 = vcmp.gt.f32.partialorder %v872_v14, 0.0  ;;  %v1267_v18 = vmul.f32 0.01, %v872_v14 }
 0x1be   : > { %v1389_v19 = vsel %vm1133_vm10, %v967_v54, %v1261_v51  ;;  %vm1140_vm13 = vcmp.gt.f32.partialorder %v921_v16, 0.0  ;;  %v1268_v20 = vmul.f32 0.01, %v921_v16 }
 0x1bf   : > { %v1390_v56 = vsel %vm1134_vm11, %v1016_v13, %v1262_v17  ;;  %v1395_v21 = vsel %vm1139_vm12, %v872_v14, %v1267_v18 }
 0x1c0   : > { %v1462_v22 = vpack.c.bf16 %v1390_v56, %v1389_v19  ;;  %v1396_v23 = vsel %vm1140_vm13, %v921_v16, %v1268_v20 }
 0x1c1   : > { %v1465_v24 = vpack.c.bf16 %v1396_v23, %v1395_v21  ;;  %v969_v25 = vpop.f32.mrf.mxu2 }
 0x1c2   : > { %1526 = vst [vmem:[#allocation2 + $0x1b8] sm:$0xff] %v1462_v22  ;;  %v970_v26 = vadd.f32 %v969_v25, %v5732_v1  ;;  %v1018_v27 = vpop.f32.mrf.mxu3  ;;  %v873_v28 = vpop.f32.mrf.mxu0 }
 0x1c3   : > { %1529 = vst [vmem:[#allocation2 + $0x1d0] sm:$0xff] %v1465_v24  ;;  %v1019_v29 = vadd.f32 %v1018_v27, %v5735_v3  ;;  %v874_v30 = vadd.f32 %v873_v28, %v5722_v50  ;;  %v922_v53 = vpop.f32.mrf.mxu1 }
 0x1c4   : > { %vm1141_vm14 = vcmp.gt.f32.partialorder %v970_v26, 0.0  ;;  %v1269_v31 = vmul.f32 0.01, %v970_v26  ;;  %v923_v32 = vadd.f32 %v922_v53, %v5725_v57 }
 0x1c5   : > { %vm1142_vm0 = vcmp.gt.f32.partialorder %v1019_v29, 0.0  ;;  %v1270_v33 = vmul.f32 0.01, %v1019_v29  ;;  %vm1147_vm15 = vcmp.gt.f32.partialorder %v874_v30, 0.0  ;;  %v1275_v38 = vmul.f32 0.01, %v874_v30 }
 0x1c6   : > { %v1397_v34 = vsel %vm1141_vm14, %v970_v26, %v1269_v31  ;;  %vm1148_vm1 = vcmp.gt.f32.partialorder %v923_v32, 0.0  ;;  %v1276_v35 = vmul.f32 0.01, %v923_v32 }
 0x1c7   : > { %v1398_v36 = vsel %vm1142_vm0, %v1019_v29, %v1270_v33  ;;  %v1403_v39 = vsel %vm1147_vm15, %v874_v30, %v1275_v38 }
 0x1c8   : > { %v1466_v40 = vpack.c.bf16 %v1398_v36, %v1397_v34  ;;  %v1404_v41 = vsel %vm1148_vm1, %v923_v32, %v1276_v35 }
 0x1c9   : > { %v1469_v42 = vpack.c.bf16 %v1404_v41, %v1403_v39  ;;  %v971_v43 = vpop.f32.mrf.mxu2 }
 0x1ca   : > { %1530 = vst [vmem:[#allocation2 + $0x1d8] sm:$0xff] %v1466_v40  ;;  %v972_v50 = vadd.f32 %v971_v43, %v5732_v1  ;;  %v1020_v44 = vpop.f32.mrf.mxu3 }
 0x1cb   : > { %1533 = vst [vmem:[#allocation2 + $0x1f0] sm:$0xff] %v1469_v42  ;;  %v1021_v57 = vadd.f32 %v1020_v44, %v5735_v3 }
 0x1cc   : > { %vm1149_vm2 = vcmp.gt.f32.partialorder %v972_v50, 0.0  ;;  %v1277_v55 = vmul.f32 0.01, %v972_v50 }
 0x1cd   : > { %vm1150_vm3 = vcmp.gt.f32.partialorder %v1021_v57, 0.0  ;;  %v1278_v45 = vmul.f32 0.01, %v1021_v57 }
 0x1ce   : > { %v1405_v46 = vsel %vm1149_vm2, %v972_v50, %v1277_v55 }
 0x1cf   : > { %v1406_v47 = vsel %vm1150_vm3, %v1021_v57, %v1278_v45 }
 0x1d0   : > { %v1470_v48 = vpack.c.bf16 %v1406_v47, %v1405_v46 }
 0x1d2   : > { %1534 = vst [vmem:[#allocation2 + $0x1f8] sm:$0xff] %v1470_v48 }
 0x1d3 PF: > { %v4277_v1 = vld [vmem:[%s5466_s21 + $0x70] sm:$0xf]  ;;  %v4840_v3 = vld [vmem:[%s5466_s21 + $0x74] sm:$0xf0]  ;;  %v4269_v0 = vld [vmem:[%s5466_s21 + $0x60] sm:$0xf] }
 0x1d4   : > { %v4341_v49 = vld [vmem:[%s5466_s21 + $0xf0] sm:$0xf]  ;;  %v4278_v59 = vor.u32 %v4840_v3, %v4277_v1  ;;  %v4856_v52 = vld [vmem:[%s5466_s21 + $0xf4] sm:$0xf0]  ;;  %v4838_v4 = vld [vmem:[%s5466_s21 + $0x64] sm:$0xf0] }
 0x1d5   : > { %v4405_v60 = vld [vmem:[%s5466_s21 + $0x170] sm:$0xf]  ;;  %v4872_v37 = vld [vmem:[%s5466_s21 + $0x174] sm:$0xf0]  ;;  %v4342_v58 = vor.u32 %v4856_v52, %v4341_v49  ;;  %v4333_v5 = vld [vmem:[%s5466_s21 + $0xe0] sm:$0xf]  ;;  %v4270_v7 = vor.u32 %v4838_v4, %v4269_v0 }
 0x1d6   : > { %v4406_v61 = vor.u32 %v4872_v37, %v4405_v60  ;;  %v4469_v62 = vld [vmem:[%s5466_s21 + $0x1f0] sm:$0xf]  ;;  %v4888_v63 = vld [vmem:[%s5466_s21 + $0x1f4] sm:$0xf0]  ;;  %2694 = vmatpush.bf16.msra.mxu0 %v4278_v59  ;;  %v4854_v6 = vld [vmem:[%s5466_s21 + $0xe4] sm:$0xf0] }
 0x1d7   : > { %v4470_v2 = vor.u32 %v4888_v63, %v4469_v62  ;;  %2743 = vmatpush.bf16.msra.mxu1 %v4342_v58  ;;  %v4334_v8 = vor.u32 %v4854_v6, %v4333_v5  ;;  %v4397_v9 = vld [vmem:[%s5466_s21 + $0x160] sm:$0xf]  ;;  %v4870_v10 = vld [vmem:[%s5466_s21 + $0x164] sm:$0xf0]  ;;  %v4261_v13 = vld [vmem:[%s5466_s21 + $0x50] sm:$0xf] }
 0x1d8   : > { %2792 = vmatpush.bf16.msra.mxu2 %v4406_v61  ;;  %v4461_v54 = vld [vmem:[%s5466_s21 + $0x1e0] sm:$0xf]  ;;  %v4398_v11 = vor.u32 %v4870_v10, %v4397_v9  ;;  %v4886_v12 = vld [vmem:[%s5466_s21 + $0x1e4] sm:$0xf0]  ;;  %v4836_v14 = vld [vmem:[%s5466_s21 + $0x54] sm:$0xf0] }
 0x1d9   : > { %2841 = vmatpush.bf16.msra.mxu3 %v4470_v2  ;;  %v4462_v15 = vor.u32 %v4886_v12, %v4461_v54  ;;  %v4325_v51 = vld [vmem:[%s5466_s21 + $0xd0] sm:$0xf]  ;;  %v4852_v16 = vld [vmem:[%s5466_s21 + $0xd4] sm:$0xf0]  ;;  %v4262_v18 = vor.u32 %v4836_v14, %v4261_v13  ;;  %v4253_v23 = vld [vmem:[%s5466_s21 + $0x40] sm:$0xf] }
 0x1da   : > { %v4389_v17 = vld [vmem:[%s5466_s21 + $0x150] sm:$0xf]  ;;  %2695 = vmatpush.bf16.msra.mxu0 %v4270_v7  ;;  %v4868_v19 = vld [vmem:[%s5466_s21 + $0x154] sm:$0xf0]  ;;  %v4326_v21 = vor.u32 %v4852_v16, %v4325_v51  ;;  %v4834_v24 = vld [vmem:[%s5466_s21 + $0x44] sm:$0xf0] }
 0x1db   : > { %v4453_v20 = vld [vmem:[%s5466_s21 + $0x1d0] sm:$0xf]  ;;  %v4884_v56 = vld [vmem:[%s5466_s21 + $0x1d4] sm:$0xf0]  ;;  %2744 = vmatpush.bf16.msra.mxu1 %v4334_v8  ;;  %v4390_v22 = vor.u32 %v4868_v19, %v4389_v17  ;;  %v4317_v25 = vld [vmem:[%s5466_s21 + $0xc0] sm:$0xf]  ;;  %v4254_v31 = vor.u32 %v4834_v24, %v4253_v23 }
 0x1dc   : > { %2793 = vmatpush.bf16.msra.mxu2 %v4398_v11  ;;  %v4454_v26 = vor.u32 %v4884_v56, %v4453_v20  ;;  %v4850_v27 = vld [vmem:[%s5466_s21 + $0xc4] sm:$0xf0]  ;;  %v4381_v28 = vld [vmem:[%s5466_s21 + $0x140] sm:$0xf]  ;;  %v4245_v38 = vld [vmem:[%s5466_s21 + $0x30] sm:$0xf] }
 0x1dd   : > { %2842 = vmatpush.bf16.msra.mxu3 %v4462_v15  ;;  %v4866_v29 = vld [vmem:[%s5466_s21 + $0x144] sm:$0xf0]  ;;  %v4445_v30 = vld [vmem:[%s5466_s21 + $0x1c0] sm:$0xf]  ;;  %v4318_v32 = vor.u32 %v4850_v27, %v4317_v25  ;;  %v4832_v34 = vld [vmem:[%s5466_s21 + $0x34] sm:$0xf0] }
 0x1de   : > { %v4882_v53 = vld [vmem:[%s5466_s21 + $0x1c4] sm:$0xf0]  ;;  %2696 = vmatpush.bf16.msra.mxu0 %v4262_v18  ;;  %v4382_v33 = vor.u32 %v4866_v29, %v4381_v28  ;;  %v4309_v35 = vld [vmem:[%s5466_s21 + $0xb0] sm:$0xf]  ;;  %v4848_v39 = vld [vmem:[%s5466_s21 + $0xb4] sm:$0xf0]  ;;  %v4246_v50 = vor.u32 %v4832_v34, %v4245_v38 }
 0x1df   : > { %2745 = vmatpush.bf16.msra.mxu1 %v4326_v21  ;;  %v4446_v36 = vor.u32 %v4882_v53, %v4445_v30  ;;  %v4373_v40 = vld [vmem:[%s5466_s21 + $0x130] sm:$0xf]  ;;  %v4864_v41 = vld [vmem:[%s5466_s21 + $0x134] sm:$0xf0]  ;;  %v4310_v44 = vor.u32 %v4848_v39, %v4309_v35  ;;  %v4237_v55 = vld [vmem:[%s5466_s21 + $0x20] sm:$0xf] }
 0x1e0   : > { %2794 = vmatpush.bf16.msra.mxu2 %v4390_v22  ;;  %v4437_v42 = vld [vmem:[%s5466_s21 + $0x1b0] sm:$0xf]  ;;  %v4880_v43 = vld [vmem:[%s5466_s21 + $0x1b4] sm:$0xf0]  ;;  %v4374_v57 = vor.u32 %v4864_v41, %v4373_v40  ;;  %v4830_v45 = vld [vmem:[%s5466_s21 + $0x24] sm:$0xf0] }
 0x1e1   : > { %2843 = vmatpush.bf16.msra.mxu3 %v4454_v26  ;;  %v4301_v46 = vld [vmem:[%s5466_s21 + $0xa0] sm:$0xf]  ;;  %v4438_v47 = vor.u32 %v4880_v43, %v4437_v42  ;;  %v4846_v48 = vld [vmem:[%s5466_s21 + $0xa4] sm:$0xf0]  ;;  %v4238_v52 = vor.u32 %v4830_v45, %v4237_v55  ;;  %v4229_v58 = vld [vmem:[%s5466_s21 + $0x10] sm:$0xf] }
 0x1e2   : > { %2697 = vmatpush.bf16.msra.mxu0 %v4254_v31  ;;  %v4365_v1 = vld [vmem:[%s5466_s21 + $0x120] sm:$0xf]  ;;  %v4862_v3 = vld [vmem:[%s5466_s21 + $0x124] sm:$0xf0]  ;;  %v4302_v60 = vor.u32 %v4846_v48, %v4301_v46  ;;  %v4828_v61 = vld [vmem:[%s5466_s21 + $0x14] sm:$0xf0] }
 0x1e3   : > { %2746 = vmatpush.bf16.msra.mxu1 %v4318_v32  ;;  %v4429_v49 = vld [vmem:[%s5466_s21 + $0x1a0] sm:$0xf]  ;;  %v4878_v59 = vld [vmem:[%s5466_s21 + $0x1a4] sm:$0xf0]  ;;  %v4366_v37 = vor.u32 %v4862_v3, %v4365_v1  ;;  %v4293_v62 = vld [vmem:[%s5466_s21 + $0x90] sm:$0xf]  ;;  %v4230_v7 = vor.u32 %v4828_v61, %v4229_v58 }
 0x1e4   : > { %2795 = vmatpush.bf16.msra.mxu2 %v4382_v33  ;;  %v4430_v63 = vor.u32 %v4878_v59, %v4429_v49  ;;  %v4844_v0 = vld [vmem:[%s5466_s21 + $0x94] sm:$0xf0]  ;;  %v4357_v2 = vld [vmem:[%s5466_s21 + $0x110] sm:$0xf]  ;;  %v4221_v10 = vld [vmem:[%s5466_s21] sm:$0xf] }
 0x1e5   : > { %2844 = vmatpush.bf16.msra.mxu3 %v4446_v36  ;;  %v4860_v4 = vld [vmem:[%s5466_s21 + $0x114] sm:$0xf0]  ;;  %v4421_v5 = vld [vmem:[%s5466_s21 + $0x190] sm:$0xf]  ;;  %v4294_v8 = vor.u32 %v4844_v0, %v4293_v62  ;;  %v4826_v54 = vld [vmem:[%s5466_s21 + $0x4] sm:$0xf0] }
 0x1e6   : > { %2698 = vmatpush.bf16.msra.mxu0 %v4246_v50  ;;  %v4876_v6 = vld [vmem:[%s5466_s21 + $0x194] sm:$0xf0]  ;;  %v4358_v9 = vor.u32 %v4860_v4, %v4357_v2  ;;  %v4285_v11 = vld [vmem:[%s5466_s21 + $0x80] sm:$0xf]  ;;  %v4842_v13 = vld [vmem:[%s5466_s21 + $0x84] sm:$0xf0]  ;;  %v4222_v17 = vor.u32 %v4826_v54, %v4221_v10 }
 0x1e7   : > { %2747 = vmatpush.bf16.msra.mxu1 %v4310_v44  ;;  %v4422_v12 = vor.u32 %v4876_v6, %v4421_v5  ;;  %v4349_v14 = vld [vmem:[%s5466_s21 + $0x100] sm:$0xf]  ;;  %v4858_v15 = vld [vmem:[%s5466_s21 + $0x104] sm:$0xf0]  ;;  %v3965_v18 = vld [vmem:[#allocation2] sm:$0xf]  ;;  %v4286_v56 = vor.u32 %v4842_v13, %v4285_v11 }
 0x1e8   : > { %2796 = vmatpush.bf16.msra.mxu2 %v4374_v57  ;;  %v4413_v51 = vld [vmem:[%s5466_s21 + $0x180] sm:$0xf]  ;;  %v4874_v16 = vld [vmem:[%s5466_s21 + $0x184] sm:$0xf0]  ;;  %v4765_v19 = vld [vmem:[#allocation2 + $0x1c] sm:$0xf0]  ;;  %v4350_v21 = vor.u32 %v4858_v15, %v4349_v14 }
 0x1e9   : > { %2845 = vmatpush.bf16.msra.mxu3 %v4438_v47  ;;  %v4761_v20 = vld [vmem:[#allocation2 + $0x4] sm:$0xf]  ;;  %v3973_v23 = vld [vmem:[#allocation2 + $0x8] sm:$0xf]  ;;  %v4414_v25 = vor.u32 %v4874_v16, %v4413_v51  ;;  %v4762_v26 = vld [vmem:[#allocation2 + $0xc] sm:$0xf]  ;;  %v5863_v28 = vor.u32 %v4765_v19, %v3965_v18 }
 0x1ea   : > { %2699 = vmatpush.bf16.msra.mxu0 %v4238_v52  ;;  %v3967_v22 = vld [vmem:[#allocation2 + $0x20] sm:$0xf0]  ;;  %v4766_v24 = vld [vmem:[#allocation2 + $0x24] sm:$0xf0]  ;;  %v3975_v27 = vld [vmem:[#allocation2 + $0x28] sm:$0xf0] }
 0x1eb   : > { %2748 = vmatpush.bf16.msra.mxu1 %v4302_v60  ;;  %v5865_v29 = vor.u32 %v4761_v20, %v3967_v22  ;;  %v5867_v30 = vor.u32 %v4766_v24, %v3973_v23  ;;  %v5869_v53 = vor.u32 %v4762_v26, %v3975_v27  ;;  %v3997_v31 = vld [vmem:[#allocation2 + $0x40] sm:$0xf]  ;;  %v4769_v33 = vld [vmem:[#allocation2 + $0x44] sm:$0xf]  ;;  %v4005_v34 = vld [vmem:[#allocation2 + $0x48] sm:$0xf] }
 0x1ec   : > { %2797 = vmatpush.bf16.msra.mxu2 %v4366_v37  ;;  %v4773_v32 = vld [vmem:[#allocation2 + $0x5c] sm:$0xf0]  ;;  %v3999_v38 = vld [vmem:[#allocation2 + $0x60] sm:$0xf0]  ;;  %v4774_v35 = vld [vmem:[#allocation2 + $0x64] sm:$0xf0] }
 0x1ed   : > { %2846 = vmatpush.bf16.msra.mxu3 %v4430_v63  ;;  %v4770_v36 = vld [vmem:[#allocation2 + $0x4c] sm:$0xf]  ;;  %v5875_v40 = vor.u32 %v4773_v32, %v3997_v31  ;;  %v5877_v41 = vor.u32 %v4769_v33, %v3999_v38  ;;  %v5879_v42 = vor.u32 %v4774_v35, %v4005_v34  ;;  %v4029_v50 = vld [vmem:[#allocation2 + $0x80] sm:$0xf]  ;;  %v4777_v57 = vld [vmem:[#allocation2 + $0x84] sm:$0xf] }
 0x1ee   : > { %2700 = vmatpush.bf16.msra.mxu0 %v4230_v7  ;;  %v4007_v39 = vld [vmem:[#allocation2 + $0x68] sm:$0xf0]  ;;  %v4781_v44 = vld [vmem:[#allocation2 + $0x9c] sm:$0xf0]  ;;  %v4031_v55 = vld [vmem:[#allocation2 + $0xa0] sm:$0xf0] }
 0x1ef   : > { %2749 = vmatpush.bf16.msra.mxu1 %v4294_v8  ;;  %v5881_v43 = vor.u32 %v4770_v36, %v4007_v39  ;;  %v4037_v45 = vld [vmem:[#allocation2 + $0x88] sm:$0xf]  ;;  %v4778_v47 = vld [vmem:[#allocation2 + $0x8c] sm:$0xf]  ;;  %v5887_v1 = vor.u32 %v4781_v44, %v4029_v50  ;;  %v5889_v3 = vor.u32 %v4777_v57, %v4031_v55  ;;  %v4661_v52 = vld [vmem:[%s5466_s21 + $0x370] sm:$0xf] }
 0x1f0   : > { %2798 = vmatpush.bf16.msra.mxu2 %v4358_v9  ;;  %v4782_v46 = vld [vmem:[#allocation2 + $0xa4] sm:$0xf0]  ;;  %v4039_v48 = vld [vmem:[#allocation2 + $0xa8] sm:$0xf0]  ;;  %v4936_v60 = vld [vmem:[%s5466_s21 + $0x374] sm:$0xf0] }
 0x1f1   : > { %2847 = vmatpush.bf16.msra.mxu3 %v4422_v12  ;;  %v5891_v49 = vor.u32 %v4782_v46, %v4037_v45  ;;  %v5893_v59 = vor.u32 %v4778_v47, %v4039_v48  ;;  %v4533_v37 = vld [vmem:[%s5466_s21 + $0x270] sm:$0xf]  ;;  %v4662_v58 = vor.u32 %v4936_v60, %v4661_v52  ;;  %v4904_v61 = vld [vmem:[%s5466_s21 + $0x274] sm:$0xf0]  ;;  %v4069_v54 = vld [vmem:[#allocation2 + $0xc8] sm:$0xf] }
 0x1f2   : > { %2701 = vmatpush.bf16.msra.mxu0 %v4222_v17  ;;  %v4725_v62 = vld [vmem:[%s5466_s21 + $0x3f0] sm:$0xf]  ;;  %v4952_v63 = vld [vmem:[%s5466_s21 + $0x3f4] sm:$0xf0]  ;;  %v4534_v0 = vor.u32 %v4904_v61, %v4533_v37  ;;  %v4790_v11 = vld [vmem:[#allocation2 + $0xe4] sm:$0xf0] }
 0x1f3   : > { %2750 = vmatpush.bf16.msra.mxu1 %v4286_v56  ;;  %v4726_v2 = vor.u32 %v4952_v63, %v4725_v62  ;;  %v4597_v4 = vld [vmem:[%s5466_s21 + $0x2f0] sm:$0xf]  ;;  %v4920_v5 = vld [vmem:[%s5466_s21 + $0x2f4] sm:$0xf0]  ;;  %v4786_v12 = vld [vmem:[#allocation2 + $0xcc] sm:$0xf]  ;;  %v5911_v51 = vor.u32 %v4790_v11, %v4069_v54 }
 0x1f4   : > { %2799 = vmatpush.bf16.msra.mxu2 %v4350_v21  ;;  %v4598_v6 = vor.u32 %v4920_v5, %v4597_v4  ;;  %v4061_v7 = vld [vmem:[#allocation2 + $0xc0] sm:$0xf]  ;;  %v4785_v9 = vld [vmem:[#allocation2 + $0xc4] sm:$0xf]  ;;  %v4071_v13 = vld [vmem:[#allocation2 + $0xe8] sm:$0xf0] }
 0x1f5   : > { %2848 = vmatpush.bf16.msra.mxu3 %v4414_v25  ;;  %2702 = vmatmul.bf16.vlgmr.msra.gmra.mxu0 %v5863_v28  ;;  %v4789_v8 = vld [vmem:[#allocation2 + $0xdc] sm:$0xf0]  ;;  %v4063_v10 = vld [vmem:[#allocation2 + $0xe0] sm:$0xf0]  ;;  %v5913_v16 = vor.u32 %v4786_v12, %v4071_v13  ;;  %v4653_v17 = vld [vmem:[%s5466_s21 + $0x360] sm:$0xf] }
 0x1f6   : > { %2751 = vmatmul.bf16.vlgmr.msra.gmra.mxu1 %v5865_v29  ;;  %2890 = vmatpush.bf16.msrb.mxu0 %v4534_v0  ;;  %v5907_v14 = vor.u32 %v4789_v8, %v4061_v7  ;;  %v5909_v15 = vor.u32 %v4785_v9, %v4063_v10  ;;  %v4934_v18 = vld [vmem:[%s5466_s21 + $0x364] sm:$0xf0]  ;;  %v4525_v19 = vld [vmem:[%s5466_s21 + $0x260] sm:$0xf]  ;;  %v4093_v31 = vld [vmem:[#allocation2 + $0x100] sm:$0xf] }
 0x1f7   : > { %2800 = vmatmul.bf16.vlgmr.msra.gmra.mxu2 %v5867_v30  ;;  %2939 = vmatpush.bf16.msrb.mxu1 %v4598_v6  ;;  %v4654_v20 = vor.u32 %v4934_v18, %v4653_v17  ;;  %v4902_v56 = vld [vmem:[%s5466_s21 + $0x264] sm:$0xf0]  ;;  %v4717_v21 = vld [vmem:[%s5466_s21 + $0x3e0] sm:$0xf]  ;;  %v4797_v32 = vld [vmem:[#allocation2 + $0x11c] sm:$0xf0] }
 0x1f8   : > { %2849 = vmatmul.bf16.vlgmr.msra.gmra.mxu3 %v5869_v53  ;;  %2988 = vmatpush.bf16.msrb.mxu2 %v4662_v58  ;;  %v4950_v22 = vld [vmem:[%s5466_s21 + $0x3e4] sm:$0xf0]  ;;  %v4526_v23 = vor.u32 %v4902_v56, %v4525_v19  ;;  %v4589_v25 = vld [vmem:[%s5466_s21 + $0x2e0] sm:$0xf]  ;;  %v4793_v33 = vld [vmem:[#allocation2 + $0x104] sm:$0xf]  ;;  %v5927_v50 = vor.u32 %v4797_v32, %v4093_v31 }
 0x1f9   : > { %3037 = vmatpush.bf16.msrb.mxu3 %v4726_v2  ;;  %v4718_v24 = vor.u32 %v4950_v22, %v4717_v21  ;;  %v4918_v26 = vld [vmem:[%s5466_s21 + $0x2e4] sm:$0xf0]  ;;  %v4095_v38 = vld [vmem:[#allocation2 + $0x120] sm:$0xf0]  ;;  %v4101_v34 = vld [vmem:[#allocation2 + $0x108] sm:$0xf] }
 0x1fa   : > { %v4590_v27 = vor.u32 %v4918_v26, %v4589_v25  ;;  %2891 = vmatpush.bf16.msrb.mxu0 %v4526_v23  ;;  %v4798_v35 = vld [vmem:[#allocation2 + $0x124] sm:$0xf0]  ;;  %v4794_v36 = vld [vmem:[#allocation2 + $0x10c] sm:$0xf]  ;;  %v5929_v44 = vor.u32 %v4793_v33, %v4095_v38  ;;  %v4645_v45 = vld [vmem:[%s5466_s21 + $0x350] sm:$0xf] }
 0x1fb   : > { %v4103_v39 = vld [vmem:[#allocation2 + $0x128] sm:$0xf0]  ;;  %v5931_v57 = vor.u32 %v4798_v35, %v4101_v34  ;;  %v4932_v46 = vld [vmem:[%s5466_s21 + $0x354] sm:$0xf0]  ;;  %v4517_v47 = vld [vmem:[%s5466_s21 + $0x250] sm:$0xf] }
 0x1fc   : > { %2989 = vmatpush.bf16.msrb.mxu2 %v4654_v20  ;;  %2940 = vmatpush.bf16.msrb.mxu1 %v4590_v27  ;;  %v5933_v55 = vor.u32 %v4794_v36, %v4103_v39  ;;  %v4646_v48 = vor.u32 %v4932_v46, %v4645_v45  ;;  %v4900_v52 = vld [vmem:[%s5466_s21 + $0x254] sm:$0xf0]  ;;  %v4709_v60 = vld [vmem:[%s5466_s21 + $0x3d0] sm:$0xf]  ;;  %v4509_v0 = vld [vmem:[%s5466_s21 + $0x240] sm:$0xf] }
 0x1fd   : > { %3038 = vmatpush.bf16.msrb.mxu3 %v4718_v24  ;;  %v4948_v37 = vld [vmem:[%s5466_s21 + $0x3d4] sm:$0xf0]  ;;  %v4518_v58 = vor.u32 %v4900_v52, %v4517_v47  ;;  %v4581_v62 = vld [vmem:[%s5466_s21 + $0x2d0] sm:$0xf]  ;;  %v4898_v4 = vld [vmem:[%s5466_s21 + $0x244] sm:$0xf0] }
 0x1fe   : > { %v4710_v61 = vor.u32 %v4948_v37, %v4709_v60  ;;  %v4916_v63 = vld [vmem:[%s5466_s21 + $0x2d4] sm:$0xf0]  ;;  %v4573_v5 = vld [vmem:[%s5466_s21 + $0x2c0] sm:$0xf]  ;;  %v4914_v6 = vld [vmem:[%s5466_s21 + $0x2c4] sm:$0xf0]  ;;  %v4510_v7 = vor.u32 %v4898_v4, %v4509_v0 }
 0x1ff   : > { %v4582_v2 = vor.u32 %v4916_v63, %v4581_v62  ;;  %2892 = vmatpush.bf16.msrb.mxu0 %v4518_v58  ;;  %v4637_v8 = vld [vmem:[%s5466_s21 + $0x340] sm:$0xf]  ;;  %v4930_v9 = vld [vmem:[%s5466_s21 + $0x344] sm:$0xf0]  ;;  %v4574_v54 = vor.u32 %v4914_v6, %v4573_v5  ;;  %v4125_v17 = vld [vmem:[#allocation2 + $0x140] sm:$0xf] }
 0x200   : > { %2990 = vmatpush.bf16.msrb.mxu2 %v4646_v48  ;;  %v4701_v10 = vld [vmem:[%s5466_s21 + $0x3c0] sm:$0xf]  ;;  %v4638_v11 = vor.u32 %v4930_v9, %v4637_v8  ;;  %v4946_v12 = vld [vmem:[%s5466_s21 + $0x3c4] sm:$0xf0]  ;;  %v4805_v18 = vld [vmem:[#allocation2 + $0x15c] sm:$0xf0] }
 0x201   : > { %3039 = vmatpush.bf16.msrb.mxu3 %v4710_v61  ;;  %2941 = vmatpush.bf16.msrb.mxu1 %v4582_v2  ;;  %v4702_v13 = vor.u32 %v4946_v12, %v4701_v10  ;;  %v4801_v19 = vld [vmem:[#allocation2 + $0x144] sm:$0xf]  ;;  %v4133_v56 = vld [vmem:[#allocation2 + $0x148] sm:$0xf]  ;;  %v4802_v22 = vld [vmem:[#allocation2 + $0x14c] sm:$0xf]  ;;  %v5955_v24 = vor.u32 %v4805_v18, %v4125_v17 }
 0x202   : > { %v4127_v20 = vld [vmem:[#allocation2 + $0x160] sm:$0xf0]  ;;  %v4806_v21 = vld [vmem:[#allocation2 + $0x164] sm:$0xf0]  ;;  %v4135_v23 = vld [vmem:[#allocation2 + $0x168] sm:$0xf0] }
 0x203   : > { %2893 = vmatpush.bf16.msrb.mxu0 %v4510_v7  ;;  %v5957_v25 = vor.u32 %v4801_v19, %v4127_v20  ;;  %v5959_v26 = vor.u32 %v4806_v21, %v4133_v56  ;;  %v5961_v27 = vor.u32 %v4802_v22, %v4135_v23  ;;  %v4501_v31 = vld [vmem:[%s5466_s21 + $0x230] sm:$0xf]  ;;  %v4896_v32 = vld [vmem:[%s5466_s21 + $0x234] sm:$0xf0]  ;;  %v4493_v48 = vld [vmem:[%s5466_s21 + $0x220] sm:$0xf] }
 0x204   : > { %2991 = vmatpush.bf16.msrb.mxu2 %v4638_v11  ;;  %v4565_v33 = vld [vmem:[%s5466_s21 + $0x2b0] sm:$0xf]  ;;  %v4502_v38 = vor.u32 %v4896_v32, %v4501_v31  ;;  %v4912_v34 = vld [vmem:[%s5466_s21 + $0x2b4] sm:$0xf0]  ;;  %v4894_v60 = vld [vmem:[%s5466_s21 + $0x224] sm:$0xf0] }
 0x205   : > { %2707 = vmatmul.bf16.gmra.mxu0 %v5875_v40  ;;  %3040 = vmatpush.bf16.msrb.mxu3 %v4702_v13  ;;  %6631 = vst [vmem:[#allocation21_spill] sm:$0xff] %v5961_v27  ;;  %v4629_v35 = vld [vmem:[%s5466_s21 + $0x330] sm:$0xf]  ;;  %v4928_v36 = vld [vmem:[%s5466_s21 + $0x334] sm:$0xf0]  ;;  %v4566_v39 = vor.u32 %v4912_v34, %v4565_v33  ;;  %v4494_v61 = vor.u32 %v4894_v60, %v4493_v48 }
 0x206   : > { %2756 = vmatmul.bf16.gmra.mxu1 %v5877_v41  ;;  %v4630_v45 = vor.u32 %v4928_v36, %v4629_v35  ;;  %v4693_v46 = vld [vmem:[%s5466_s21 + $0x3b0] sm:$0xf]  ;;  %v4944_v47 = vld [vmem:[%s5466_s21 + $0x3b4] sm:$0xf0]  ;;  %v4557_v37 = vld [vmem:[%s5466_s21 + $0x2a0] sm:$0xf] }
 0x207   : > { %2805 = vmatmul.bf16.gmra.mxu2 %v5879_v42  ;;  %2942 = vmatpush.bf16.msrb.mxu1 %v4574_v54  ;;  %v4694_v52 = vor.u32 %v4944_v47, %v4693_v46  ;;  %v4910_v58 = vld [vmem:[%s5466_s21 + $0x2a4] sm:$0xf0]  ;;  %v4621_v63 = vld [vmem:[%s5466_s21 + $0x320] sm:$0xf]  ;;  %v4485_v6 = vld [vmem:[%s5466_s21 + $0x210] sm:$0xf] }
 0x208   : > { %2854 = vmatmul.bf16.gmra.mxu3 %v5881_v43  ;;  %2894 = vmatpush.bf16.msrb.mxu0 %v4502_v38  ;;  %v4558_v62 = vor.u32 %v4910_v58, %v4557_v37  ;;  %v4926_v0 = vld [vmem:[%s5466_s21 + $0x324] sm:$0xf0]  ;;  %v4685_v2 = vld [vmem:[%s5466_s21 + $0x3a0] sm:$0xf]  ;;  %v4892_v7 = vld [vmem:[%s5466_s21 + $0x214] sm:$0xf0] }
 0x209   : > { %2992 = vmatpush.bf16.msrb.mxu2 %v4630_v45  ;;  %3041 = vmatpush.bf16.msrb.mxu3 %v4694_v52  ;;  %v4622_v4 = vor.u32 %v4926_v0, %v4621_v63  ;;  %v4942_v5 = vld [vmem:[%s5466_s21 + $0x3a4] sm:$0xf0]  ;;  %v4549_v9 = vld [vmem:[%s5466_s21 + $0x290] sm:$0xf]  ;;  %v4908_v10 = vld [vmem:[%s5466_s21 + $0x294] sm:$0xf0]  ;;  %v4486_v11 = vor.u32 %v4892_v7, %v4485_v6 }
 0x20a   : > { %v4686_v8 = vor.u32 %v4942_v5, %v4685_v2  ;;  %v4613_v54 = vld [vmem:[%s5466_s21 + $0x310] sm:$0xf]  ;;  %v4924_v12 = vld [vmem:[%s5466_s21 + $0x314] sm:$0xf0]  ;;  %v4550_v56 = vor.u32 %v4908_v10, %v4549_v9  ;;  %v4165_v23 = vld [vmem:[#allocation2 + $0x188] sm:$0xf] }
 0x20b   : > { %2943 = vmatpush.bf16.msrb.mxu1 %v4566_v39  ;;  %v4677_v13 = vld [vmem:[%s5466_s21 + $0x390] sm:$0xf]  ;;  %v4940_v17 = vld [vmem:[%s5466_s21 + $0x394] sm:$0xf0]  ;;  %v4614_v21 = vor.u32 %v4924_v12, %v4613_v54  ;;  %v4814_v31 = vld [vmem:[#allocation2 + $0x1a4] sm:$0xf0] }
 0x20c   : > { %2895 = vmatpush.bf16.msrb.mxu0 %v4494_v61  ;;  %v4157_v18 = vld [vmem:[#allocation2 + $0x180] sm:$0xf]  ;;  %v4809_v20 = vld [vmem:[#allocation2 + $0x184] sm:$0xf]  ;;  %v4678_v32 = vor.u32 %v4940_v17, %v4677_v13  ;;  %v4810_v33 = vld [vmem:[#allocation2 + $0x18c] sm:$0xf]  ;;  %v5998_v46 = vor.u32 %v4814_v31, %v4165_v23 }
 0x20d   : > { %v4813_v19 = vld [vmem:[#allocation2 + $0x19c] sm:$0xf0]  ;;  %2993 = vmatpush.bf16.msrb.mxu2 %v4622_v4  ;;  %v4159_v22 = vld [vmem:[#allocation2 + $0x1a0] sm:$0xf0]  ;;  %3042 = vmatpush.bf16.msrb.mxu3 %v4686_v8  ;;  %v4167_v38 = vld [vmem:[#allocation2 + $0x1a8] sm:$0xf0] }
 0x20e   : > { %v5991_v34 = vor.u32 %v4813_v19, %v4157_v18  ;;  %v4477_v35 = vld [vmem:[%s5466_s21 + $0x200] sm:$0xf]  ;;  %v4890_v36 = vld [vmem:[%s5466_s21 + $0x204] sm:$0xf0]  ;;  %v5996_v45 = vor.u32 %v4809_v20, %v4159_v22  ;;  %6634 = vst [vmem:[#allocation24_spill] sm:$0xff] %v5998_v46  ;;  %v6003_v60 = vor.u32 %v4810_v33, %v4167_v38 }
 0x20f   : > { %2944 = vmatpush.bf16.msrb.mxu1 %v4558_v62  ;;  %v4541_v39 = vld [vmem:[%s5466_s21 + $0x280] sm:$0xf]  ;;  %v4906_v47 = vld [vmem:[%s5466_s21 + $0x284] sm:$0xf0]  ;;  %v4478_v37 = vor.u32 %v4890_v36, %v4477_v35  ;;  %v4189_v2 = vld [vmem:[#allocation2 + $0x1c0] sm:$0xf] }
 0x210   : > { %6632 = vst [vmem:[#allocation22_spill] sm:$0xff] %v5991_v34  ;;  %2896 = vmatpush.bf16.msrb.mxu0 %v4486_v11  ;;  %v4605_v48 = vld [vmem:[%s5466_s21 + $0x300] sm:$0xf]  ;;  %v4922_v52 = vld [vmem:[%s5466_s21 + $0x304] sm:$0xf0]  ;;  %v4542_v62 = vor.u32 %v4906_v47, %v4541_v39 }
 0x211   : > { %6633 = vst [vmem:[#allocation23_spill] sm:$0xff] %v5996_v45  ;;  %2994 = vmatpush.bf16.msrb.mxu2 %v4614_v21  ;;  %3043 = vmatpush.bf16.msrb.mxu3 %v4678_v32  ;;  %v4669_v58 = vld [vmem:[%s5466_s21 + $0x380] sm:$0xf]  ;;  %v4938_v61 = vld [vmem:[%s5466_s21 + $0x384] sm:$0xf0]  ;;  %v4606_v63 = vor.u32 %v4922_v52, %v4605_v48 }
 0x212   : > { %6635 = vst [vmem:[#allocation25_spill] sm:$0xff] %v6003_v60  ;;  %v4670_v0 = vor.u32 %v4938_v61, %v4669_v58  ;;  %v4821_v4 = vld [vmem:[#allocation2 + $0x1dc] sm:$0xf0]  ;;  %v4817_v5 = vld [vmem:[#allocation2 + $0x1c4] sm:$0xf] }
 0x213   : > { %2945 = vmatpush.bf16.msrb.mxu1 %v4550_v56  ;;  %v4191_v6 = vld [vmem:[#allocation2 + $0x1e0] sm:$0xf0]  ;;  %v4197_v7 = vld [vmem:[#allocation2 + $0x1c8] sm:$0xf]  ;;  %v4818_v9 = vld [vmem:[#allocation2 + $0x1cc] sm:$0xf]  ;;  %v6011_v54 = vor.u32 %v4821_v4, %v4189_v2 }
 0x214   : > { %2897 = vmatpush.bf16.msrb.mxu0 %v4478_v37  ;;  %v4822_v8 = vld [vmem:[#allocation2 + $0x1e4] sm:$0xf0]  ;;  %v4199_v10 = vld [vmem:[#allocation2 + $0x1e8] sm:$0xf0]  ;;  %v6013_v11 = vor.u32 %v4817_v5, %v4191_v6  ;;  %v3981_v19 = vld [vmem:[#allocation2 + $0x10] sm:$0xf] }
 0x215   : > { %2712 = vmatmul.bf16.gmra.mxu0 %v5887_v1  ;;  %2995 = vmatpush.bf16.msrb.mxu2 %v4606_v63  ;;  %6636 = vst [vmem:[#allocation26_spill] sm:$0xff] %v6011_v54  ;;  %v6015_v12 = vor.u32 %v4822_v8, %v4197_v7  ;;  %v6017_v13 = vor.u32 %v4818_v9, %v4199_v10  ;;  %v1728_v17 = vld [vmem:[%s370_s25] sm:$0x3]  ;;  %v4767_v20 = vld [vmem:[#allocation2 + $0x2c] sm:$0xf0] }
 0x216   : > { %2761 = vmatmul.bf16.gmra.mxu1 %v5889_v3  ;;  %3044 = vmatpush.bf16.msrb.mxu3 %v4670_v0  ;;  %6637 = vst [vmem:[#allocation27_spill] sm:$0xff] %v6013_v11  ;;  %v6025_v18 = vperm.slane %v1728_v17, 0  ;;  %v4763_v56 = vld [vmem:[#allocation2 + $0x14] sm:$0xf]  ;;  %v3989_v22 = vld [vmem:[#allocation2 + $0x18] sm:$0xf]  ;;  %v6027_v33 = vor.u32 %v4767_v20, %v3981_v19 }
 0x217   : > { %2810 = vmatmul.bf16.gmra.mxu2 %v5891_v49  ;;  %2946 = vmatpush.bf16.msrb.mxu1 %v4542_v62  ;;  %6638 = vst [vmem:[#allocation28_spill] sm:$0xff] %v6015_v12  ;;  %v3983_v21 = vld [vmem:[#allocation2 + $0x30] sm:$0xf0]  ;;  %v4768_v23 = vld [vmem:[#allocation2 + $0x34] sm:$0xf0] }
 0x218   : > { %2859 = vmatmul.bf16.gmra.mxu3 %v5893_v59  ;;  %6639 = vst [vmem:[#allocation29_spill] sm:$0xff] %v6017_v13  ;;  %v4764_v31 = vld [vmem:[#allocation2 + $0x1c] sm:$0xf]  ;;  %v6029_v35 = vor.u32 %v4763_v56, %v3983_v21  ;;  %v6031_v36 = vor.u32 %v4768_v23, %v3989_v22  ;;  %v4013_v5 = vld [vmem:[#allocation2 + $0x50] sm:$0xf] }
 0x219   : > { %v3991_v32 = vld [vmem:[#allocation2 + $0x38] sm:$0xf0]  ;;  %6640 = vst [vmem:[#allocation30_spill] sm:$0xff] %v6027_v33  ;;  %v4775_v6 = vld [vmem:[#allocation2 + $0x6c] sm:$0xf0] }
 0x21a   : > { %6641 = vst [vmem:[#allocation31_spill] sm:$0xff] %v6029_v35  ;;  %v6034_v48 = vor.u32 %v4764_v31, %v3991_v32  ;;  %v4771_v7 = vld [vmem:[#allocation2 + $0x54] sm:$0xf]  ;;  %v4021_v9 = vld [vmem:[#allocation2 + $0x58] sm:$0xf]  ;;  %v6043_v56 = vor.u32 %v4775_v6, %v4013_v5 }
 0x21b   : > { %6642 = vst [vmem:[#allocation32_spill] sm:$0xff] %v6031_v36  ;;  %v4015_v8 = vld [vmem:[#allocation2 + $0x70] sm:$0xf0]  ;;  %v4776_v10 = vld [vmem:[#allocation2 + $0x74] sm:$0xf0] }
 0x21c   : > { %6643 = vst [vmem:[#allocation33_spill] sm:$0xff] %v6034_v48  ;;  %v4772_v17 = vld [vmem:[#allocation2 + $0x5c] sm:$0xf]  ;;  %v6045_v31 = vor.u32 %v4771_v7, %v4015_v8  ;;  %v6047_v32 = vor.u32 %v4776_v10, %v4021_v9  ;;  %v4045_v7 = vld [vmem:[#allocation2 + $0x90] sm:$0xf] }
 0x21d   : > { %v4023_v19 = vld [vmem:[#allocation2 + $0x78] sm:$0xf0]  ;;  %6644 = vst [vmem:[#allocation34_spill] sm:$0xff] %v6043_v56  ;;  %v4783_v8 = vld [vmem:[#allocation2 + $0xac] sm:$0xf0] }
 0x21e   : > { %6645 = vst [vmem:[#allocation35_spill] sm:$0xff] %v6045_v31  ;;  %v4779_v9 = vld [vmem:[#allocation2 + $0x94] sm:$0xf] }
 0x21f   : > { %6646 = vst [vmem:[#allocation36_spill] sm:$0xff] %v6047_v32  ;;  %v4047_v10 = vld [vmem:[#allocation2 + $0xb0] sm:$0xf0] }
 0x225   : > { %2717 = vmatmul.bf16.gmra.mxu0 %v5907_v14 }
 0x226   : > { %2766 = vmatmul.bf16.gmra.mxu1 %v5909_v15 }
 0x227   : > { %2815 = vmatmul.bf16.gmra.mxu2 %v5911_v51 }
 0x228   : > { %2864 = vmatmul.bf16.gmra.mxu3 %v5913_v16 }
 0x235   : > { %2722 = vmatmul.bf16.gmra.mxu0 %v5927_v50 }
 0x236   : > { %2771 = vmatmul.bf16.gmra.mxu1 %v5929_v44 }
 0x237   : > { %2820 = vmatmul.bf16.gmra.mxu2 %v5931_v57 }
 0x238   : > { %2869 = vmatmul.bf16.gmra.mxu3 %v5933_v55 }
 0x245   : > { %2727 = vmatmul.bf16.gmra.mxu0 %v5955_v24 }
 0x246   : > { %2776 = vmatmul.bf16.gmra.mxu1 %v5957_v25 }
 0x247   : > { %2825 = vmatmul.bf16.gmra.mxu2 %v5959_v26 }
 0x248   : > { %2874 = vmatmul.bf16.gmra.mxu3 %v5961_v27 }
 0x255   : > { %2732 = vmatmul.bf16.gmra.mxu0 %v5991_v34 }
 0x256   : > { %2781 = vmatmul.bf16.gmra.mxu1 %v5996_v45 }
 0x257   : > { %2830 = vmatmul.bf16.gmra.mxu2 %v5998_v46  ;;  %v4841_v46 = vld [vmem:[%s5466_s21 + $0x84] sm:$0xf] }
 0x258   : > { %2879 = vmatmul.bf16.gmra.mxu3 %v6003_v60  ;;  %v4223_v60 = vld [vmem:[%s5466_s21 + $0x8] sm:$0xf0] }
 0x265   : > { %2737 = vmatmul.bf16.gmra.mxu0 %v6011_v54  ;;  %v4183_v54 = vld [vmem:[#allocation2 + $0x1b8] sm:$0xf0] }
 0x266   : > { %2786 = vmatmul.bf16.gmra.mxu1 %v6013_v11 }
 0x267   : > { %2835 = vmatmul.bf16.gmra.mxu2 %v6015_v12  ;;  %v4865_v12 = vld [vmem:[%s5466_s21 + $0x144] sm:$0xf] }
 0x268   : > { %2884 = vmatmul.bf16.gmra.mxu3 %v6017_v13  ;;  %v4319_v13 = vld [vmem:[%s5466_s21 + $0xc8] sm:$0xf0] }
 0x272   : > { %v2703_v38 = vpop.f32.mrf.mxu0 }
 0x273   : > { %v2704_v39 = vadd.f32 %v2703_v38, %v6025_v18  ;;  %v2752_v47 = vpop.f32.mrf.mxu1 }
 0x275   : > { %v2753_v52 = vadd.f32 %v2752_v47, %v2704_v39  ;;  %2898 = vmatmul.bf16.vlgmr.msrb.gmra.mxu0 %v6027_v33  ;;  %v6050_v47 = vor.u32 %v4772_v17, %v4023_v19  ;;  %v4053_v17 = vld [vmem:[#allocation2 + $0x98] sm:$0xf] }
 0x276   : > { %2947 = vmatmul.bf16.vlgmr.msrb.gmra.mxu1 %v6029_v35  ;;  %v4784_v19 = vld [vmem:[#allocation2 + $0xb4] sm:$0xf0]  ;;  %v4849_v35 = vld [vmem:[%s5466_s21 + $0xc4] sm:$0xf] }
 0x277   : > { %2996 = vmatmul.bf16.vlgmr.msrb.gmra.mxu2 %v6031_v36  ;;  %6647 = vst [vmem:[#allocation37_spill] sm:$0xff] %v6050_v47  ;;  %v4322_v11 = vor.u32 %v4849_v35, %v4319_v13  ;;  %v4247_v13 = vld [vmem:[%s5466_s21 + $0x38] sm:$0xf0] }
 0x278   : > { %3045 = vmatmul.bf16.vlgmr.msrb.gmra.mxu3 %v6034_v48  ;;  %v4800_v48 = vld [vmem:[#allocation2 + $0x134] sm:$0xf0]  ;;  %v4311_v35 = vld [vmem:[%s5466_s21 + $0xb8] sm:$0xf0] }
 0x27a   : > { %v2801_v37 = vpop.f32.mrf.mxu2  ;;  %v2705_v62 = vpop.f32.mrf.mxu0 }
 0x27b   : > { %v2802_v58 = vadd.f32 %v2801_v37, %v2753_v52  ;;  %v2850_v61 = vpop.f32.mrf.mxu3  ;;  %v2706_v63 = vadd.f32 %v2705_v62, %v6025_v18  ;;  %v2754_v0 = vpop.f32.mrf.mxu1 }
 0x27d   : > { %v6041_v2 = vadd.f32 %v2850_v61, %v2802_v58  ;;  %v2755_v4 = vadd.f32 %v2754_v0, %v2706_v63 }
 0x282   : > { %v2803_v20 = vpop.f32.mrf.mxu2  ;;  %v2708_v23 = vpop.f32.mrf.mxu0 }
 0x283   : > { %v2804_v21 = vadd.f32 %v2803_v20, %v2755_v4  ;;  %v2852_v22 = vpop.f32.mrf.mxu3  ;;  %v2709_v38 = vadd.f32 %v2708_v23, %v6025_v18  ;;  %v2757_v39 = vpop.f32.mrf.mxu1  ;;  %v4780_v20 = vld [vmem:[#allocation2 + $0x9c] sm:$0xf]  ;;  %v6061_v23 = vor.u32 %v4783_v8, %v4045_v7  ;;  %v4407_v7 = vld [vmem:[%s5466_s21 + $0x178] sm:$0xf0] }
 0x285   : > { %v6052_v52 = vadd.f32 %v2852_v22, %v2804_v21  ;;  %v2758_v37 = vadd.f32 %v2757_v39, %v2709_v38  ;;  %2903 = vmatmul.bf16.gmra.mxu0 %v6043_v56  ;;  %v4055_v21 = vld [vmem:[#allocation2 + $0xb8] sm:$0xf0]  ;;  %6648 = vst [vmem:[#allocation38_spill] sm:$0xff] %v6061_v23 }
 0x286   : > { %2952 = vmatmul.bf16.gmra.mxu1 %v6045_v31  ;;  %v4792_v31 = vld [vmem:[#allocation2 + $0xf4] sm:$0xf0] }
 0x287   : > { %3001 = vmatmul.bf16.gmra.mxu2 %v6047_v32  ;;  %v4079_v32 = vld [vmem:[#allocation2 + $0xf0] sm:$0xf0] }
 0x288   : > { %3050 = vmatmul.bf16.gmra.mxu3 %v6050_v47 }
 0x28a   : > { %v2806_v58 = vpop.f32.mrf.mxu2  ;;  %v2710_v63 = vpop.f32.mrf.mxu0 }
 0x28b   : > { %v2807_v61 = vadd.f32 %v2806_v58, %v2758_v37  ;;  %v2855_v62 = vpop.f32.mrf.mxu3  ;;  %v2711_v0 = vadd.f32 %v2710_v63, %v6025_v18  ;;  %v2759_v4 = vpop.f32.mrf.mxu1  ;;  %v6063_v58 = vor.u32 %v4779_v9, %v4047_v10 }
 0x28d   : > { %v6059_v5 = vadd.f32 %v2855_v62, %v2807_v61  ;;  %v2760_v6 = vadd.f32 %v2759_v4, %v2711_v0  ;;  %6649 = vst [vmem:[#allocation39_spill] sm:$0xff] %v6063_v58  ;;  %v6065_v61 = vor.u32 %v4784_v19, %v4053_v17  ;;  %v6068_v0 = vor.u32 %v4780_v20, %v4055_v21 }
 0x28f   : > { %6650 = vst [vmem:[#allocation40_spill] sm:$0xff] %v6065_v61 }
 0x290   : > { %6651 = vst [vmem:[#allocation41_spill] sm:$0xff] %v6068_v0 }
 0x292   : > { %v2808_v22 = vpop.f32.mrf.mxu2  ;;  %v2713_v37 = vpop.f32.mrf.mxu0 }
 0x293   : > { %v2809_v38 = vadd.f32 %v2808_v22, %v2760_v6  ;;  %v2857_v39 = vpop.f32.mrf.mxu3  ;;  %v2714_v62 = vadd.f32 %v2713_v37, %v6025_v18  ;;  %v2762_v63 = vpop.f32.mrf.mxu1  ;;  %v4871_v6 = vld [vmem:[%s5466_s21 + $0x174] sm:$0xf] }
 0x294   : > { %v4410_v8 = vor.u32 %v4871_v6, %v4407_v7  ;;  %v4887_v37 = vld [vmem:[%s5466_s21 + $0x1f4] sm:$0xf]  ;;  %v4077_v6 = vld [vmem:[#allocation2 + $0xd0] sm:$0xf] }
 0x295   : > { %v6070_v4 = vadd.f32 %v2857_v39, %v2809_v38  ;;  %v2763_v47 = vadd.f32 %v2762_v63, %v2714_v62  ;;  %2908 = vmatmul.bf16.gmra.mxu0 %v6061_v23  ;;  %v4839_v38 = vld [vmem:[%s5466_s21 + $0x74] sm:$0xf]  ;;  %v4279_v39 = vld [vmem:[%s5466_s21 + $0x78] sm:$0xf0]  ;;  %v4791_v7 = vld [vmem:[#allocation2 + $0xec] sm:$0xf0] }
 0x296   : > { %2957 = vmatmul.bf16.gmra.mxu1 %v6063_v58  ;;  %3184 = vmatpush.bf16.msra.mxu2 %v4410_v8  ;;  %v4282_v63 = vor.u32 %v4839_v38, %v4279_v39  ;;  %v4343_v58 = vld [vmem:[%s5466_s21 + $0xf8] sm:$0xf0]  ;;  %v4787_v23 = vld [vmem:[#allocation2 + $0xd4] sm:$0xf]  ;;  %v4085_v8 = vld [vmem:[#allocation2 + $0xd8] sm:$0xf] }
 0x297   : > { %3006 = vmatmul.bf16.gmra.mxu2 %v6065_v61  ;;  %v4855_v61 = vld [vmem:[%s5466_s21 + $0xf4] sm:$0xf]  ;;  %v6089_v56 = vor.u32 %v4787_v23, %v4079_v32  ;;  %v4399_v32 = vld [vmem:[%s5466_s21 + $0x168] sm:$0xf0] }
 0x298   : > { %3055 = vmatmul.bf16.gmra.mxu3 %v6068_v0  ;;  %v4471_v0 = vld [vmem:[%s5466_s21 + $0x1f8] sm:$0xf0]  ;;  %3086 = vmatpush.bf16.msra.mxu0 %v4282_v63 }
 0x299   : > { %6653 = vst [vmem:[#allocation43_spill] sm:$0xff] %v6089_v56 }
 0x29a   : > { %v2811_v9 = vpop.f32.mrf.mxu2  ;;  %v2715_v19 = vpop.f32.mrf.mxu0 }
 0x29b   : > { %v2812_v10 = vadd.f32 %v2811_v9, %v2763_v47  ;;  %v2860_v17 = vpop.f32.mrf.mxu3  ;;  %v2716_v20 = vadd.f32 %v2715_v19, %v6025_v18  ;;  %v2764_v21 = vpop.f32.mrf.mxu1  ;;  %v4474_v47 = vor.u32 %v4887_v37, %v4471_v0  ;;  %v4346_v9 = vor.u32 %v4855_v61, %v4343_v58  ;;  %v4788_v19 = vld [vmem:[#allocation2 + $0xdc] sm:$0xf] }
 0x29c   : > { %v6091_v0 = vor.u32 %v4792_v31, %v4085_v8  ;;  %v4869_v31 = vld [vmem:[%s5466_s21 + $0x164] sm:$0xf] }
 0x29d   : > { %v6079_v22 = vadd.f32 %v2860_v17, %v2812_v10  ;;  %v2765_v62 = vadd.f32 %v2764_v21, %v2716_v20  ;;  %v4087_v10 = vld [vmem:[#allocation2 + $0xf8] sm:$0xf0]  ;;  %3233 = vmatpush.bf16.msra.mxu3 %v4474_v47  ;;  %3135 = vmatpush.bf16.msra.mxu1 %v4346_v9  ;;  %v6087_v20 = vor.u32 %v4791_v7, %v4077_v6 }
 0x29e   : > { %6654 = vst [vmem:[#allocation44_spill] sm:$0xff] %v6091_v0  ;;  %v6094_v37 = vor.u32 %v4788_v19, %v4087_v10  ;;  %v4402_v23 = vor.u32 %v4869_v31, %v4399_v32  ;;  %v4109_v31 = vld [vmem:[#allocation2 + $0x110] sm:$0xf] }
 0x29f   : > { %6652 = vst [vmem:[#allocation42_spill] sm:$0xff] %v6087_v20  ;;  %v4799_v32 = vld [vmem:[#allocation2 + $0x12c] sm:$0xf0] }
 0x2a0   : > { %6655 = vst [vmem:[#allocation45_spill] sm:$0xff] %v6094_v37  ;;  %3185 = vmatpush.bf16.msra.mxu2 %v4402_v23  ;;  %v4117_v23 = vld [vmem:[#allocation2 + $0x118] sm:$0xf] }
 0x2a2   : > { %v2813_v17 = vpop.f32.mrf.mxu2  ;;  %v2718_v39 = vpop.f32.mrf.mxu0 }
 0x2a3   : > { %v2814_v21 = vadd.f32 %v2813_v17, %v2765_v62  ;;  %v2862_v38 = vpop.f32.mrf.mxu3  ;;  %v2719_v58 = vadd.f32 %v2718_v39, %v6025_v18  ;;  %v2767_v61 = vpop.f32.mrf.mxu1  ;;  %v4837_v17 = vld [vmem:[%s5466_s21 + $0x64] sm:$0xf] }
 0x2a5   : > { %v6096_v63 = vadd.f32 %v2862_v38, %v2814_v21  ;;  %v2768_v47 = vadd.f32 %v2767_v61, %v2719_v58  ;;  %2913 = vmatmul.bf16.gmra.mxu0 %v6087_v20  ;;  %v4271_v21 = vld [vmem:[%s5466_s21 + $0x68] sm:$0xf0]  ;;  %v4885_v38 = vld [vmem:[%s5466_s21 + $0x1e4] sm:$0xf] }
 0x2a6   : > { %2962 = vmatmul.bf16.gmra.mxu1 %v6089_v56  ;;  %v4274_v58 = vor.u32 %v4837_v17, %v4271_v21  ;;  %v4463_v61 = vld [vmem:[%s5466_s21 + $0x1e8] sm:$0xf0] }
 0x2a7   : > { %3011 = vmatmul.bf16.gmra.mxu2 %v6091_v0  ;;  %v4335_v0 = vld [vmem:[%s5466_s21 + $0xe8] sm:$0xf0] }
 0x2a8   : > { %3060 = vmatmul.bf16.gmra.mxu3 %v6094_v37  ;;  %v4853_v37 = vld [vmem:[%s5466_s21 + $0xe4] sm:$0xf]  ;;  %v4795_v56 = vld [vmem:[#allocation2 + $0x114] sm:$0xf]  ;;  %3087 = vmatpush.bf16.msra.mxu0 %v4274_v58 }
 0x2a9   : > { %v4111_v20 = vld [vmem:[#allocation2 + $0x130] sm:$0xf0] }
 0x2aa   : > { %v2816_v62 = vpop.f32.mrf.mxu2  ;;  %v2720_v9 = vpop.f32.mrf.mxu0  ;;  %v6115_v36 = vor.u32 %v4795_v56, %v4111_v20  ;;  %v4391_v56 = vld [vmem:[%s5466_s21 + $0x158] sm:$0xf0] }
 0x2ab   : > { %v2817_v6 = vadd.f32 %v2816_v62, %v2768_v47  ;;  %v2865_v7 = vpop.f32.mrf.mxu3  ;;  %v2721_v8 = vadd.f32 %v2720_v9, %v6025_v18  ;;  %v2769_v19 = vpop.f32.mrf.mxu1  ;;  %v4466_v47 = vor.u32 %v4885_v38, %v4463_v61  ;;  %v4338_v62 = vor.u32 %v4853_v37, %v4335_v0  ;;  %v4796_v9 = vld [vmem:[#allocation2 + $0x11c] sm:$0xf] }
 0x2ac   : > { %6657 = vst [vmem:[#allocation47_spill] sm:$0xff] %v6115_v36  ;;  %v6117_v38 = vor.u32 %v4800_v48, %v4117_v23  ;;  %v4867_v48 = vld [vmem:[%s5466_s21 + $0x154] sm:$0xf] }
 0x2ad   : > { %v6105_v10 = vadd.f32 %v2865_v7, %v2817_v6  ;;  %v2770_v39 = vadd.f32 %v2769_v19, %v2721_v8  ;;  %v4119_v6 = vld [vmem:[#allocation2 + $0x138] sm:$0xf0]  ;;  %3234 = vmatpush.bf16.msra.mxu3 %v4466_v47  ;;  %3136 = vmatpush.bf16.msra.mxu1 %v4338_v62  ;;  %v6113_v8 = vor.u32 %v4799_v32, %v4109_v31 }
 0x2ae   : > { %6658 = vst [vmem:[#allocation48_spill] sm:$0xff] %v6117_v38  ;;  %v6120_v58 = vor.u32 %v4796_v9, %v4119_v6  ;;  %v4394_v20 = vor.u32 %v4867_v48, %v4391_v56  ;;  %v4141_v48 = vld [vmem:[#allocation2 + $0x150] sm:$0xf]  ;;  %v4803_v56 = vld [vmem:[#allocation2 + $0x154] sm:$0xf] }
 0x2af   : > { %6656 = vst [vmem:[#allocation46_spill] sm:$0xff] %v6113_v8 }
 0x2b0   : > { %6659 = vst [vmem:[#allocation49_spill] sm:$0xff] %v6120_v58  ;;  %3186 = vmatpush.bf16.msra.mxu2 %v4394_v20 }
 0x2b2   : > { %v2818_v7 = vpop.f32.mrf.mxu2  ;;  %v2723_v21 = vpop.f32.mrf.mxu0 }
 0x2b3   : > { %v2819_v19 = vadd.f32 %v2818_v7, %v2770_v39  ;;  %v2867_v17 = vpop.f32.mrf.mxu3  ;;  %v2724_v0 = vadd.f32 %v2723_v21, %v6025_v18  ;;  %v2772_v37 = vpop.f32.mrf.mxu1  ;;  %v4835_v7 = vld [vmem:[%s5466_s21 + $0x54] sm:$0xf] }
 0x2b5   : > { %v6122_v61 = vadd.f32 %v2867_v17, %v2819_v19  ;;  %v2773_v47 = vadd.f32 %v2772_v37, %v2724_v0  ;;  %2918 = vmatmul.bf16.gmra.mxu0 %v6113_v8  ;;  %v4263_v19 = vld [vmem:[%s5466_s21 + $0x58] sm:$0xf0]  ;;  %v4883_v17 = vld [vmem:[%s5466_s21 + $0x1d4] sm:$0xf]  ;;  %v4255_v8 = vld [vmem:[%s5466_s21 + $0x48] sm:$0xf0] }
 0x2b6   : > { %2967 = vmatmul.bf16.gmra.mxu1 %v6115_v36  ;;  %v4266_v0 = vor.u32 %v4835_v7, %v4263_v19  ;;  %v4455_v37 = vld [vmem:[%s5466_s21 + $0x1d8] sm:$0xf0]  ;;  %v4149_v36 = vld [vmem:[#allocation2 + $0x158] sm:$0xf]  ;;  %v4833_v19 = vld [vmem:[%s5466_s21 + $0x44] sm:$0xf] }
 0x2b7   : > { %3016 = vmatmul.bf16.gmra.mxu2 %v6117_v38  ;;  %v4327_v38 = vld [vmem:[%s5466_s21 + $0xd8] sm:$0xf0]  ;;  %v4458_v20 = vor.u32 %v4883_v17, %v4455_v37  ;;  %v4258_v33 = vor.u32 %v4833_v19, %v4255_v8  ;;  %v4879_v19 = vld [vmem:[%s5466_s21 + $0x1b4] sm:$0xf] }
 0x2b8   : > { %3065 = vmatmul.bf16.gmra.mxu3 %v6120_v58  ;;  %v4851_v58 = vld [vmem:[%s5466_s21 + $0xd4] sm:$0xf]  ;;  %3088 = vmatpush.bf16.msra.mxu0 %v4266_v0 }
 0x2b9   : > { %3235 = vmatpush.bf16.msra.mxu3 %v4458_v20  ;;  %v4383_v20 = vld [vmem:[%s5466_s21 + $0x148] sm:$0xf0] }
 0x2ba   : > { %v2821_v39 = vpop.f32.mrf.mxu2  ;;  %v2725_v62 = vpop.f32.mrf.mxu0 }
 0x2bb   : > { %v2822_v31 = vadd.f32 %v2821_v39, %v2773_v47  ;;  %v2870_v32 = vpop.f32.mrf.mxu3  ;;  %v2726_v23 = vadd.f32 %v2725_v62, %v6025_v18  ;;  %v2774_v9 = vpop.f32.mrf.mxu1  ;;  %v4807_v47 = vld [vmem:[#allocation2 + $0x16c] sm:$0xf0]  ;;  %v4330_v39 = vor.u32 %v4851_v58, %v4327_v38  ;;  %v4143_v62 = vld [vmem:[#allocation2 + $0x170] sm:$0xf0] }
 0x2bc   : > { %v6139_v7 = vor.u32 %v4807_v47, %v4141_v48  ;;  %v6144_v37 = vor.u32 %v4803_v56, %v4143_v62  ;;  %v4447_v56 = vld [vmem:[%s5466_s21 + $0x1c8] sm:$0xf0]  ;;  %3089 = vmatpush.bf16.msra.mxu0 %v4258_v33  ;;  %v4847_v33 = vld [vmem:[%s5466_s21 + $0xb4] sm:$0xf] }
 0x2bd   : > { %v6131_v6 = vadd.f32 %v2870_v32, %v2822_v31  ;;  %v2775_v21 = vadd.f32 %v2774_v9, %v2726_v23  ;;  %v4808_v31 = vld [vmem:[#allocation2 + $0x174] sm:$0xf0]  ;;  %v4804_v32 = vld [vmem:[#allocation2 + $0x15c] sm:$0xf]  ;;  %3137 = vmatpush.bf16.msra.mxu1 %v4330_v39 }
 0x2be   : > { %v4151_v23 = vld [vmem:[#allocation2 + $0x178] sm:$0xf0]  ;;  %6660 = vst [vmem:[#allocation50_spill] sm:$0xff] %v6139_v7  ;;  %v6146_v0 = vor.u32 %v4808_v31, %v4149_v36 }
 0x2bf   : > { %6661 = vst [vmem:[#allocation51_spill] sm:$0xff] %v6144_v37  ;;  %v6152_v39 = vor.u32 %v4804_v32, %v4151_v23  ;;  %v4314_v32 = vor.u32 %v4847_v33, %v4311_v35  ;;  %v4863_v23 = vld [vmem:[%s5466_s21 + $0x134] sm:$0xf]  ;;  %v4861_v33 = vld [vmem:[%s5466_s21 + $0x124] sm:$0xf] }
 0x2c0   : > { %6662 = vst [vmem:[#allocation52_spill] sm:$0xff] %v6146_v0 }
 0x2c1   : > { %6663 = vst [vmem:[#allocation53_spill] sm:$0xff] %v6152_v39  ;;  %3138 = vmatpush.bf16.msra.mxu1 %v4322_v11  ;;  %v4375_v11 = vld [vmem:[%s5466_s21 + $0x138] sm:$0xf0] }
 0x2c2   : > { %v2823_v9 = vpop.f32.mrf.mxu2  ;;  %v2728_v17 = vpop.f32.mrf.mxu0 }
 0x2c3   : > { %v2824_v38 = vadd.f32 %v2823_v9, %v2775_v21  ;;  %v2872_v58 = vpop.f32.mrf.mxu3  ;;  %v2729_v48 = vadd.f32 %v2728_v17, %v6025_v18  ;;  %v2777_v47 = vpop.f32.mrf.mxu1  ;;  %v4386_v21 = vor.u32 %v4865_v12, %v4383_v20  ;;  %v4881_v9 = vld [vmem:[%s5466_s21 + $0x1c4] sm:$0xf]  ;;  %v4831_v12 = vld [vmem:[%s5466_s21 + $0x34] sm:$0xf]  ;;  %v4439_v17 = vld [vmem:[%s5466_s21 + $0x1b8] sm:$0xf0] }
 0x2c4   : > { %v4450_v36 = vor.u32 %v4881_v9, %v4447_v56  ;;  %v4250_v31 = vor.u32 %v4831_v12, %v4247_v13  ;;  %v4829_v20 = vld [vmem:[%s5466_s21 + $0x24] sm:$0xf]  ;;  %v4442_v56 = vor.u32 %v4879_v19, %v4439_v17  ;;  %v4303_v13 = vld [vmem:[%s5466_s21 + $0xa8] sm:$0xf0] }
 0x2c5   : > { %v6156_v62 = vadd.f32 %v2872_v58, %v2824_v38  ;;  %v2778_v8 = vadd.f32 %v2777_v47, %v2729_v48  ;;  %2923 = vmatmul.bf16.gmra.mxu0 %v6139_v7  ;;  %3187 = vmatpush.bf16.msra.mxu2 %v4386_v21  ;;  %v4378_v58 = vor.u32 %v4863_v23, %v4375_v11  ;;  %v4239_v48 = vld [vmem:[%s5466_s21 + $0x28] sm:$0xf0]  ;;  %v4845_v12 = vld [vmem:[%s5466_s21 + $0xa4] sm:$0xf]  ;;  %v4859_v7 = vld [vmem:[%s5466_s21 + $0x114] sm:$0xf] }
 0x2c6   : > { %2972 = vmatmul.bf16.gmra.mxu1 %v6144_v37  ;;  %3236 = vmatpush.bf16.msra.mxu3 %v4450_v36  ;;  %v4242_v36 = vor.u32 %v4829_v20, %v4239_v48  ;;  %v4306_v23 = vor.u32 %v4845_v12, %v4303_v13  ;;  %v4367_v11 = vld [vmem:[%s5466_s21 + $0x128] sm:$0xf0]  ;;  %v4827_v12 = vld [vmem:[%s5466_s21 + $0x14] sm:$0xf]  ;;  %v4231_v13 = vld [vmem:[%s5466_s21 + $0x18] sm:$0xf0] }
 0x2c7   : > { %3021 = vmatmul.bf16.gmra.mxu2 %v6146_v0  ;;  %3090 = vmatpush.bf16.msra.mxu0 %v4250_v31  ;;  %v4173_v31 = vld [vmem:[#allocation2 + $0x190] sm:$0xf]  ;;  %v4370_v19 = vor.u32 %v4861_v33, %v4367_v11  ;;  %v4811_v48 = vld [vmem:[#allocation2 + $0x194] sm:$0xf]  ;;  %v4843_v37 = vld [vmem:[%s5466_s21 + $0x94] sm:$0xf] }
 0x2c8   : > { %3070 = vmatmul.bf16.gmra.mxu3 %v6152_v39  ;;  %3139 = vmatpush.bf16.msra.mxu1 %v4314_v32  ;;  %v4815_v32 = vld [vmem:[#allocation2 + $0x1ac] sm:$0xf0]  ;;  %v4816_v33 = vld [vmem:[#allocation2 + $0x1b4] sm:$0xf0]  ;;  %v4875_v11 = vld [vmem:[%s5466_s21 + $0x194] sm:$0xf] }
 0x2c9   : > { %3188 = vmatpush.bf16.msra.mxu2 %v4378_v58  ;;  %v4175_v58 = vld [vmem:[#allocation2 + $0x1b0] sm:$0xf0] }
 0x2ca   : > { %v2826_v38 = vpop.f32.mrf.mxu2  ;;  %v2730_v9 = vpop.f32.mrf.mxu0  ;;  %3237 = vmatpush.bf16.msra.mxu3 %v4442_v56  ;;  %v4359_v56 = vld [vmem:[%s5466_s21 + $0x118] sm:$0xf0] }
 0x2cb   : > { %v2827_v47 = vadd.f32 %v2826_v38, %v2778_v8  ;;  %v2875_v21 = vpop.f32.mrf.mxu3  ;;  %v2731_v35 = vadd.f32 %v2730_v9, %v6025_v18  ;;  %v2779_v39 = vpop.f32.mrf.mxu1  ;;  %v4877_v8 = vld [vmem:[%s5466_s21 + $0x1a4] sm:$0xf]  ;;  %v4431_v38 = vld [vmem:[%s5466_s21 + $0x1a8] sm:$0xf0]  ;;  %3091 = vmatpush.bf16.msra.mxu0 %v4242_v36 }
 0x2cc   : > { %v4434_v17 = vor.u32 %v4877_v8, %v4431_v38  ;;  %v4181_v9 = vld [vmem:[#allocation2 + $0x198] sm:$0xf]  ;;  %3140 = vmatpush.bf16.msra.mxu1 %v4306_v23  ;;  %v4423_v8 = vld [vmem:[%s5466_s21 + $0x198] sm:$0xf0]  ;;  %v4812_v38 = vld [vmem:[#allocation2 + $0x19c] sm:$0xf] }
 0x2cd   : > { %v6179_v0 = vadd.f32 %v2875_v21, %v2827_v47  ;;  %v2780_v20 = vadd.f32 %v2779_v39, %v2731_v35  ;;  %v4234_v47 = vor.u32 %v4827_v12, %v4231_v13  ;;  %v4295_v21 = vld [vmem:[%s5466_s21 + $0x98] sm:$0xf0]  ;;  %3189 = vmatpush.bf16.msra.mxu2 %v4370_v19  ;;  %v4362_v35 = vor.u32 %v4859_v7, %v4359_v56  ;;  %v4825_v13 = vld [vmem:[%s5466_s21 + $0x4] sm:$0xf] }
 0x2ce   : > { %v4298_v39 = vor.u32 %v4843_v37, %v4295_v21  ;;  %3238 = vmatpush.bf16.msra.mxu3 %v4434_v17  ;;  %v4426_v36 = vor.u32 %v4875_v11, %v4423_v8  ;;  %v6189_v12 = vor.u32 %v4815_v32, %v4173_v31  ;;  %v6194_v19 = vor.u32 %v4811_v48, %v4175_v58  ;;  %v4287_v17 = vld [vmem:[%s5466_s21 + $0x88] sm:$0xf0]  ;;  %v4857_v56 = vld [vmem:[%s5466_s21 + $0x104] sm:$0xf] }
 0x2cf   : > { %v6196_v21 = vor.u32 %v4816_v33, %v4181_v9  ;;  %3092 = vmatpush.bf16.msra.mxu0 %v4234_v47  ;;  %v4351_v11 = vld [vmem:[%s5466_s21 + $0x108] sm:$0xf0]  ;;  %v6202_v8 = vor.u32 %v4812_v38, %v4183_v54  ;;  %v4226_v34 = vor.u32 %v4825_v13, %v4223_v60  ;;  %v4290_v48 = vor.u32 %v4841_v46, %v4287_v17  ;;  %v4823_v13 = vld [vmem:[#allocation2 + $0x1ec] sm:$0xf0] }
 0x2d0   : > { %3141 = vmatpush.bf16.msra.mxu1 %v4298_v39  ;;  %v4354_v58 = vor.u32 %v4857_v56, %v4351_v11  ;;  %v4213_v17 = vld [vmem:[#allocation2 + $0x1d8] sm:$0xf]  ;;  %v4215_v11 = vld [vmem:[#allocation2 + $0x1f8] sm:$0xf0] }
 0x2d1   : > { %3190 = vmatpush.bf16.msra.mxu2 %v4362_v35  ;;  %v4824_v56 = vld [vmem:[#allocation2 + $0x1f4] sm:$0xf0] }
 0x2d2   : > { %v2828_v23 = vpop.f32.mrf.mxu2  ;;  %v2733_v7 = vpop.f32.mrf.mxu0  ;;  %3239 = vmatpush.bf16.msra.mxu3 %v4426_v36  ;;  %v4205_v36 = vld [vmem:[#allocation2 + $0x1d0] sm:$0xf] }
 0x2d3   : > { %v2829_v45 = vadd.f32 %v2828_v23, %v2780_v20  ;;  %v2877_v37 = vpop.f32.mrf.mxu3  ;;  %v2734_v31 = vadd.f32 %v2733_v7, %v6025_v18  ;;  %v2782_v32 = vpop.f32.mrf.mxu1  ;;  %v4873_v20 = vld [vmem:[%s5466_s21 + $0x184] sm:$0xf]  ;;  %v4415_v23 = vld [vmem:[%s5466_s21 + $0x188] sm:$0xf0]  ;;  %3093 = vmatpush.bf16.msra.mxu0 %v4226_v34  ;;  %v4820_v34 = vld [vmem:[#allocation2 + $0x1dc] sm:$0xf] }
 0x2d4   : > { %v4418_v47 = vor.u32 %v4873_v20, %v4415_v23  ;;  %3142 = vmatpush.bf16.msra.mxu1 %v4290_v48  ;;  %v4207_v7 = vld [vmem:[#allocation2 + $0x1f0] sm:$0xf0] }
 0x2d5   : > { %v6206_v27 = vadd.f32 %v2877_v37, %v2829_v45  ;;  %v2783_v9 = vadd.f32 %v2782_v32, %v2734_v31  ;;  %2928 = vmatmul.bf16.gmra.mxu0 %v6189_v12  ;;  %3191 = vmatpush.bf16.msra.mxu2 %v4354_v58  ;;  %v4819_v37 = vld [vmem:[#allocation2 + $0x1d4] sm:$0xf]  ;;  %v6215_v32 = vor.u32 %v4823_v13, %v4205_v36 }
 0x2d6   : > { %2977 = vmatmul.bf16.gmra.mxu1 %v6194_v19  ;;  %3240 = vmatpush.bf16.msra.mxu3 %v4418_v47  ;;  %v6217_v58 = vor.u32 %v4819_v37, %v4207_v7 }
 0x2d7   : > { %3026 = vmatmul.bf16.gmra.mxu2 %v6196_v21 }
 0x2d8   : > { %3075 = vmatmul.bf16.gmra.mxu3 %v6202_v8 }
 0x2da   : > { %v2831_v60 = vpop.f32.mrf.mxu2  ;;  %v2735_v33 = vpop.f32.mrf.mxu0 }
 0x2db   : > { %v2832_v45 = vadd.f32 %v2831_v60, %v2783_v9  ;;  %v2880_v54 = vpop.f32.mrf.mxu3  ;;  %v2736_v46 = vadd.f32 %v2735_v33, %v6025_v18  ;;  %v2784_v39 = vpop.f32.mrf.mxu1  ;;  %v6219_v9 = vor.u32 %v4824_v56, %v4213_v17 }
 0x2dd   : > { %v6213_v35 = vadd.f32 %v2880_v54, %v2832_v45  ;;  %v2785_v38 = vadd.f32 %v2784_v39, %v2736_v46  ;;  %v6222_v45 = vor.u32 %v4820_v34, %v4215_v11 }
 0x2e2   : > { %v2833_v31 = vpop.f32.mrf.mxu2  ;;  %v2738_v48 = vpop.f32.mrf.mxu0 }
 0x2e3   : > { %v2834_v20 = vadd.f32 %v2833_v31, %v2785_v38  ;;  %v2882_v23 = vpop.f32.mrf.mxu3  ;;  %v2739_v47 = vadd.f32 %v2738_v48, %v6025_v18  ;;  %v2787_v60 = vpop.f32.mrf.mxu1 }
 0x2e5   : > { %v6224_v54 = vadd.f32 %v2882_v23, %v2834_v20  ;;  %v2788_v33 = vadd.f32 %v2787_v60, %v2739_v47  ;;  %2933 = vmatmul.bf16.gmra.mxu0 %v6215_v32 }
 0x2e6   : > { %2982 = vmatmul.bf16.gmra.mxu1 %v6217_v58 }
 0x2e7   : > { %3031 = vmatmul.bf16.gmra.mxu2 %v6219_v9 }
 0x2e8   : > { %3080 = vmatmul.bf16.gmra.mxu3 %v6222_v45 }
 0x2ea   : > { %v2836_v46 = vpop.f32.mrf.mxu2  ;;  %v2740_v36 = vpop.f32.mrf.mxu0 }
 0x2eb   : > { %v2837_v39 = vadd.f32 %v2836_v46, %v2788_v33  ;;  %v2885_v38 = vpop.f32.mrf.mxu3  ;;  %v2741_v13 = vadd.f32 %v2740_v36, %v6025_v18  ;;  %v2789_v37 = vpop.f32.mrf.mxu1 }
 0x2ed   : > { %v6231_v7 = vadd.f32 %v2885_v38, %v2837_v39  ;;  %v2790_v17 = vadd.f32 %v2789_v37, %v2741_v13 }
 0x2f2   : > { %v2838_v56 = vpop.f32.mrf.mxu2  ;;  %v2899_v31 = vpop.f32.mrf.mxu0 }
 0x2f3   : > { %v2839_v34 = vadd.f32 %v2838_v56, %v2790_v17  ;;  %v2887_v11 = vpop.f32.mrf.mxu3  ;;  %v2900_v20 = vadd.f32 %v2899_v31, %v6041_v2  ;;  %v2948_v23 = vpop.f32.mrf.mxu1 }
 0x2f5   : > { %v6234_v48 = vadd.f32 %v2887_v11, %v2839_v34  ;;  %v2949_v47 = vadd.f32 %v2948_v23, %v2900_v20  ;;  %3094 = vmatmul.bf16.vlgmr.msra.gmra.mxu0 %v5863_v28 }
 0x2f6   : > { %3143 = vmatmul.bf16.vlgmr.msra.gmra.mxu1 %v5865_v29 }
 0x2f7   : > { %3192 = vmatmul.bf16.vlgmr.msra.gmra.mxu2 %v5867_v30 }
 0x2f8   : > { %3241 = vmatmul.bf16.vlgmr.msra.gmra.mxu3 %v5869_v53 }
 0x2fa   : > { %v2997_v18 = vpop.f32.mrf.mxu2  ;;  %v2901_v46 = vpop.f32.mrf.mxu0 }
 0x2fb   : > { %v2998_v60 = vadd.f32 %v2997_v18, %v2949_v47  ;;  %v3046_v33 = vpop.f32.mrf.mxu3  ;;  %v2902_v39 = vadd.f32 %v2901_v46, %v6052_v52  ;;  %v2950_v38 = vpop.f32.mrf.mxu1 }
 0x2fd   : > { %v3047_v2 = vadd.f32 %v3046_v33, %v2998_v60  ;;  %v2951_v36 = vadd.f32 %v2950_v38, %v2902_v39 }
 0x2ff   : > { %v3510_v34 = vmul.f32 0.01, %v3047_v2  ;;  %vm3478_vm4 = vcmp.gt.f32.partialorder %v3047_v2, 0.0 }
 0x301   : > { %v6246_v52 = vsel %vm3478_vm4, %v3047_v2, %v3510_v34 }
 0x302   : > { %v2999_v13 = vpop.f32.mrf.mxu2  ;;  %v2904_v56 = vpop.f32.mrf.mxu0 }
 0x303   : > { %v3000_v37 = vadd.f32 %v2999_v13, %v2951_v36  ;;  %v3048_v17 = vpop.f32.mrf.mxu3  ;;  %v2905_v28 = vadd.f32 %v2904_v56, %v6059_v5  ;;  %v2953_v29 = vpop.f32.mrf.mxu1  ;;  %v4663_v56 = vld [vmem:[%s5466_s21 + $0x378] sm:$0xf0] }
 0x305   : > { %v3049_v30 = vadd.f32 %v3048_v17, %v3000_v37  ;;  %v2954_v53 = vadd.f32 %v2953_v29, %v2905_v28  ;;  %3099 = vmatmul.bf16.gmra.mxu0 %v5875_v40  ;;  %v4935_v17 = vld [vmem:[%s5466_s21 + $0x374] sm:$0xf] }
 0x306   : > { %3148 = vmatmul.bf16.gmra.mxu1 %v5877_v41 }
 0x307   : > { %vm3480_vm5 = vcmp.gt.f32.partialorder %v3049_v30, 0.0  ;;  %v3512_v11 = vmul.f32 0.01, %v3049_v30  ;;  %3197 = vmatmul.bf16.gmra.mxu2 %v5879_v42 }
 0x308   : > { %3246 = vmatmul.bf16.gmra.mxu3 %v5881_v43 }
 0x309   : > { %v6248_v31 = vsel %vm3480_vm5, %v3049_v30, %v3512_v11 }
 0x30a   : > { %v3002_v5 = vpop.f32.mrf.mxu2  ;;  %v3575_v20 = vpack.c.bf16 %v6248_v31, %v6246_v52  ;;  %v2906_v18 = vpop.f32.mrf.mxu0 }
 0x30b   : > { %v3003_v23 = vadd.f32 %v3002_v5, %v2954_v53  ;;  %v3051_v47 = vpop.f32.mrf.mxu3  ;;  %v2907_v40 = vadd.f32 %v2906_v18, %v6070_v4  ;;  %v2955_v60 = vpop.f32.mrf.mxu1  ;;  %v4951_v18 = vld [vmem:[%s5466_s21 + $0x3f4] sm:$0xf] }
 0x30d   : > { %v3052_v33 = vadd.f32 %v3051_v47, %v3003_v23  ;;  %v2956_v41 = vadd.f32 %v2955_v60, %v2907_v40  ;;  %v4903_v23 = vld [vmem:[%s5466_s21 + $0x274] sm:$0xf]  ;;  %v4535_v47 = vld [vmem:[%s5466_s21 + $0x278] sm:$0xf0] }
 0x30e   : > { %v4727_v40 = vld [vmem:[%s5466_s21 + $0x3f8] sm:$0xf0]  ;;  %v4538_v60 = vor.u32 %v4903_v23, %v4535_v47  ;;  %v4901_v23 = vld [vmem:[%s5466_s21 + $0x264] sm:$0xf] }
 0x30f   : > { %v3514_v36 = vmul.f32 0.01, %v3052_v33  ;;  %vm3482_vm6 = vcmp.gt.f32.partialorder %v3052_v33, 0.0  ;;  %v4949_v47 = vld [vmem:[%s5466_s21 + $0x3e4] sm:$0xf] }
 0x310   : > { %3282 = vmatpush.bf16.msrb.mxu0 %v4538_v60 }
 0x311   : > { %v6260_v28 = vsel %vm3482_vm6, %v3052_v33, %v3514_v36  ;;  %v4730_v33 = vor.u32 %v4951_v18, %v4727_v40  ;;  %v4719_v18 = vld [vmem:[%s5466_s21 + $0x3e8] sm:$0xf0] }
 0x312   : > { %v3004_v46 = vpop.f32.mrf.mxu2  ;;  %v2909_v39 = vpop.f32.mrf.mxu0  ;;  %v4722_v60 = vor.u32 %v4949_v47, %v4719_v18  ;;  %v4915_v47 = vld [vmem:[%s5466_s21 + $0x2d4] sm:$0xf]  ;;  %v4583_v18 = vld [vmem:[%s5466_s21 + $0x2d8] sm:$0xf0] }
 0x313   : > { %v3005_v42 = vadd.f32 %v3004_v46, %v2956_v41  ;;  %v3053_v43 = vpop.f32.mrf.mxu3  ;;  %v2910_v38 = vadd.f32 %v2909_v39, %v6079_v22  ;;  %v2958_v2 = vpop.f32.mrf.mxu1  ;;  %v4666_v22 = vor.u32 %v4935_v17, %v4663_v56  ;;  %v4919_v41 = vld [vmem:[%s5466_s21 + $0x2f4] sm:$0xf]  ;;  %v4599_v46 = vld [vmem:[%s5466_s21 + $0x2f8] sm:$0xf0]  ;;  %3429 = vmatpush.bf16.msrb.mxu3 %v4730_v33  ;;  %v4933_v56 = vld [vmem:[%s5466_s21 + $0x364] sm:$0xf] }
 0x314   : > { %v4917_v33 = vld [vmem:[%s5466_s21 + $0x2e4] sm:$0xf] }
 0x315   : > { %v3054_v13 = vadd.f32 %v3053_v43, %v3005_v42  ;;  %v2959_v37 = vadd.f32 %v2958_v2, %v2910_v38  ;;  %3104 = vmatmul.bf16.gmra.mxu0 %v5887_v1  ;;  %3380 = vmatpush.bf16.msrb.mxu2 %v4666_v22  ;;  %v4602_v43 = vor.u32 %v4919_v41, %v4599_v46  ;;  %v4591_v41 = vld [vmem:[%s5466_s21 + $0x2e8] sm:$0xf0] }
 0x316   : > { %3153 = vmatmul.bf16.gmra.mxu1 %v5889_v3 }
 0x317   : > { %vm3484_vm7 = vcmp.gt.f32.partialorder %v3054_v13, 0.0  ;;  %v3516_v4 = vmul.f32 0.01, %v3054_v13  ;;  %3202 = vmatmul.bf16.gmra.mxu2 %v5891_v49  ;;  %3331 = vmatpush.bf16.msrb.mxu1 %v4602_v43 }
 0x318   : > { %3251 = vmatmul.bf16.gmra.mxu3 %v5893_v59 }
 0x319   : > { %v6262_v29 = vsel %vm3484_vm7, %v3054_v13, %v3516_v4  ;;  %3430 = vmatpush.bf16.msrb.mxu3 %v4722_v60  ;;  %v4897_v60 = vld [vmem:[%s5466_s21 + $0x244] sm:$0xf] }
 0x31a   : > { %v3007_v1 = vpop.f32.mrf.mxu2  ;;  %v3577_v3 = vpack.c.bf16 %v6262_v29, %v6260_v28  ;;  %v2911_v59 = vpop.f32.mrf.mxu0  ;;  %v6690_v28 = vld [vmem:[#allocation47_spill] sm:$0xff]  ;;  %v6691_v29 = vld [vmem:[#allocation48_spill] sm:$0xff] }
 0x31b   : > { %v3008_v49 = vadd.f32 %v3007_v1, %v2959_v37  ;;  %v3056_v34 = vpop.f32.mrf.mxu3  ;;  %v2912_v30 = vadd.f32 %v2911_v59, %v6096_v63  ;;  %v2960_v53 = vpop.f32.mrf.mxu1 }
 0x31d   : > { %v3057_v11 = vadd.f32 %v3056_v34, %v3008_v49  ;;  %v2961_v5 = vadd.f32 %v2960_v53, %v2912_v30 }
 0x31f   : > { %v3518_v13 = vmul.f32 0.01, %v3057_v11  ;;  %vm3486_vm8 = vcmp.gt.f32.partialorder %v3057_v11, 0.0 }
 0x321   : > { %v6280_v1 = vsel %vm3486_vm8, %v3057_v11, %v3518_v13  ;;  %v4527_v11 = vld [vmem:[%s5466_s21 + $0x268] sm:$0xf0] }
 0x322   : > { %v3009_v42 = vpop.f32.mrf.mxu2  ;;  %v2914_v2 = vpop.f32.mrf.mxu0  ;;  %v4530_v40 = vor.u32 %v4901_v23, %v4527_v11  ;;  %v4711_v23 = vld [vmem:[%s5466_s21 + $0x3d8] sm:$0xf0] }
 0x323   : > { %v3010_v39 = vadd.f32 %v3009_v42, %v2961_v5  ;;  %v3058_v38 = vpop.f32.mrf.mxu3  ;;  %v2915_v63 = vadd.f32 %v2914_v2, %v6105_v10  ;;  %v2963_v36 = vpop.f32.mrf.mxu1  ;;  %v4655_v10 = vld [vmem:[%s5466_s21 + $0x368] sm:$0xf0]  ;;  %v4594_v42 = vor.u32 %v4917_v33, %v4591_v41  ;;  %v4913_v41 = vld [vmem:[%s5466_s21 + $0x2c4] sm:$0xf] }
 0x324   : > { %v4658_v22 = vor.u32 %v4933_v56, %v4655_v10  ;;  %3283 = vmatpush.bf16.msrb.mxu0 %v4530_v40  ;;  %v4586_v40 = vor.u32 %v4915_v47, %v4583_v18  ;;  %v4511_v33 = vld [vmem:[%s5466_s21 + $0x248] sm:$0xf0] }
 0x325   : > { %v3059_v37 = vadd.f32 %v3058_v38, %v3010_v39  ;;  %v2964_v4 = vadd.f32 %v2963_v36, %v2915_v63  ;;  %3109 = vmatmul.bf16.gmra.mxu0 %v5907_v14  ;;  %3332 = vmatpush.bf16.msrb.mxu1 %v4594_v42 }
 0x326   : > { %3158 = vmatmul.bf16.gmra.mxu1 %v5909_v15  ;;  %3381 = vmatpush.bf16.msrb.mxu2 %v4658_v22 }
 0x327   : > { %vm3488_vm9 = vcmp.gt.f32.partialorder %v3059_v37, 0.0  ;;  %v3520_v17 = vmul.f32 0.01, %v3059_v37  ;;  %3207 = vmatmul.bf16.gmra.mxu2 %v5911_v51 }
 0x328   : > { %3256 = vmatmul.bf16.gmra.mxu3 %v5913_v16 }
 0x329   : > { %v6282_v49 = vsel %vm3488_vm9, %v3059_v37, %v3520_v17  ;;  %3333 = vmatpush.bf16.msrb.mxu1 %v4586_v40  ;;  %v4893_v40 = vld [vmem:[%s5466_s21 + $0x224] sm:$0xf] }
 0x32a   : > { %v3012_v14 = vpop.f32.mrf.mxu2  ;;  %v3579_v15 = vpack.c.bf16 %v6282_v49, %v6280_v1  ;;  %v2916_v16 = vpop.f32.mrf.mxu0 }
 0x32b   : > { %v3013_v51 = vadd.f32 %v3012_v14, %v2964_v4  ;;  %v3061_v34 = vpop.f32.mrf.mxu3  ;;  %v2917_v59 = vadd.f32 %v2916_v16, %v6122_v61  ;;  %v2965_v30 = vpop.f32.mrf.mxu1  ;;  %v4931_v4 = vld [vmem:[%s5466_s21 + $0x354] sm:$0xf] }
 0x32d   : > { %v3062_v53 = vadd.f32 %v3061_v34, %v3013_v51  ;;  %v2966_v5 = vadd.f32 %v2965_v30, %v2917_v59  ;;  %v4899_v59 = vld [vmem:[%s5466_s21 + $0x254] sm:$0xf]  ;;  %v4519_v30 = vld [vmem:[%s5466_s21 + $0x258] sm:$0xf0] }
 0x32f   : > { %v3522_v63 = vmul.f32 0.01, %v3062_v53  ;;  %vm3490_vm10 = vcmp.gt.f32.partialorder %v3062_v53, 0.0 }
 0x331   : > { %v6300_v56 = vsel %vm3490_vm10, %v3062_v53, %v3522_v63  ;;  %v4947_v53 = vld [vmem:[%s5466_s21 + $0x3d4] sm:$0xf] }
 0x332   : > { %v3014_v46 = vpop.f32.mrf.mxu2  ;;  %v2919_v38 = vpop.f32.mrf.mxu0  ;;  %v4714_v11 = vor.u32 %v4947_v53, %v4711_v23  ;;  %v4927_v53 = vld [vmem:[%s5466_s21 + $0x334] sm:$0xf] }
 0x333   : > { %v3015_v43 = vadd.f32 %v3014_v46, %v2966_v5  ;;  %v3063_v39 = vpop.f32.mrf.mxu3  ;;  %v2920_v61 = vadd.f32 %v2919_v38, %v6131_v6  ;;  %v2968_v2 = vpop.f32.mrf.mxu1  ;;  %v4647_v6 = vld [vmem:[%s5466_s21 + $0x358] sm:$0xf0]  ;;  %v4522_v5 = vor.u32 %v4899_v59, %v4519_v30  ;;  %v4575_v38 = vld [vmem:[%s5466_s21 + $0x2c8] sm:$0xf0]  ;;  %v4943_v23 = vld [vmem:[%s5466_s21 + $0x3b4] sm:$0xf] }
 0x334   : > { %v4650_v17 = vor.u32 %v4931_v4, %v4647_v6  ;;  %3431 = vmatpush.bf16.msrb.mxu3 %v4714_v11  ;;  %v4703_v4 = vld [vmem:[%s5466_s21 + $0x3c8] sm:$0xf0]  ;;  %v4567_v59 = vld [vmem:[%s5466_s21 + $0x2b8] sm:$0xf0] }
 0x335   : > { %v3064_v36 = vadd.f32 %v3063_v39, %v3015_v43  ;;  %v2969_v13 = vadd.f32 %v2968_v2, %v2920_v61  ;;  %3114 = vmatmul.bf16.gmra.mxu0 %v5927_v50  ;;  %v4514_v39 = vor.u32 %v4897_v60, %v4511_v33  ;;  %v4929_v61 = vld [vmem:[%s5466_s21 + $0x344] sm:$0xf]  ;;  %v4639_v2 = vld [vmem:[%s5466_s21 + $0x348] sm:$0xf0] }
 0x336   : > { %3163 = vmatmul.bf16.gmra.mxu1 %v5929_v44  ;;  %3382 = vmatpush.bf16.msrb.mxu2 %v4650_v17  ;;  %v6664_v30 = vld [vmem:[#allocation21_spill] sm:$0xff]  ;;  %v4909_v60 = vld [vmem:[%s5466_s21 + $0x2a4] sm:$0xf] }
 0x337   : > { %vm3492_vm11 = vcmp.gt.f32.partialorder %v3064_v36, 0.0  ;;  %v3524_v37 = vmul.f32 0.01, %v3064_v36  ;;  %3212 = vmatmul.bf16.gmra.mxu2 %v5931_v57  ;;  %3284 = vmatpush.bf16.msrb.mxu0 %v4522_v5  ;;  %v4631_v5 = vld [vmem:[%s5466_s21 + $0x338] sm:$0xf0] }
 0x338   : > { %3261 = vmatmul.bf16.gmra.mxu3 %v5933_v55 }
 0x339   : > { %v6302_v10 = vsel %vm3492_vm11, %v3064_v36, %v3524_v37  ;;  %v4578_v36 = vor.u32 %v4913_v41, %v4575_v38  ;;  %v4945_v37 = vld [vmem:[%s5466_s21 + $0x3c4] sm:$0xf]  ;;  %v4623_v38 = vld [vmem:[%s5466_s21 + $0x328] sm:$0xf0] }
 0x33a   : > { %v3017_v50 = vpop.f32.mrf.mxu2  ;;  %v3581_v44 = vpack.c.bf16 %v6302_v10, %v6300_v56  ;;  %v2921_v55 = vpop.f32.mrf.mxu0  ;;  %v6686_v56 = vld [vmem:[#allocation43_spill] sm:$0xff]  ;;  %v6687_v10 = vld [vmem:[#allocation44_spill] sm:$0xff] }
 0x33b   : > { %v3018_v57 = vadd.f32 %v3017_v50, %v2969_v13  ;;  %v3066_v22 = vpop.f32.mrf.mxu3  ;;  %v2922_v14 = vadd.f32 %v2921_v55, %v6156_v62  ;;  %v2970_v51 = vpop.f32.mrf.mxu1  ;;  %v4642_v13 = vor.u32 %v4929_v61, %v4639_v2  ;;  %3285 = vmatpush.bf16.msrb.mxu0 %v4514_v39  ;;  %v4706_v50 = vor.u32 %v4945_v37, %v4703_v4  ;;  %v4911_v55 = vld [vmem:[%s5466_s21 + $0x2b4] sm:$0xf]  ;;  %v4925_v39 = vld [vmem:[%s5466_s21 + $0x324] sm:$0xf]  ;;  %v4687_v37 = vld [vmem:[%s5466_s21 + $0x3a8] sm:$0xf0] }
 0x33c   : > { %3334 = vmatpush.bf16.msrb.mxu1 %v4578_v36  ;;  %v4626_v36 = vor.u32 %v4925_v39, %v4623_v38  ;;  %v4937_v39 = vld [vmem:[%s5466_s21 + $0x384] sm:$0xf]  ;;  %v4671_v38 = vld [vmem:[%s5466_s21 + $0x388] sm:$0xf0] }
 0x33d   : > { %v3067_v34 = vadd.f32 %v3066_v22, %v3018_v57  ;;  %v2971_v16 = vadd.f32 %v2970_v51, %v2922_v14  ;;  %3383 = vmatpush.bf16.msrb.mxu2 %v4642_v13  ;;  %v4895_v57 = vld [vmem:[%s5466_s21 + $0x234] sm:$0xf]  ;;  %v4503_v22 = vld [vmem:[%s5466_s21 + $0x238] sm:$0xf0]  ;;  %3432 = vmatpush.bf16.msrb.mxu3 %v4706_v50  ;;  %v4941_v13 = vld [vmem:[%s5466_s21 + $0x3a4] sm:$0xf] }
 0x33e   : > { %v4487_v50 = vld [vmem:[%s5466_s21 + $0x218] sm:$0xf0] }
 0x33f   : > { %vm3494_vm12 = vcmp.gt.f32.partialorder %v3067_v34, 0.0  ;;  %v3526_v6 = vmul.f32 0.01, %v3067_v34 }
 0x342   : > { %v3019_v62 = vpop.f32.mrf.mxu2  ;;  %v2924_v43 = vpop.f32.mrf.mxu0 }
 0x343   : > { %v3020_v46 = vadd.f32 %v3019_v62, %v2971_v16  ;;  %v3068_v42 = vpop.f32.mrf.mxu3  ;;  %v2973_v63 = vpop.f32.mrf.mxu1  ;;  %v2925_v51 = vadd.f32 %v2924_v43, %v6179_v0  ;;  %v4506_v16 = vor.u32 %v4895_v57, %v4503_v22  ;;  %v4634_v0 = vor.u32 %v4927_v53, %v4631_v5  ;;  %v4495_v62 = vld [vmem:[%s5466_s21 + $0x228] sm:$0xf0]  ;;  %v4907_v57 = vld [vmem:[%s5466_s21 + $0x294] sm:$0xf]  ;;  %v4679_v53 = vld [vmem:[%s5466_s21 + $0x398] sm:$0xf0] }
 0x344   : > { %v4559_v43 = vld [vmem:[%s5466_s21 + $0x2a8] sm:$0xf0] }
 0x345   : > { %v3069_v17 = vadd.f32 %v3068_v42, %v3020_v46  ;;  %3119 = vmatmul.bf16.gmra.mxu0 %v5955_v24  ;;  %v4570_v24 = vor.u32 %v4911_v55, %v4567_v59  ;;  %v2974_v41 = vadd.f32 %v2973_v63, %v2925_v51  ;;  %3384 = vmatpush.bf16.msrb.mxu2 %v4634_v0  ;;  %v4551_v55 = vld [vmem:[%s5466_s21 + $0x298] sm:$0xf0]  ;;  %v4923_v51 = vld [vmem:[%s5466_s21 + $0x314] sm:$0xf]  ;;  %v4889_v0 = vld [vmem:[%s5466_s21 + $0x204] sm:$0xf] }
 0x346   : > { %3168 = vmatmul.bf16.gmra.mxu1 %v5957_v25  ;;  %3286 = vmatpush.bf16.msrb.mxu0 %v4506_v16  ;;  %v4695_v25 = vld [vmem:[%s5466_s21 + $0x3b8] sm:$0xf0]  ;;  %v4562_v2 = vor.u32 %v4909_v60, %v4559_v43  ;;  %v4939_v59 = vld [vmem:[%s5466_s21 + $0x394] sm:$0xf] }
 0x347   : > { %vm3496_vm13 = vcmp.gt.f32.partialorder %v3069_v17, 0.0  ;;  %v3528_v14 = vmul.f32 0.01, %v3069_v17  ;;  %3217 = vmatmul.bf16.gmra.mxu2 %v5959_v26  ;;  %v6335_v26 = vsel %vm3494_vm12, %v3067_v34, %v3526_v6  ;;  %v4698_v18 = vor.u32 %v4943_v23, %v4695_v25  ;;  %3335 = vmatpush.bf16.msrb.mxu1 %v4570_v24  ;;  %v4615_v16 = vld [vmem:[%s5466_s21 + $0x318] sm:$0xf0] }
 0x348   : > { %3266 = vmatmul.bf16.gmra.mxu3 %v6664_v30  ;;  %v4498_v34 = vor.u32 %v4893_v40, %v4495_v62  ;;  %v4690_v6 = vor.u32 %v4941_v13, %v4687_v37  ;;  %v4618_v24 = vor.u32 %v4923_v51, %v4615_v16  ;;  %v4682_v23 = vor.u32 %v4939_v59, %v4679_v53  ;;  %v4479_v25 = vld [vmem:[%s5466_s21 + $0x208] sm:$0xf0]  ;;  %v6665_v37 = vld [vmem:[#allocation22_spill] sm:$0xff] }
 0x349   : > { %v6338_v11 = vsel %vm3496_vm13, %v3069_v17, %v3528_v14  ;;  %3433 = vmatpush.bf16.msrb.mxu3 %v4698_v18  ;;  %v4891_v17 = vld [vmem:[%s5466_s21 + $0x214] sm:$0xf]  ;;  %3385 = vmatpush.bf16.msrb.mxu2 %v4626_v36  ;;  %v4554_v14 = vor.u32 %v4907_v57, %v4551_v55  ;;  %v4482_v60 = vor.u32 %v4889_v0, %v4479_v25 }
 0x34a   : > { %v3022_v47 = vpop.f32.mrf.mxu2  ;;  %v3583_v33 = vpack.c.bf16 %v6338_v11, %v6335_v26  ;;  %v2926_v42 = vpop.f32.mrf.mxu0  ;;  %3287 = vmatpush.bf16.msrb.mxu0 %v4498_v34  ;;  %v4490_v22 = vor.u32 %v4891_v17, %v4487_v50  ;;  %v4674_v13 = vor.u32 %v4937_v39, %v4671_v38  ;;  %v6667_v17 = vld [vmem:[#allocation24_spill] sm:$0xff]  ;;  %v6668_v50 = vld [vmem:[#allocation25_spill] sm:$0xff] }
 0x34b   : > { %v3071_v46 = vpop.f32.mrf.mxu3  ;;  %v2975_v61 = vpop.f32.mrf.mxu1  ;;  %v3023_v63 = vadd.f32 %v3022_v47, %v2974_v41  ;;  %v2927_v4 = vadd.f32 %v2926_v42, %v6206_v27  ;;  %3336 = vmatpush.bf16.msrb.mxu1 %v4562_v2  ;;  %v4905_v47 = vld [vmem:[%s5466_s21 + $0x284] sm:$0xf]  ;;  %v4543_v41 = vld [vmem:[%s5466_s21 + $0x288] sm:$0xf0] }
 0x34c   : > { %v4607_v42 = vld [vmem:[%s5466_s21 + $0x308] sm:$0xf0]  ;;  %v4546_v43 = vor.u32 %v4905_v47, %v4543_v41 }
 0x34d   : > { %v3072_v30 = vadd.f32 %v3071_v46, %v3023_v63  ;;  %v2976_v27 = vadd.f32 %v2975_v61, %v2927_v4  ;;  %3434 = vmatpush.bf16.msrb.mxu3 %v4690_v6  ;;  %3386 = vmatpush.bf16.msrb.mxu2 %v4618_v24  ;;  %v4921_v46 = vld [vmem:[%s5466_s21 + $0x304] sm:$0xf]  ;;  %v6666_v6 = vld [vmem:[#allocation23_spill] sm:$0xff]  ;;  %s6697_s21 = sld [smem:[#allocation18_spill]] }
 0x34e   : > { %3288 = vmatpush.bf16.msrb.mxu0 %v4490_v22  ;;  %v4610_v36 = vor.u32 %v4921_v46, %v4607_v42  ;;  %v6670_v46 = vld [vmem:[#allocation27_spill] sm:$0xff]  ;;  %v6672_v42 = vld [vmem:[#allocation29_spill] sm:$0xff] }
 0x34f   : > { %3337 = vmatpush.bf16.msrb.mxu1 %v4554_v14  ;;  %v3530_v61 = vmul.f32 0.01, %v3072_v30  ;;  %vm3498_vm14 = vcmp.gt.f32.partialorder %v3072_v30, 0.0 }
 0x351   : > { %3435 = vmatpush.bf16.msrb.mxu3 %v4682_v23  ;;  %3387 = vmatpush.bf16.msrb.mxu2 %v4610_v36  ;;  %v6372_v57 = vsel %vm3498_vm14, %v3072_v30, %v3530_v61 }
 0x352   : > { %v3024_v5 = vpop.f32.mrf.mxu2  ;;  %v2929_v62 = vpop.f32.mrf.mxu0  ;;  %3289 = vmatpush.bf16.msrb.mxu0 %v4482_v60 }
 0x353   : > { %v3025_v18 = vadd.f32 %v3024_v5, %v2976_v27  ;;  %v3073_v40 = vpop.f32.mrf.mxu3  ;;  %v2978_v34 = vpop.f32.mrf.mxu1  ;;  %v2930_v4 = vadd.f32 %v2929_v62, %v6213_v35  ;;  %3338 = vmatpush.bf16.msrb.mxu1 %v4546_v43  ;;  %v6669_v62 = vld [vmem:[#allocation26_spill] sm:$0xff]  ;;  %p4731_p2 = scmp.ne.s32.totalorder %s6697_s21, 3 }
 0x354   : > { %s3631_s26 = sld [smem:[#allocation4]] (!%p4731_p2) }
 0x355   : > { %v3074_v2 = vadd.f32 %v3073_v40, %v3025_v18  ;;  %3124 = vmatmul.bf16.gmra.mxu0 %v6665_v37  ;;  %3436 = vmatpush.bf16.msrb.mxu3 %v4674_v13  ;;  %v2979_v51 = vadd.f32 %v2978_v34, %v2930_v4  ;;  %v5051_v4 = vld [vmem:[%s370_s25] sm:$0x3] }
 0x356   : > { %3173 = vmatmul.bf16.gmra.mxu1 %v6666_v6 }
 0x357   : > { %vm3500_vm0 = vcmp.gt.f32.partialorder %v3074_v2, 0.0  ;;  %v3532_v63 = vmul.f32 0.01, %v3074_v2  ;;  %3222 = vmatmul.bf16.gmra.mxu2 %v6667_v17 }
 0x358   : > { %3271 = vmatmul.bf16.gmra.mxu3 %v6668_v50 }
 0x359   : > { %v6374_v22 = vsel %vm3500_vm0, %v3074_v2, %v3532_v63 }
 0x35a   : > { %v3027_v55 = vpop.f32.mrf.mxu2  ;;  %v3585_v14 = vpack.c.bf16 %v6374_v22, %v6372_v57  ;;  %v2931_v35 = vpop.f32.mrf.mxu0  ;;  %v6682_v57 = vld [vmem:[#allocation39_spill] sm:$0xff]  ;;  %v6683_v22 = vld [vmem:[#allocation40_spill] sm:$0xff] }
 0x35b   : > { %v3076_v16 = vpop.f32.mrf.mxu3  ;;  %v2980_v59 = vpop.f32.mrf.mxu1  ;;  %v3028_v27 = vadd.f32 %v3027_v55, %v2979_v51  ;;  %v2932_v24 = vadd.f32 %v2931_v35, %v6224_v54  ;;  %v6671_v54 = vld [vmem:[#allocation28_spill] sm:$0xff] }
 0x35d   : > { %v3077_v53 = vadd.f32 %v3076_v16, %v3028_v27  ;;  %v2981_v5 = vadd.f32 %v2980_v59, %v2932_v24 }
 0x35f   : > { %v3534_v18 = vmul.f32 0.01, %v3077_v53  ;;  %vm3502_vm15 = vcmp.gt.f32.partialorder %v3077_v53, 0.0 }
 0x361   : > { %v3566_v34 = vsel %vm3502_vm15, %v3077_v53, %v3534_v18 }
 0x362   : > { %v3029_v23 = vpop.f32.mrf.mxu2  ;;  %v2934_v30 = vpop.f32.mrf.mxu0 }
 0x363   : > { %v3030_v0 = vadd.f32 %v3029_v23, %v2981_v5  ;;  %v3078_v25 = vpop.f32.mrf.mxu3  ;;  %v2983_v47 = vpop.f32.mrf.mxu1  ;;  %v2935_v41 = vadd.f32 %v2934_v30, %v6231_v7  ;;  %v6387_v7 = vperm.slane %v5051_v4, 1  ;;  %v6673_v5 = vld [vmem:[#allocation30_spill] sm:$0xff]  ;;  %v6674_v23 = vld [vmem:[#allocation31_spill] sm:$0xff] }
 0x364   : > { %v6677_v4 = vld [vmem:[#allocation34_spill] sm:$0xff] }
 0x365   : > { %v3079_v40 = vadd.f32 %v3078_v25, %v3030_v0  ;;  %3129 = vmatmul.bf16.gmra.mxu0 %v6669_v62  ;;  %v2984_v61 = vadd.f32 %v2983_v47, %v2935_v41  ;;  %v6675_v0 = vld [vmem:[#allocation32_spill] sm:$0xff]  ;;  %v6676_v25 = vld [vmem:[#allocation33_spill] sm:$0xff] }
 0x366   : > { %3178 = vmatmul.bf16.gmra.mxu1 %v6670_v46 }
 0x367   : > { %vm3504_vm1 = vcmp.gt.f32.partialorder %v3079_v40, 0.0  ;;  %v3536_v60 = vmul.f32 0.01, %v3079_v40  ;;  %3227 = vmatmul.bf16.gmra.mxu2 %v6671_v54 }
 0x368   : > { %3276 = vmatmul.bf16.gmra.mxu3 %v6672_v42 }
 0x369   : > { %v3568_v43 = vsel %vm3504_vm1, %v3079_v40, %v3536_v60 }
 0x36a   : > { %v3032_v39 = vpop.f32.mrf.mxu2  ;;  %v3587_v38 = vpack.c.bf16 %v3568_v43, %v3566_v34  ;;  %v2936_v36 = vpop.f32.mrf.mxu0 }
 0x36b   : > { %v3081_v2 = vpop.f32.mrf.mxu3  ;;  %v2985_v13 = vpop.f32.mrf.mxu1  ;;  %v3033_v37 = vadd.f32 %v3032_v39, %v2984_v61  ;;  %v2937_v63 = vadd.f32 %v2936_v36, %v6234_v48 }
 0x36d   : > { %v3082_v6 = vadd.f32 %v3081_v2, %v3033_v37  ;;  %v2986_v17 = vadd.f32 %v2985_v13, %v2937_v63 }
 0x36f   : > { %v3538_v27 = vmul.f32 0.01, %v3082_v6  ;;  %vm3506_vm2 = vcmp.gt.f32.partialorder %v3082_v6, 0.0 }
 0x371   : > { %v3570_v30 = vsel %vm3506_vm2, %v3082_v6, %v3538_v27  ;;  %v6678_v6 = vld [vmem:[#allocation35_spill] sm:$0xff] }
 0x372   : > { %v3034_v50 = vpop.f32.mrf.mxu2  ;;  %v3095_v16 = vpop.f32.mrf.mxu0 }
 0x373   : > { %v3035_v55 = vadd.f32 %v3034_v50, %v2986_v17  ;;  %v3083_v51 = vpop.f32.mrf.mxu3  ;;  %v3096_v35 = vadd.f32 %v3095_v16, %v6387_v7  ;;  %v3144_v59 = vpop.f32.mrf.mxu1  ;;  %v6679_v17 = vld [vmem:[#allocation36_spill] sm:$0xff]  ;;  %v6680_v50 = vld [vmem:[#allocation37_spill] sm:$0xff] }
 0x375   : > { %v3084_v24 = vadd.f32 %v3083_v51, %v3035_v55  ;;  %v3145_v53 = vadd.f32 %v3144_v59, %v3096_v35  ;;  %3290 = vmatmul.bf16.vlgmr.msrb.gmra.mxu0 %v6673_v5 }
 0x376   : > { %3339 = vmatmul.bf16.vlgmr.msrb.gmra.mxu1 %v6674_v23 }
 0x377   : > { %vm3508_vm3 = vcmp.gt.f32.partialorder %v3084_v24, 0.0  ;;  %v3540_v48 = vmul.f32 0.01, %v3084_v24  ;;  %3388 = vmatmul.bf16.vlgmr.msrb.gmra.mxu2 %v6675_v0 }
 0x378   : > { %3437 = vmatmul.bf16.vlgmr.msrb.gmra.mxu3 %v6676_v25 }
 0x379   : > { %v3572_v47 = vsel %vm3508_vm3, %v3084_v24, %v3540_v48 }
 0x37a   : > { %v3589_v18 = vpack.c.bf16 %v3572_v47, %v3570_v30  ;;  %v3193_v40 = vpop.f32.mrf.mxu2  ;;  %v3097_v41 = vpop.f32.mrf.mxu0 }
 0x37b   : > { %v3194_v62 = vadd.f32 %v3193_v40, %v3145_v53  ;;  %v3242_v60 = vpop.f32.mrf.mxu3  ;;  %v3098_v46 = vadd.f32 %v3097_v41, %v6387_v7  ;;  %v3146_v54 = vpop.f32.mrf.mxu1 }
 0x37c   : > { %3597 = vmatpush.bf16.xpose.msra.mxu0 %v3589_v18  ;;  %v6681_v18 = vld [vmem:[#allocation38_spill] sm:$0xff] }
 0x37d   : > { %v6395_v42 = vadd.f32 %v3242_v60, %v3194_v62  ;;  %v3147_v34 = vadd.f32 %v3146_v54, %v3098_v46 }
 0x382   : > { %v3195_v43 = vpop.f32.mrf.mxu2  ;;  %v3100_v2 = vpop.f32.mrf.mxu0 }
 0x383   : > { %v3196_v39 = vadd.f32 %v3195_v43, %v3147_v34  ;;  %v3244_v61 = vpop.f32.mrf.mxu3  ;;  %v3101_v36 = vadd.f32 %v3100_v2, %v6387_v7  ;;  %v3149_v13 = vpop.f32.mrf.mxu1 }
 0x384   : > { %3598 = vmatpush.bf16.xpose.msra.mxu0 %v3587_v38 }
 0x385   : > { %v6398_v37 = vadd.f32 %v3244_v61, %v3196_v39  ;;  %v3150_v63 = vadd.f32 %v3149_v13, %v3101_v36  ;;  %3295 = vmatmul.bf16.gmra.mxu0 %v6677_v4 }
 0x386   : > { %3344 = vmatmul.bf16.gmra.mxu1 %v6678_v6 }
 0x387   : > { %3393 = vmatmul.bf16.gmra.mxu2 %v6679_v17 }
 0x388   : > { %3442 = vmatmul.bf16.gmra.mxu3 %v6680_v50 }
 0x38a   : > { %v3198_v55 = vpop.f32.mrf.mxu2  ;;  %v3102_v35 = vpop.f32.mrf.mxu0 }
 0x38b   : > { %v3199_v51 = vadd.f32 %v3198_v55, %v3150_v63  ;;  %v3247_v16 = vpop.f32.mrf.mxu3  ;;  %v3103_v59 = vadd.f32 %v3102_v35, %v6387_v7  ;;  %v3151_v27 = vpop.f32.mrf.mxu1  ;;  %v6685_v63 = vld [vmem:[#allocation42_spill] sm:$0xff] }
 0x38c   : > { %3599 = vmatpush.bf16.xpose.msra.mxu0 %v3585_v14  ;;  %v6684_v14 = vld [vmem:[#allocation41_spill] sm:$0xff] }
 0x38d   : > { %v6408_v38 = vadd.f32 %v3247_v16, %v3199_v51  ;;  %v3152_v24 = vadd.f32 %v3151_v27, %v3103_v59 }
 0x392   : > { %v3200_v53 = vpop.f32.mrf.mxu2  ;;  %v3105_v23 = vpop.f32.mrf.mxu0 }
 0x393   : > { %v3201_v5 = vadd.f32 %v3200_v53, %v3152_v24  ;;  %v3249_v48 = vpop.f32.mrf.mxu3  ;;  %v3106_v0 = vadd.f32 %v3105_v23, %v6387_v7  ;;  %v3154_v25 = vpop.f32.mrf.mxu1 }
 0x394   : > { %3600 = vmatpush.bf16.xpose.msra.mxu0 %v3583_v33 }
 0x395   : > { %v6414_v30 = vadd.f32 %v3249_v48, %v3201_v5  ;;  %v3155_v47 = vadd.f32 %v3154_v25, %v3106_v0  ;;  %3300 = vmatmul.bf16.gmra.mxu0 %v6681_v18  ;;  %v6689_v48 = vld [vmem:[#allocation46_spill] sm:$0xff] }
 0x396   : > { %3349 = vmatmul.bf16.gmra.mxu1 %v6682_v57 }
 0x397   : > { %3398 = vmatmul.bf16.gmra.mxu2 %v6683_v22 }
 0x398   : > { %3447 = vmatmul.bf16.gmra.mxu3 %v6684_v14 }
 0x39a   : > { %v3203_v40 = vpop.f32.mrf.mxu2  ;;  %v3107_v41 = vpop.f32.mrf.mxu0 }
 0x39b   : > { %v3204_v62 = vadd.f32 %v3203_v40, %v3155_v47  ;;  %v3252_v60 = vpop.f32.mrf.mxu3  ;;  %v3108_v46 = vadd.f32 %v3107_v41, %v6387_v7  ;;  %v3156_v54 = vpop.f32.mrf.mxu1 }
 0x39c   : > { %3601 = vmatpush.bf16.xpose.msra.mxu0 %v3581_v44  ;;  %v6688_v44 = vld [vmem:[#allocation45_spill] sm:$0xff] }
 0x39d   : > { %v6424_v26 = vadd.f32 %v3252_v60, %v3204_v62  ;;  %v3157_v11 = vadd.f32 %v3156_v54, %v3108_v46  ;;  %v6693_v54 = vld [vmem:[#allocation50_spill] sm:$0xff] }
 0x3a2   : > { %v3205_v33 = vpop.f32.mrf.mxu2  ;;  %v3110_v39 = vpop.f32.mrf.mxu0 }
 0x3a3   : > { %v3206_v34 = vadd.f32 %v3205_v33, %v3157_v11  ;;  %v3254_v43 = vpop.f32.mrf.mxu3  ;;  %v3111_v61 = vadd.f32 %v3110_v39, %v6387_v7  ;;  %v3159_v2 = vpop.f32.mrf.mxu1  ;;  %v6694_v11 = vld [vmem:[#allocation51_spill] sm:$0xff]  ;;  %v6695_v33 = vld [vmem:[#allocation52_spill] sm:$0xff] }
 0x3a4   : > { %3602 = vmatpush.bf16.xpose.msra.mxu0 %v3579_v15 }
 0x3a5   : > { %v6430_v36 = vadd.f32 %v3254_v43, %v3206_v34  ;;  %v3160_v13 = vadd.f32 %v3159_v2, %v3111_v61  ;;  %3305 = vmatmul.bf16.gmra.mxu0 %v6685_v63  ;;  %v6696_v34 = vld [vmem:[#allocation53_spill] sm:$0xff] }
 0x3a6   : > { %3354 = vmatmul.bf16.gmra.mxu1 %v6686_v56 }
 0x3a7   : > { %3403 = vmatmul.bf16.gmra.mxu2 %v6687_v10 }
 0x3a8   : > { %3452 = vmatmul.bf16.gmra.mxu3 %v6688_v44 }
 0x3aa   : > { %v3208_v4 = vpop.f32.mrf.mxu2  ;;  %v3112_v50 = vpop.f32.mrf.mxu0 }
 0x3ab   : > { %v3209_v6 = vadd.f32 %v3208_v4, %v3160_v13  ;;  %v3257_v17 = vpop.f32.mrf.mxu3  ;;  %v3113_v55 = vadd.f32 %v3112_v50, %v6387_v7  ;;  %v3161_v51 = vpop.f32.mrf.mxu1 }
 0x3ac   : > { %3603 = vmatpush.bf16.xpose.msra.mxu0 %v3577_v3  ;;  %v6692_v3 = vld [vmem:[#allocation49_spill] sm:$0xff] }
 0x3ad   : > { %v6440_v1 = vadd.f32 %v3257_v17, %v3209_v6  ;;  %v3162_v49 = vadd.f32 %v3161_v51, %v3113_v55 }
 0x3b2   : > { %v3210_v15 = vpop.f32.mrf.mxu2  ;;  %v3115_v59 = vpop.f32.mrf.mxu0 }
 0x3b3   : > { %v3211_v16 = vadd.f32 %v3210_v15, %v3162_v49  ;;  %v3259_v35 = vpop.f32.mrf.mxu3  ;;  %v3116_v27 = vadd.f32 %v3115_v59, %v6387_v7  ;;  %v3164_v24 = vpop.f32.mrf.mxu1 }
 0x3b4   : > { %3604 = vmatpush.bf16.xpose.msra.mxu0 %v3575_v20 }
 0x3b5   : > { %v6446_v53 = vadd.f32 %v3259_v35, %v3211_v16  ;;  %v3165_v5 = vadd.f32 %v3164_v24, %v3116_v27  ;;  %3310 = vmatmul.bf16.gmra.mxu0 %v6689_v48 }
 0x3b6   : > { %3359 = vmatmul.bf16.gmra.mxu1 %v6690_v28 }
 0x3b7   : > { %3408 = vmatmul.bf16.gmra.mxu2 %v6691_v29 }
 0x3b8   : > { %3457 = vmatmul.bf16.gmra.mxu3 %v6692_v3 }
 0x3ba   : > { %v3213_v23 = vpop.f32.mrf.mxu2  ;;  %v3117_v47 = vpop.f32.mrf.mxu0 }
 0x3bb   : > { %v3214_v0 = vadd.f32 %v3213_v23, %v3165_v5  ;;  %v3262_v25 = vpop.f32.mrf.mxu3  ;;  %v3166_v18 = vpop.f32.mrf.mxu1  ;;  %v3118_v52 = vadd.f32 %v3117_v47, %v6387_v7 }
 0x3bd   : > { %v6452_v57 = vadd.f32 %v3262_v25, %v3214_v0  ;;  %v3167_v31 = vadd.f32 %v3166_v18, %v3118_v52 }
 0x3c2   : > { %v3215_v20 = vpop.f32.mrf.mxu2  ;;  %v3120_v40 = vpop.f32.mrf.mxu0 }
 0x3c3   : > { %v3216_v22 = vadd.f32 %v3215_v20, %v3167_v31  ;;  %v3264_v14 = vpop.f32.mrf.mxu3  ;;  %v3121_v62 = vadd.f32 %v3120_v40, %v6387_v7  ;;  %v3169_v60 = vpop.f32.mrf.mxu1 }
 0x3c5   : > { %v6456_v41 = vadd.f32 %v3264_v14, %v3216_v22  ;;  %v3170_v46 = vadd.f32 %v3169_v60, %v3121_v62  ;;  %3315 = vmatmul.bf16.gmra.mxu0 %v6693_v54 }
 0x3c6   : > { %3364 = vmatmul.bf16.gmra.mxu1 %v6694_v11 }
 0x3c7   : > { %3413 = vmatmul.bf16.gmra.mxu2 %v6695_v33 }
 0x3c8   : > { %3462 = vmatmul.bf16.gmra.mxu3 %v6696_v34 }
 0x3ca   : > { %v3218_v43 = vpop.f32.mrf.mxu2  ;;  %v3122_v2 = vpop.f32.mrf.mxu0 }
 0x3cb   : > { %v3219_v39 = vadd.f32 %v3218_v43, %v3170_v46  ;;  %v3267_v61 = vpop.f32.mrf.mxu3  ;;  %v3123_v13 = vadd.f32 %v3122_v2, %v6387_v7  ;;  %v3171_v63 = vpop.f32.mrf.mxu1 }
 0x3cd   : > { %v6463_v56 = vadd.f32 %v3267_v61, %v3219_v39  ;;  %v3172_v10 = vadd.f32 %v3171_v63, %v3123_v13 }
 0x3d2   : > { %v3220_v44 = vpop.f32.mrf.mxu2  ;;  %v3125_v17 = vpop.f32.mrf.mxu0 }
 0x3d3   : > { %v3221_v4 = vadd.f32 %v3220_v44, %v3172_v10  ;;  %v3269_v6 = vpop.f32.mrf.mxu3  ;;  %v3126_v50 = vadd.f32 %v3125_v17, %v6387_v7  ;;  %v3174_v55 = vpop.f32.mrf.mxu1 }
 0x3d5   : > { %v6466_v51 = vadd.f32 %v3269_v6, %v3221_v4  ;;  %v3175_v49 = vadd.f32 %v3174_v55, %v3126_v50  ;;  %3320 = vmatmul.bf16.gmra.mxu0 %v6189_v12 }
 0x3d6   : > { %3369 = vmatmul.bf16.gmra.mxu1 %v6194_v19 }
 0x3d7   : > { %3418 = vmatmul.bf16.gmra.mxu2 %v6196_v21 }
 0x3d8   : > { %3467 = vmatmul.bf16.gmra.mxu3 %v6202_v8 }
 0x3da   : > { %v3223_v15 = vpop.f32.mrf.mxu2  ;;  %v3127_v59 = vpop.f32.mrf.mxu0 }
 0x3db   : > { %v3224_v16 = vadd.f32 %v3223_v15, %v3175_v49  ;;  %v3272_v35 = vpop.f32.mrf.mxu3  ;;  %v3128_v27 = vadd.f32 %v3127_v59, %v6387_v7  ;;  %v3176_v24 = vpop.f32.mrf.mxu1 }
 0x3dd   : > { %v6473_v5 = vadd.f32 %v3272_v35, %v3224_v16  ;;  %v3177_v48 = vadd.f32 %v3176_v24, %v3128_v27 }
 0x3e2   : > { %v3225_v28 = vpop.f32.mrf.mxu2  ;;  %v3130_v12 = vpop.f32.mrf.mxu0 }
 0x3e3   : > { %v3226_v29 = vadd.f32 %v3225_v28, %v3177_v48  ;;  %v3274_v3 = vpop.f32.mrf.mxu3  ;;  %v3131_v19 = vadd.f32 %v3130_v12, %v6387_v7  ;;  %v3179_v23 = vpop.f32.mrf.mxu1 }
 0x3e5   : > { %v6476_v21 = vadd.f32 %v3274_v3, %v3226_v29  ;;  %v3180_v8 = vadd.f32 %v3179_v23, %v3131_v19  ;;  %3325 = vmatmul.bf16.gmra.mxu0 %v6215_v32 }
 0x3e6   : > { %3374 = vmatmul.bf16.gmra.mxu1 %v6217_v58 }
 0x3e7   : > { %3423 = vmatmul.bf16.gmra.mxu2 %v6219_v9 }
 0x3e8   : > { %3472 = vmatmul.bf16.gmra.mxu3 %v6222_v45 }
 0x3ea   : > { %v3228_v0 = vpop.f32.mrf.mxu2  ;;  %v3132_v18 = vpop.f32.mrf.mxu0 }
 0x3eb   : > { %v3229_v25 = vadd.f32 %v3228_v0, %v3180_v8  ;;  %v3277_v47 = vpop.f32.mrf.mxu3  ;;  %v3133_v52 = vadd.f32 %v3132_v18, %v6387_v7  ;;  %v3181_v31 = vpop.f32.mrf.mxu1 }
 0x3ed   : > { %v6483_v20 = vadd.f32 %v3277_v47, %v3229_v25  ;;  %v3182_v22 = vadd.f32 %v3181_v31, %v3133_v52 }
 0x3f2   : > { %v3230_v14 = vpop.f32.mrf.mxu2  ;;  %v3291_v32 = vpop.f32.mrf.mxu0 }
 0x3f3   : > { %v3231_v40 = vadd.f32 %v3230_v14, %v3182_v22  ;;  %v3279_v62 = vpop.f32.mrf.mxu3  ;;  %v3292_v58 = vadd.f32 %v3291_v32, %v6395_v42  ;;  %v3340_v60 = vpop.f32.mrf.mxu1 }
 0x3f5   : > { %v6486_v9 = vadd.f32 %v3279_v62, %v3231_v40  ;;  %v3341_v45 = vadd.f32 %v3340_v60, %v3292_v58 }
 0x3fa   : > { %v3389_v46 = vpop.f32.mrf.mxu2  ;;  %v3293_v33 = vpop.f32.mrf.mxu0 }
 0x3fb   : > { %v3390_v54 = vadd.f32 %v3389_v46, %v3341_v45  ;;  %v3438_v11 = vpop.f32.mrf.mxu3  ;;  %v3294_v7 = vadd.f32 %v3293_v33, %v6398_v37  ;;  %v3342_v34 = vpop.f32.mrf.mxu1 }
 0x3fd   : > { %v3439_v43 = vadd.f32 %v3438_v11, %v3390_v54  ;;  %v3343_v39 = vadd.f32 %v3342_v34, %v3294_v7 }
 0x3ff   : > { %v3511_v44 = vmul.f32 0.01, %v3439_v43  ;;  %vm3479_vm4 = vcmp.gt.f32.partialorder %v3439_v43, 0.0 }
 0x401   : > { %v6490_v50 = vsel %vm3479_vm4, %v3439_v43, %v3511_v44 }
 0x402   : > { %v3391_v61 = vpop.f32.mrf.mxu2  ;;  %v3296_v63 = vpop.f32.mrf.mxu0 }
 0x403   : > { %v3392_v2 = vadd.f32 %v3391_v61, %v3343_v39  ;;  %v3440_v13 = vpop.f32.mrf.mxu3  ;;  %v3297_v10 = vadd.f32 %v3296_v63, %v6408_v38  ;;  %v3345_v42 = vpop.f32.mrf.mxu1 }
 0x405   : > { %v3441_v4 = vadd.f32 %v3440_v13, %v3392_v2  ;;  %v3346_v6 = vadd.f32 %v3345_v42, %v3297_v10 }
 0x407   : > { %vm3481_vm5 = vcmp.gt.f32.partialorder %v3441_v4, 0.0  ;;  %v3513_v17 = vmul.f32 0.01, %v3441_v4 }
 0x409   : > { %v6492_v55 = vsel %vm3481_vm5, %v3441_v4, %v3513_v17 }
 0x40a   : > { %v3394_v37 = vpop.f32.mrf.mxu2  ;;  %v3576_v49 = vpack.c.bf16 %v6492_v55, %v6490_v50  ;;  %v3298_v35 = vpop.f32.mrf.mxu0 }
 0x40b   : > { %v3395_v15 = vadd.f32 %v3394_v37, %v3346_v6  ;;  %v3443_v16 = vpop.f32.mrf.mxu3  ;;  %v3299_v38 = vadd.f32 %v3298_v35, %v6414_v30  ;;  %v3347_v59 = vpop.f32.mrf.mxu1 }
 0x40d   : > { %v3444_v27 = vadd.f32 %v3443_v16, %v3395_v15  ;;  %v3348_v24 = vadd.f32 %v3347_v59, %v3299_v38 }
 0x40f   : > { %v3515_v23 = vmul.f32 0.01, %v3444_v27  ;;  %vm3483_vm6 = vcmp.gt.f32.partialorder %v3444_v27, 0.0 }
 0x411   : > { %v6498_v47 = vsel %vm3483_vm6, %v3444_v27, %v3515_v23 }
 0x412   : > { %v3396_v48 = vpop.f32.mrf.mxu2  ;;  %v3301_v3 = vpop.f32.mrf.mxu0 }
 0x413   : > { %v3397_v28 = vadd.f32 %v3396_v48, %v3348_v24  ;;  %v3445_v29 = vpop.f32.mrf.mxu3  ;;  %v3302_v12 = vadd.f32 %v3301_v3, %v6424_v26  ;;  %v3350_v19 = vpop.f32.mrf.mxu1 }
 0x415   : > { %v3446_v8 = vadd.f32 %v3445_v29, %v3397_v28  ;;  %v3351_v0 = vadd.f32 %v3350_v19, %v3302_v12 }
 0x417   : > { %vm3485_vm7 = vcmp.gt.f32.partialorder %v3446_v8, 0.0  ;;  %v3517_v25 = vmul.f32 0.01, %v3446_v8 }
 0x419   : > { %v6500_v18 = vsel %vm3485_vm7, %v3446_v8, %v3517_v25 }
 0x41a   : > { %v3399_v30 = vpop.f32.mrf.mxu2  ;;  %v3578_v52 = vpack.c.bf16 %v6500_v18, %v6498_v47  ;;  %v3303_v14 = vpop.f32.mrf.mxu0 }
 0x41b   : > { %v3400_v31 = vadd.f32 %v3399_v30, %v3351_v0  ;;  %v3448_v22 = vpop.f32.mrf.mxu3  ;;  %v3304_v26 = vadd.f32 %v3303_v14, %v6430_v36  ;;  %v3352_v40 = vpop.f32.mrf.mxu1 }
 0x41d   : > { %v3449_v62 = vadd.f32 %v3448_v22, %v3400_v31  ;;  %v3353_v32 = vadd.f32 %v3352_v40, %v3304_v26 }
 0x41f   : > { %v3519_v33 = vmul.f32 0.01, %v3449_v62  ;;  %vm3487_vm8 = vcmp.gt.f32.partialorder %v3449_v62, 0.0 }
 0x421   : > { %v6506_v39 = vsel %vm3487_vm8, %v3449_v62, %v3519_v33 }
 0x422   : > { %v3401_v58 = vpop.f32.mrf.mxu2  ;;  %v3306_v46 = vpop.f32.mrf.mxu0 }
 0x423   : > { %v3402_v60 = vadd.f32 %v3401_v58, %v3353_v32  ;;  %v3450_v45 = vpop.f32.mrf.mxu3  ;;  %v3307_v54 = vadd.f32 %v3306_v46, %v6440_v1  ;;  %v3355_v11 = vpop.f32.mrf.mxu1 }
 0x425   : > { %v3451_v7 = vadd.f32 %v3450_v45, %v3402_v60  ;;  %v3356_v34 = vadd.f32 %v3355_v11, %v3307_v54 }
 0x427   : > { %vm3489_vm9 = vcmp.gt.f32.partialorder %v3451_v7, 0.0  ;;  %v3521_v43 = vmul.f32 0.01, %v3451_v7 }
 0x429   : > { %v6508_v61 = vsel %vm3489_vm9, %v3451_v7, %v3521_v43 }
 0x42a   : > { %v3404_v36 = vpop.f32.mrf.mxu2  ;;  %v3580_v2 = vpack.c.bf16 %v6508_v61, %v6506_v39  ;;  %v3308_v10 = vpop.f32.mrf.mxu0 }
 0x42b   : > { %v3405_v13 = vadd.f32 %v3404_v36, %v3356_v34  ;;  %v3453_v63 = vpop.f32.mrf.mxu3  ;;  %v3309_v1 = vadd.f32 %v3308_v10, %v6446_v53  ;;  %v3357_v42 = vpop.f32.mrf.mxu1 }
 0x42d   : > { %v3454_v44 = vadd.f32 %v3453_v63, %v3405_v13  ;;  %v3358_v4 = vadd.f32 %v3357_v42, %v3309_v1 }
 0x42f   : > { %v3523_v38 = vmul.f32 0.01, %v3454_v44  ;;  %vm3491_vm10 = vcmp.gt.f32.partialorder %v3454_v44, 0.0 }
 0x431   : > { %v6514_v48 = vsel %vm3491_vm10, %v3454_v44, %v3523_v38 }
 0x432   : > { %v3406_v6 = vpop.f32.mrf.mxu2  ;;  %v3311_v15 = vpop.f32.mrf.mxu0 }
 0x433   : > { %v3407_v17 = vadd.f32 %v3406_v6, %v3358_v4  ;;  %v3455_v37 = vpop.f32.mrf.mxu3  ;;  %v3312_v16 = vadd.f32 %v3311_v15, %v6452_v57  ;;  %v3360_v35 = vpop.f32.mrf.mxu1 }
 0x435   : > { %v3456_v59 = vadd.f32 %v3455_v37, %v3407_v17  ;;  %v3361_v27 = vadd.f32 %v3360_v35, %v3312_v16 }
 0x437   : > { %vm3493_vm11 = vcmp.gt.f32.partialorder %v3456_v59, 0.0  ;;  %v3525_v24 = vmul.f32 0.01, %v3456_v59 }
 0x439   : > { %v6516_v28 = vsel %vm3493_vm11, %v3456_v59, %v3525_v24 }
 0x43a   : > { %v3409_v53 = vpop.f32.mrf.mxu2  ;;  %v3582_v29 = vpack.c.bf16 %v6516_v28, %v6514_v48  ;;  %v3313_v19 = vpop.f32.mrf.mxu0 }
 0x43b   : > { %v3410_v3 = vadd.f32 %v3409_v53, %v3361_v27  ;;  %v3458_v12 = vpop.f32.mrf.mxu3  ;;  %v3314_v57 = vadd.f32 %v3313_v19, %v6456_v41  ;;  %v3362_v23 = vpop.f32.mrf.mxu1 }
 0x43d   : > { %v3459_v8 = vadd.f32 %v3458_v12, %v3410_v3  ;;  %v3363_v0 = vadd.f32 %v3362_v23, %v3314_v57 }
 0x43f   : > { %v3527_v26 = vmul.f32 0.01, %v3459_v8  ;;  %vm3495_vm12 = vcmp.gt.f32.partialorder %v3459_v8, 0.0 }
 0x441   : > { %v6522_v58 = vsel %vm3495_vm12, %v3459_v8, %v3527_v26 }
 0x442   : > { %v3411_v25 = vpop.f32.mrf.mxu2  ;;  %v3316_v22 = vpop.f32.mrf.mxu0 }
 0x443   : > { %v3412_v30 = vadd.f32 %v3411_v25, %v3363_v0  ;;  %v3460_v31 = vpop.f32.mrf.mxu3  ;;  %v3365_v14 = vpop.f32.mrf.mxu1  ;;  %v3317_v32 = vadd.f32 %v3316_v22, %v6463_v56 }
 0x445   : > { %v3461_v40 = vadd.f32 %v3460_v31, %v3412_v30  ;;  %v3366_v46 = vadd.f32 %v3365_v14, %v3317_v32 }
 0x447   : > { %vm3497_vm13 = vcmp.gt.f32.partialorder %v3461_v40, 0.0  ;;  %v3529_v62 = vmul.f32 0.01, %v3461_v40 }
 0x449   : > { %v6524_v60 = vsel %vm3497_vm13, %v3461_v40, %v3529_v62 }
 0x44a   : > { %v3414_v41 = vpop.f32.mrf.mxu2  ;;  %v3584_v45 = vpack.c.bf16 %v6524_v60, %v6522_v58  ;;  %v3318_v11 = vpop.f32.mrf.mxu0 }
 0x44b   : > { %v3463_v54 = vpop.f32.mrf.mxu3  ;;  %v3367_v33 = vpop.f32.mrf.mxu1  ;;  %v3415_v7 = vadd.f32 %v3414_v41, %v3366_v46  ;;  %v3319_v34 = vadd.f32 %v3318_v11, %v6466_v51 }
 0x44d   : > { %v3464_v43 = vadd.f32 %v3463_v54, %v3415_v7  ;;  %v3368_v36 = vadd.f32 %v3367_v33, %v3319_v34 }
 0x44f   : > { %v3531_v42 = vmul.f32 0.01, %v3464_v43  ;;  %vm3499_vm14 = vcmp.gt.f32.partialorder %v3464_v43, 0.0 }
 0x451   : > { %v3563_v17 = vsel %vm3499_vm14, %v3464_v43, %v3531_v42  ;;  %v3623_v42 = vld [vmem:[#allocation3] sm:$0x1] }
 0x452   : > { %v3416_v13 = vpop.f32.mrf.mxu2  ;;  %v3321_v10 = vpop.f32.mrf.mxu0 }
 0x453   : > { %v3417_v63 = vadd.f32 %v3416_v13, %v3368_v36  ;;  %v3465_v56 = vpop.f32.mrf.mxu3  ;;  %v3370_v1 = vpop.f32.mrf.mxu1  ;;  %v3322_v6 = vadd.f32 %v3321_v10, %v6473_v5  ;;  %v3574_v10 = vld [vmem:[%s380_s12] sm:$0x3] }
 0x454   : > { %3592 = vst [vmem:[#allocation1] ss:$9 sm:$0xff] %v3574_v10 }
 0x455   : > { %v3466_v44 = vadd.f32 %v3465_v56, %v3417_v63  ;;  %v3371_v35 = vadd.f32 %v3370_v1, %v3322_v6 }
 0x457   : > { %vm3501_vm0 = vcmp.gt.f32.partialorder %v3466_v44, 0.0  ;;  %v3533_v4 = vmul.f32 0.01, %v3466_v44 }
 0x459   : > { %v3565_v37 = vsel %vm3501_vm0, %v3466_v44, %v3533_v4 }
 0x45a   : > { %v3419_v15 = vpop.f32.mrf.mxu2  ;;  %v3586_v16 = vpack.c.bf16 %v3565_v37, %v3563_v17  ;;  %v3323_v38 = vpop.f32.mrf.mxu0 }
 0x45b   : > { %v3468_v51 = vpop.f32.mrf.mxu3  ;;  %v3372_v59 = vpop.f32.mrf.mxu1  ;;  %v3420_v27 = vadd.f32 %v3419_v15, %v3371_v35  ;;  %v3324_v24 = vadd.f32 %v3323_v38, %v6476_v21  ;;  %v3594_v1 = vld [vmem:[#allocation1 + $0x9] sm:$0xff] }
 0x45d   : > { %v3469_v53 = vadd.f32 %v3468_v51, %v3420_v27  ;;  %v3373_v3 = vadd.f32 %v3372_v59, %v3324_v24 }
 0x45f   : > { %v3535_v8 = vmul.f32 0.01, %v3469_v53  ;;  %vm3503_vm15 = vcmp.gt.f32.partialorder %v3469_v53, 0.0 }
 0x461   : > { %v3567_v31 = vsel %vm3503_vm15, %v3469_v53, %v3535_v8 }
 0x462   : > { %v3421_v12 = vpop.f32.mrf.mxu2  ;;  %v3326_v23 = vpop.f32.mrf.mxu0 }
 0x463   : > { %v3422_v19 = vadd.f32 %v3421_v12, %v3373_v3  ;;  %v3470_v57 = vpop.f32.mrf.mxu3  ;;  %v3375_v5 = vpop.f32.mrf.mxu1  ;;  %v3327_v30 = vadd.f32 %v3326_v23, %v6483_v20 }
 0x465   : > { %v3471_v0 = vadd.f32 %v3470_v57, %v3422_v19  ;;  %v3376_v40 = vadd.f32 %v3375_v5, %v3327_v30 }
 0x467   : > { %vm3505_vm1 = vcmp.gt.f32.partialorder %v3471_v0, 0.0  ;;  %v3537_v25 = vmul.f32 0.01, %v3471_v0 }
 0x469   : > { %v3569_v22 = vsel %vm3505_vm1, %v3471_v0, %v3537_v25 }
 0x46a   : > { %v3424_v14 = vpop.f32.mrf.mxu2  ;;  %v3588_v26 = vpack.c.bf16 %v3569_v22, %v3567_v31  ;;  %v3328_v62 = vpop.f32.mrf.mxu0 }
 0x46b   : > { %v3473_v21 = vpop.f32.mrf.mxu3  ;;  %v3425_v32 = vadd.f32 %v3424_v14, %v3376_v40  ;;  %v3329_v41 = vadd.f32 %v3328_v62, %v6486_v9  ;;  %v3377_v46 = vpop.f32.mrf.mxu1  ;;  %v3593_v9 = vld [vmem:[#allocation1] sm:$0xff] }
 0x46c   : > { %3605 = vmatmul.bf16.vlgmr.msra.gmra.mxu0 %v3593_v9 }
 0x46d   : > { %v3474_v54 = vadd.f32 %v3473_v21, %v3425_v32  ;;  %v3378_v11 = vadd.f32 %v3377_v46, %v3329_v41 }
 0x46f   : > { %v3539_v43 = vmul.f32 0.01, %v3474_v54  ;;  %vm3507_vm2 = vcmp.gt.f32.partialorder %v3474_v54, 0.0 }
 0x471   : > { %v3571_v13 = vsel %vm3507_vm2, %v3474_v54, %v3539_v43 }
 0x472   : > { %v3426_v33 = vpop.f32.mrf.mxu2 }
 0x473   : > { %v3427_v7 = vadd.f32 %v3426_v33, %v3378_v11  ;;  %v3475_v34 = vpop.f32.mrf.mxu3 }
 0x475   : > { %v3476_v36 = vadd.f32 %v3475_v34, %v3427_v7 }
 0x477   : > { %vm3509_vm3 = vcmp.gt.f32.partialorder %v3476_v36, 0.0  ;;  %v3541_v20 = vmul.f32 0.01, %v3476_v36 }
 0x479   : > { %v3573_v63 = vsel %vm3509_vm3, %v3476_v36, %v3541_v20 }
 0x47a   : > { %v3590_v56 = vpack.c.bf16 %v3573_v63, %v3571_v13 }
 0x47c   : > { %3610 = vmatpush.bf16.xpose.msra.mxu1 %v3590_v56 }
 0x484   : > { %3611 = vmatpush.bf16.xpose.msra.mxu1 %v3588_v26 }
 0x48c   : > { %3612 = vmatpush.bf16.xpose.msra.mxu1 %v3586_v16 }
 0x494   : > { %3613 = vmatpush.bf16.xpose.msra.mxu1 %v3584_v45 }
 0x49c   : > { %3614 = vmatpush.bf16.xpose.msra.mxu1 %v3582_v29 }
 0x4a4   : > { %3615 = vmatpush.bf16.xpose.msra.mxu1 %v3580_v2 }
 0x4ac   : > { %3616 = vmatpush.bf16.xpose.msra.mxu1 %v3578_v52 }
 0x4b4   : > { %3617 = vmatpush.bf16.xpose.msra.mxu1 %v3576_v49 }
 0x4bb   : > { %3618 = vmatmul.bf16.vlgmr.msra.gmra.mxu1 %v3594_v1 }
 0x4e9   : > { %v3606_v58 = vpop.f32.mrf.mxu0 }
 0x4f1   : > { %v3608_v60 = vpop.f32.mrf.mxu0 }
 0x538   : > { %v3619_v45 = vpop.f32.mrf.mxu1 }
 0x539   : > { %v3620_v48 = vadd.f32 %v3619_v45, %v3606_v58 }
 0x53b   : > { %v3624_v28 = vadd.f32 %v3623_v42, %v3620_v48 }
 0x53c   : > { %3629 = sbr.rel (%p4731_p2) target bundleno = 1365 (0x555), region = 76 }
 0x53d   : > { %3625 = vst [vmem:[#allocation3] sm:$0x1] %v3624_v28 }
 0x540   : > { %v3621_v29 = vpop.f32.mrf.mxu1 }
 0x541   : > { %v3632_v18 = vstv %s3631_s26 }
 0x544   : > { %v3630_v47 = vld [vmem:[#allocation3] sm:$0x1] }
 0x545   : > { %v3633_v52 = vadd.f32 %v3632_v18, %v3630_v47 }
 0x547   : > { %v3634_v39 = vmul.f32 0.5, %v3633_v52 }
 0x549   : > { %5052 = vtanh.f32 %v3634_v39 }
 0x54f   : > { %v5053_v50 = vpop.eup %5052 }
 0x550   : > { %v3636_v55 = vadd.f32 1.0, %v5053_v50 }
 0x552   : > { %v3637_v49 = vmul.f32 0.5, %v3636_v55 }
 0x554   : > { %3638 = vst [vmem:[#allocation13] sm:$0x1] %v3637_v49 }
 0x555 PF: > { %p4993_p3 = scmp.eq.s32.totalorder %s5376_s6, 3  ;;  %s6698_s14 = sld [smem:[#allocation56_spill]] }
 0x556   : > { %s5303_s9 = smov [#allocation13]  }
 0x557   : > { %s3646_s16 = sshll.u32 %s5303_s9, 4  ;;  %s3647_s16 = int_to_ptr.vmem [resolvable:$true] %s3646_s16 }
 0x55b   : > { %s3648_s11 = sshll.u32 %s6698_s14, 4  ;;  %s3649_s11 = int_to_ptr.hbm [resolvable:$true] %s3648_s11 }
 0x55c   : > { %4968 = dma.vmem_to_hbm [thread:$0]  (%p4993_p3), %s3647_s16, 16, %s3649_s11, [#allocation7]  }
 0x55d   : > { %5269 = dma.done.wait (%p4993_p3), [#allocation7], 16  }
 0x55e   : > { %5271 = vsyncadd (%p4993_p3), [#allocation7], 4294967280 }
 0x55f PF: > { %s6699_s23 = sld [smem:[#allocation19_spill]]  ;;  %s6701_s26 = smov %s5278_s27 }
 0x560   : > { %s6700_s6 = sld [smem:[#allocation20_spill]]  ;;  %s6702_s27 = smov %s5282_s28 }
 0x561   : > { %s6703_s28 = smov %s5434_s20  ;;  %s6704_s29 = smov %s5290_s30 }
 0x565   : > { %s21_s8 = sadd.s32 1, %s6699_s23  }
 0x566   : > { %p18_p4 = scmp.ge.s32.totalorder %s21_s8, 6   ;;  %s6705_s30 = smov %s6700_s6 }
 0x568   :  { %20 = sbr.rel (!%p18_p4) target bundleno = 10 (0xa), region = 126 }
 0x56d   :  { %3662 = vsyncpa [#allocation6], 1 }
 0x56e   :  { %3664 = vsyncpa [#allocation6 + $0x1], 1 }
 0x56f   :  { %3665 = vsyncpa [#allocation9], 1 }
 0x570   :  { %3666 = vsyncpa [#allocation7], 1 }
 0x571   :  { %3668 = vsyncpa [#allocation7 + $0x1], 1 }

</bundles_post_ra>
